<compile_context>
chip_gen: v7x
topology: tpu7x:2x2x1
jax: 0.10.0
libtpu: 0.0.40
codegen_flags: <defaults>
</compile_context>

<pallas_src>
import math
import numpy as np

import jax
import jax.numpy as jnp
from jax.experimental import pallas as pl
from jax.experimental.pallas import tpu as pltpu


def _cdiv(a: int, b: int) -> int:
    return -(-a // b)


def _ceil_to(a: int, m: int) -> int:
    return _cdiv(a, m) * m


def _pe_kernel(x_ref, e_ref, mul_ref, phase_ref, mask_ref, o_ref):
    """x_ref:(R, Gd) in-dtype; e_ref:(K, Gout) bf16 0/1 expansion (K = Gd or 3*Gd);
    mul_ref:(1, Gout) f32 per-lane multiplier (1 or freq*pi);
    phase_ref:(1, Gout) f32 per-lane phase (0 for input/sin lanes, pi/2 for cos lanes);
    mask_ref:(1, Gout) f32, 1.0 on include_input pass-through lanes;
    o_ref:(R, Gout) in-dtype."""
    if x_ref.dtype == jnp.bfloat16:
        # bf16 input: already exact in bf16, single gather matmul (K = Gd).
        xs = x_ref[...]
    else:
        x = x_ref[...].astype(jnp.float32)                   # (R, Gd), lane-dense
        # Exact 3-way bf16 split so the bf16 MXU gather reconstructs x to ~f32,
        # fused into one K=3*Gd matmul against the stacked [e;e;e] matrix.
        x_hi = x.astype(jnp.bfloat16)
        r1 = x - x_hi.astype(jnp.float32)
        x_mid = r1.astype(jnp.bfloat16)
        x_lo = (r1 - x_mid.astype(jnp.float32)).astype(jnp.bfloat16)
        xs = jnp.concatenate([x_hi, x_mid, x_lo], axis=-1)   # (R, 3*Gd)

    gathered = jnp.dot(xs, e_ref[...], preferred_element_type=jnp.float32)  # (R, Gout)

    arg = gathered * mul_ref[...] + phase_ref[...]           # full-lane VPU FMA
    s = jnp.sin(arg)                                         # single sin; cos via phase
    is_input = mask_ref[...] != 0.0                          # (1, Gout), computed once/step
    o_ref[...] = jnp.where(is_input, gathered, s).astype(o_ref.dtype)  # lane-dense store


def positional_encoding(
    x,
    num_encoding_functions: int = 6,
    include_input: bool = True,
    log_sampling: bool = True,
    block_super_rows: int = 512,
):
    """Matches PositionalEncoding.forward semantics (computes in f32, stores in x.dtype)."""
    orig_shape = x.shape
    d = orig_shape[-1]
    F = num_encoding_functions

    if F <= 0:
        # Module: no frequency bands -> forward returns x (cat([x]) == x).
        return x

    orig_dtype = x.dtype
    compute_dtype = orig_dtype if orig_dtype in (jnp.float32, jnp.bfloat16) else jnp.float32
    xk = x.astype(compute_dtype)

    # frequency_bands buffer, identical to the module's __init__.
    if log_sampling:
        bands = (2.0 ** np.linspace(0.0, F - 1, F)).astype(np.float32)
    else:
        bands = np.linspace(1.0, 2.0 ** (F - 1), F).astype(np.float32)

    n_comp = (1 if include_input else 0) + 2 * F
    out_d = n_comp * d

    # Lane packing: fold G consecutive rows into one super-row of Gd lanes,
    # with Gd = lcm(d, 128) so both Gd and Gout are exact multiples of 128.
    G = max(1, math.lcm(d, 128) // d)
    Gd = G * d
    Gout = G * out_d
    # TODO(synk): for very large last-dim d the (K, Gout) expansion matrix gets big;
    # a non-gather variant would be preferable there (not needed for NeRF-style d=2/3).

    # Host-side constant per-lane tables for one super-row.
    lane = np.arange(Gout)
    comp = (lane % out_d) // d        # output component index per lane
    g = lane // out_d                 # packed-row index per lane
    j = lane % d                      # coordinate index per lane
    src = g * d + j                   # source lane in the packed input super-row
    e01 = np.zeros((Gd, Gout), np.float32)
    e01[src, lane] = 1.0
    fpi = bands * np.float32(math.pi)
    if include_input:
        comp_mul = np.concatenate([[1.0], np.repeat(fpi, 2)])
        comp_phase = np.concatenate([[0.0], np.tile([0.0, math.pi / 2.0], F)])
        comp_isin = np.concatenate([[1.0], np.zeros(2 * F)])
    else:
        comp_mul = np.repeat(fpi, 2)
        comp_phase = np.tile([0.0, math.pi / 2.0], F)
        comp_isin = np.zeros(2 * F)
    mul = comp_mul.astype(np.float32)[comp][None, :]          # (1, Gout)
    phase = comp_phase.astype(np.float32)[comp][None, :]      # (1, Gout)
    inmask = comp_isin.astype(np.float32)[comp][None, :]      # (1, Gout)

    # f32 path uses a fused K=3*Gd gather (x split into hi/mid/lo bf16 parts);
    # bf16 path is exact with a single K=Gd gather.
    if compute_dtype == jnp.bfloat16:
        e_stack = e01
    else:
        e_stack = np.vstack([e01, e01, e01])
    K = e_stack.shape[0]

    # Flatten rows, pad to a whole number of blocks of super-rows.
    x2 = xk.reshape(-1, d)
    n = x2.shape[0]
    n_super = _cdiv(n, G)

    # Block count: >=2 blocks (and an even count) when there is enough work so
    # both v7x TensorCores get balanced step counts; single block for tiny inputs.
    nb = _cdiv(n_super, block_super_rows)
    if n_super > 8 and nb < 2:
        nb = 2
    if nb > 1 and nb % 2 == 1:
        nb += 1
    R = max(8, _ceil_to(_cdiv(n_super, nb), 8))
    n_super_pad = R * nb
    rows_pad = n_super_pad * G
    if rows_pad != n:
        x2 = jnp.pad(x2, ((0, rows_pad - n), (0, 0)))
    x_packed = x2.reshape(n_super_pad, Gd)                    # free row-major reshape

    # VMEM budget sized from the actual tile footprint (double-buffered I/O tiles,
    # resident constants, f32 intermediates), capped well under v7x's 64 MiB.
    isz = jnp.dtype(compute_dtype).itemsize
    tile_io = R * (Gd + Gout) * isz
    const_bytes = K * Gout * 2 + 3 * Gout * 4
    interm = R * (K * 2 + 4 * Gout * 4)
    vmem_limit = int(min(48 << 20, max(16 << 20, 2 * tile_io + 2 * const_bytes + interm + (4 << 20))))

    out = pl.pallas_call(
        _pe_kernel,
        out_shape=jax.ShapeDtypeStruct((n_super_pad, Gout), compute_dtype),
        grid=(n_super_pad // R,),
        in_specs=[
            pl.BlockSpec((R, Gd), lambda i: (i, 0)),          # packed rows of x
            pl.BlockSpec((K, Gout), lambda i: (0, 0)),        # stacked expansion matrix (fetched once)
            pl.BlockSpec((1, Gout), lambda i: (0, 0)),        # per-lane multiplier
            pl.BlockSpec((1, Gout), lambda i: (0, 0)),        # per-lane phase (cos = sin(z + pi/2))
            pl.BlockSpec((1, Gout), lambda i: (0, 0)),        # include_input lane mask
        ],
        out_specs=pl.BlockSpec((R, Gout), lambda i: (i, 0)),
        compiler_params=pltpu.CompilerParams(
            dimension_semantics=("parallel",),
            vmem_limit_bytes=vmem_limit,
        ),
    )(
        x_packed,
        jnp.asarray(e_stack, jnp.bfloat16),
        jnp.asarray(mul),
        jnp.asarray(phase),
        jnp.asarray(inmask),
    )

    out = out.reshape(rows_pad, out_d)                        # free row-major reshape
    if rows_pad != n:
        out = out[:n]
    out = out.reshape(*orig_shape[:-1], out_d)
    return out.astype(orig_dtype)


def _reference(x, F=6, include_input=True, log_sampling=True):
    if log_sampling:
        bands = 2.0 ** jnp.linspace(0.0, F - 1, F)
    else:
        bands = jnp.linspace(1.0, 2.0 ** (F - 1), F)
    parts = [x] if include_input else []
    for f in bands:
        parts.append(jnp.sin(x * f * math.pi))
        parts.append(jnp.cos(x * f * math.pi))
    return jnp.concatenate(parts, axis=-1)


if __name__ == "__main__":
    key = jax.random.PRNGKey(0)
    F = 6

    # Coordinates as the module implies (get_output_dim default input_dims=2):
    # batch=2, seq=8, coord dims=2.
    x2 = jax.random.normal(key, (2, 8, 2), dtype=jnp.float32)
    out2 = jax.block_until_ready(positional_encoding(x2, num_encoding_functions=F))
    ref2 = _reference(x2, F=F)
    assert out2.shape == (2, 8, 2 + F * 2 * 2), out2.shape
    err2 = float(jnp.max(jnp.abs(out2 - ref2)))
    # 1e-4 tolerance: sin/cos of arguments up to ~|x|*32*pi are only defined to
    # ~|arg|*eps_f32, and kernel/reference associate the product differently
    # (plus the exact cos = sin(z + pi/2) phase rewrite perturbs arg by ~1 ulp).
    assert err2 < 1e-4, err2

    # NeRF-style 3-D coordinates exercise the lcm-based lane-packing path.
    x3 = jax.random.normal(jax.random.PRNGKey(1), (2, 8, 3), dtype=jnp.float32)
    out3 = jax.block_until_ready(positional_encoding(x3, num_encoding_functions=F))
    ref3 = _reference(x3, F=F)
    assert out3.shape == (2, 8, 3 + F * 2 * 3), out3.shape
    err3 = float(jnp.max(jnp.abs(out3 - ref3)))
    assert err3 < 1e-4, err3

    print("KERNEL_OK")
</pallas_src>

<mosaic_0001>
module attributes {stable_mosaic.version = 11 : i64} {
  func.func @_pe_kernel(%arg0: i32, %arg1: memref<8x128xf32, #tpu.memory_space<vmem>>, %arg2: memref<384x1664xbf16, #tpu.memory_space<vmem>>, %arg3: memref<1x1664xf32, #tpu.memory_space<vmem>>, %arg4: memref<1x1664xf32, #tpu.memory_space<vmem>>, %arg5: memref<1x1664xf32, #tpu.memory_space<vmem>>, %arg6: memref<8x1664xf32, #tpu.memory_space<vmem>>) attributes {dimension_semantics = [#tpu.dimension_semantics<parallel>], iteration_bounds = array<i64: 1>, scalar_prefetch = 0 : i64, scratch_operands = 0 : i64, tpu.core_type = #tpu.core_type<tc>, window_params = [{transform_indices = @transform_0, window_bounds = array<i64: 8, 128>}, {pipeline_mode = #tpu.pipeline_mode<synchronous>, transform_indices = @transform_1, window_bounds = array<i64: 384, 1664>}, {pipeline_mode = #tpu.pipeline_mode<synchronous>, transform_indices = @transform_2, window_bounds = array<i64: 1, 1664>}, {pipeline_mode = #tpu.pipeline_mode<synchronous>, transform_indices = @transform_3, window_bounds = array<i64: 1, 1664>}, {pipeline_mode = #tpu.pipeline_mode<synchronous>, transform_indices = @transform_4, window_bounds = array<i64: 1, 1664>}, {transform_indices = @transform_5, window_bounds = array<i64: 8, 1664>}]} {
    %c0 = arith.constant 0 : index
    %c0_0 = arith.constant 0 : index
    %0 = vector.load %arg1[%c0, %c0_0] : memref<8x128xf32, #tpu.memory_space<vmem>>, vector<8x128xf32>
    %1 = arith.truncf %0 : vector<8x128xf32> to vector<8x128xbf16>
    %2 = arith.extf %1 : vector<8x128xbf16> to vector<8x128xf32>
    %3 = arith.subf %0, %2 : vector<8x128xf32>
    %4 = arith.truncf %3 : vector<8x128xf32> to vector<8x128xbf16>
    %5 = arith.extf %4 : vector<8x128xbf16> to vector<8x128xf32>
    %6 = arith.subf %3, %5 : vector<8x128xf32>
    %7 = arith.truncf %6 : vector<8x128xf32> to vector<8x128xbf16>
    %8 = tpu.concatenate %1, %4, %7 in 1 : vector<8x128xbf16>, vector<8x128xbf16>, vector<8x128xbf16> -> vector<8x384xbf16>
    %c0_1 = arith.constant 0 : index
    %c0_2 = arith.constant 0 : index
    %9 = vector.load %arg2[%c0_1, %c0_2] : memref<384x1664xbf16, #tpu.memory_space<vmem>>, vector<384x1664xbf16>
    %cst = arith.constant dense<0.000000e+00> : vector<8x1664xf32>
    %10 = tpu.matmul %8, %9, %cst {dimension_numbers = #tpu.dot_dimension_numbers<[1], [0], [0], [1], [0, 0, 1, 1], [], []>} : vector<8x384xbf16>, vector<384x1664xbf16>, vector<8x1664xf32> -> vector<8x1664xf32>
    %c0_3 = arith.constant 0 : index
    %c0_4 = arith.constant 0 : index
    %11 = vector.load %arg3[%c0_3, %c0_4] : memref<1x1664xf32, #tpu.memory_space<vmem>>, vector<1x1664xf32>
    %12 = vector.broadcast %11 : vector<1x1664xf32> to vector<8x1664xf32>
    %13 = arith.mulf %10, %12 : vector<8x1664xf32>
    %c0_5 = arith.constant 0 : index
    %c0_6 = arith.constant 0 : index
    %14 = vector.load %arg4[%c0_5, %c0_6] : memref<1x1664xf32, #tpu.memory_space<vmem>>, vector<1x1664xf32>
    %15 = vector.broadcast %14 : vector<1x1664xf32> to vector<8x1664xf32>
    %16 = arith.addf %13, %15 : vector<8x1664xf32>
    %17 = math.sin %16 : vector<8x1664xf32>
    %c0_7 = arith.constant 0 : index
    %c0_8 = arith.constant 0 : index
    %18 = vector.load %arg5[%c0_7, %c0_8] : memref<1x1664xf32, #tpu.memory_space<vmem>>, vector<1x1664xf32>
    %cst_9 = arith.constant 0.000000e+00 : f32
    %19 = vector.broadcast %cst_9 : f32 to vector<1x1664xf32>
    %20 = arith.cmpf one, %18, %19 : vector<1x1664xf32>
    %21 = vector.shape_cast %20 : vector<1x1664xi1> to vector<1x1664xi1>
    %22 = vector.broadcast %21 : vector<1x1664xi1> to vector<8x1664xi1>
    %23 = arith.select %22, %10, %17 : vector<8x1664xi1>, vector<8x1664xf32>
    %c0_10 = arith.constant 0 : index
    %c0_11 = arith.constant 0 : index
    %24 = vector.load %arg6[%c0_10, %c0_11] : memref<8x1664xf32, #tpu.memory_space<vmem>>, vector<8x1664xf32>
    tpu.vector_store %arg6[%c0_10, %c0_11], %23 {strides = array<i32>} : memref<8x1664xf32, #tpu.memory_space<vmem>>, vector<8x1664xf32>,
    return
  }
  func.func @transform_0(%arg0: i32) -> (i32, i32) {
    %c0_i32 = arith.constant 0 : i32
    %c0_i32_0 = arith.constant 0 : i32
    return %arg0, %c0_i32 : i32, i32
  }
  func.func @transform_1(%arg0: i32) -> (i32, i32) {
    %c0_i32 = arith.constant 0 : i32
    %c0_i32_0 = arith.constant 0 : i32
    %c0_i32_1 = arith.constant 0 : i32
    return %c0_i32, %c0_i32_0 : i32, i32
  }
  func.func @transform_2(%arg0: i32) -> (i32, i32) {
    %c0_i32 = arith.constant 0 : i32
    %c0_i32_0 = arith.constant 0 : i32
    %c0_i32_1 = arith.constant 0 : i32
    return %c0_i32, %c0_i32_0 : i32, i32
  }
  func.func @transform_3(%arg0: i32) -> (i32, i32) {
    %c0_i32 = arith.constant 0 : i32
    %c0_i32_0 = arith.constant 0 : i32
    %c0_i32_1 = arith.constant 0 : i32
    return %c0_i32, %c0_i32_0 : i32, i32
  }
  func.func @transform_4(%arg0: i32) -> (i32, i32) {
    %c0_i32 = arith.constant 0 : i32
    %c0_i32_0 = arith.constant 0 : i32
    %c0_i32_1 = arith.constant 0 : i32
    return %c0_i32, %c0_i32_0 : i32, i32
  }
  func.func @transform_5(%arg0: i32) -> (i32, i32) {
    %c0_i32 = arith.constant 0 : i32
    %c0_i32_0 = arith.constant 0 : i32
    return %arg0, %c0_i32 : i32, i32
  }
}

</mosaic_0001>

<bundles_post_ra>
// kernel: tpu_custom_call.1
= control target key start
LH: loop header
LB: loop body
LE: loop exit
PB: predicated region body
PF: predicated region fallthrough
CT: control target
= control target key end

     0   :  { %10 = vsyncpa [#allocation3], 0  ;;  %s6894_s0 = inlined_call_operand.hbm [shape: f32[8,128], index: 0, kind: input, shape index: {}]   ;;  %s6895_s1 = inlined_call_operand.hbm [shape: bf16[384,1664], index: 1, kind: input, shape index: {}]   ;;  %s6896_s2 = inlined_call_operand.hbm [shape: f32[1,1664], index: 2, kind: input, shape index: {}]   ;;  %s6897_s3 = inlined_call_operand.hbm [shape: f32[1,1664], index: 3, kind: input, shape index: {}]   ;;  %s6898_s4 = inlined_call_operand.hbm [shape: f32[1,1664], index: 4, kind: input, shape index: {}]   ;;  %s6899_s5 = inlined_call_operand.hbm [shape: f32[8,1664], index: 5, kind: output, shape index: {}]  }
   0x1   :  { %11 = vsyncpa [#allocation6], 0 }
   0x2   :  { %12 = vsyncpa [#allocation9], 0 }
   0x3   :  { %13 = vsyncpa [#allocation4], 0  ;;  %s5369_s18 = smov [#allocation5]   ;;  %s5229_s22 = scalar_lea.hbm %s6895_s1, 39936 }
   0x4   :  { %s29_s19 = sshll.u32 %s5369_s18, 4  ;;  %p5230_p0 = scmp.ne.s32.totalorder %s6895_s1, %s5229_s22  ;;  %s30_s19 = int_to_ptr.vmem [resolvable:$true] %s29_s19 }
   0x5   :  { %p5233_p1 = scmp.lt.u32.totalorder %s5229_s22, %s6895_s1 }
   0x7   :  { %p5235_p2 = pnand %p5233_p1, %p5230_p0 }
   0x9   :  { %5238 = shalt.err (!%p5235_p2)
}
   0xa   :  { %s5239_s27 = scalar_lea.vmem %s30_s19, 39936  ;;  %p5244_p4 = scmp.lt.s32.totalorder %s30_s19, %s30_s19 }
   0xb   :  { %p5240_p3 = scmp.ne.s32.totalorder %s30_s19, %s5239_s27  ;;  %p5245_p5 = scmp.lt.s32.totalorder %s5239_s27, %s5239_s27 }
   0xd   :  { %p5246_p6 = por %p5245_p5, %p5244_p4 }
   0xf   :  { %p5247_p7 = pnand %p5246_p6, %p5240_p3 }
  0x11   :  { %5250 = shalt.err (!%p5247_p7)
}
  0x12   :  { %s5370_s28 = smov 832   ;;  %s5371_s29 = smov 52  }
  0x13   :  { %35 = dma.hbm_to_vmem [thread:$0]  %s6895_s1, 39936, %s30_s19, [#allocation6], %s5370_s28, %s5370_s28, %s5371_s29  }
  0x14   :  { %s5372_s7 = smov [#allocation8]   ;;  %s5373_s9 = smov [#allocation2]  }
  0x15   :  { %s52_s8 = sshll.u32 %s5372_s7, 4  ;;  %s20_s10 = sshll.u32 %s5373_s9, 4  ;;  %s53_s8 = int_to_ptr.vmem [resolvable:$true] %s52_s8  ;;  %s21_s10 = int_to_ptr.vmem [resolvable:$true] %s20_s10 }
  0x16   :  { %s5251_s13 = scalar_lea.hbm %s6897_s3, 208 }
  0x17   :  { %p5252_p8 = scmp.ne.s32.totalorder %s6897_s3, %s5251_s13  ;;  %p5255_p9 = scmp.lt.u32.totalorder %s5251_s13, %s6897_s3 }
  0x19   :  { %p5257_p10 = pnand %p5255_p9, %p5252_p8 }
  0x1b   :  { %5260 = shalt.err (!%p5257_p10)
}
  0x1c   :  { %s5261_s1 = scalar_lea.vmem %s53_s8, 208  ;;  %s5265_s18 = scalar_lea.vmem %s53_s8, 224 }
  0x1d   :  { %p5262_p11 = scmp.ne.s32.totalorder %s53_s8, %s5261_s1  ;;  %p5266_p12 = scmp.lt.s32.totalorder %s53_s8, %s53_s8 }
  0x1e   :  { %p5267_p13 = scmp.lt.s32.totalorder %s5265_s18, %s5261_s1 }
  0x20   :  { %p5268_p0 = por %p5267_p13, %p5266_p12 }
  0x22   :  { %p5269_p1 = pnand %p5268_p0, %p5262_p11 }
  0x24   :  { %5272 = shalt.err (!%p5269_p1)
}
  0x25   :  { %55 = dma.hbm_to_vmem [thread:$0]  %s6897_s3, 208, %s53_s8, [#allocation9]  }
  0x26   :  { %s5273_s23 = scalar_lea.hbm %s6894_s0, 128 }
  0x27   :  { %p5274_p2 = scmp.ne.s32.totalorder %s6894_s0, %s5273_s23  ;;  %p5277_p3 = scmp.lt.u32.totalorder %s5273_s23, %s6894_s0 }
  0x29   :  { %p5279_p4 = pnand %p5277_p3, %p5274_p2 }
  0x2b   :  { %5282 = shalt.err (!%p5279_p4)
}
  0x2c   :  { %s5283_s28 = scalar_lea.vmem %s21_s10, 128  ;;  %p5288_p6 = scmp.lt.s32.totalorder %s21_s10, %s21_s10 }
  0x2d   :  { %p5284_p5 = scmp.ne.s32.totalorder %s21_s10, %s5283_s28  ;;  %p5289_p7 = scmp.lt.s32.totalorder %s5283_s28, %s5283_s28 }
  0x2f   :  { %p5290_p8 = por %p5289_p7, %p5288_p6 }
  0x31   :  { %p5291_p9 = pnand %p5290_p8, %p5284_p5 }
  0x33   :  { %5294 = shalt.err (!%p5291_p9)
}
  0x34   :  { %23 = dma.hbm_to_vmem [thread:$0]  %s6894_s0, 128, %s21_s10, [#allocation3]  }
  0x35   :  { %s5374_s30 = smov [#allocation7]   ;;  %s5375_s7 = smov [#allocation10]  }
  0x36   :  { %s42_s6 = sshll.u32 %s5374_s30, 4  ;;  %s62_s8 = sshll.u32 %s5375_s7, 4  ;;  %s43_s6 = int_to_ptr.vmem [resolvable:$true] %s42_s6  ;;  %s63_s8 = int_to_ptr.vmem [resolvable:$true] %s62_s8 }
  0x37   :  { %s5295_s12 = scalar_lea.hbm %s6896_s2, 208 }
  0x38   :  { %p5296_p10 = scmp.ne.s32.totalorder %s6896_s2, %s5295_s12  ;;  %p5299_p11 = scmp.lt.u32.totalorder %s5295_s12, %s6896_s2 }
  0x3a   :  { %p5301_p12 = pnand %p5299_p11, %p5296_p10 }
  0x3c   :  { %5304 = shalt.err (!%p5301_p12)
}
  0x3d   :  { %s5305_s0 = scalar_lea.vmem %s43_s6, 208  ;;  %s5309_s10 = scalar_lea.vmem %s43_s6, 224 }
  0x3e   :  { %p5306_p13 = scmp.ne.s32.totalorder %s43_s6, %s5305_s0  ;;  %p5310_p0 = scmp.lt.s32.totalorder %s43_s6, %s43_s6 }
  0x3f   :  { %p5311_p1 = scmp.lt.s32.totalorder %s5309_s10, %s5305_s0 }
  0x41   :  { %p5312_p2 = por %p5311_p1, %p5310_p0 }
  0x43   :  { %p5313_p3 = pnand %p5312_p2, %p5306_p13 }
  0x45   :  { %5316 = shalt.err (!%p5313_p3)
}
  0x46   :  { %45 = dma.hbm_to_vmem [thread:$0]  %s6896_s2, 208, %s43_s6, [#allocation6]  }
  0x47   :  { %s5317_s20 = scalar_lea.hbm %s6898_s4, 208 }
  0x48   :  { %p5318_p4 = scmp.ne.s32.totalorder %s6898_s4, %s5317_s20  ;;  %p5321_p5 = scmp.lt.u32.totalorder %s5317_s20, %s6898_s4 }
  0x4a   :  { %p5323_p6 = pnand %p5321_p5, %p5318_p4 }
  0x4c   :  { %5326 = shalt.err (!%p5323_p6)
}
  0x4d   :  { %s5327_s25 = scalar_lea.vmem %s63_s8, 208  ;;  %s5331_s26 = scalar_lea.vmem %s63_s8, 224 }
  0x4e   :  { %p5328_p7 = scmp.ne.s32.totalorder %s63_s8, %s5327_s25  ;;  %p5332_p8 = scmp.lt.s32.totalorder %s63_s8, %s63_s8 }
  0x4f   :  { %p5333_p9 = scmp.lt.s32.totalorder %s5331_s26, %s5327_s25 }
  0x51   :  { %p5334_p10 = por %p5333_p9, %p5332_p8 }
  0x53   :  { %p5335_p11 = pnand %p5334_p10, %p5328_p7 }
  0x55   :  { %5338 = shalt.err (!%p5335_p11)
}
  0x56   :  { %65 = dma.hbm_to_vmem [thread:$0]  %s6898_s4, 208, %s63_s8, [#allocation9]  }
  0x57   :  { %5361 = dma.done.wait [#allocation3], 128  }
  0x58   :  { %5362 = vsyncadd [#allocation3], 4294967168 }
  0x59   :  { %5363 = dma.done.wait [#allocation6], 40144  }
  0x5a   :  { %5364 = vsyncadd [#allocation6], 4294927152 }
  0x5b   :  { %5365 = dma.done.wait [#allocation9], 416  }
  0x5c   :  { %5366 = vsyncadd [#allocation9], 4294966880  ;;  %v4720_v0 = vld [vmem:[#allocation5 + $0x4] ss:$52 sps:$4 sm:$0xff]   ;;  %v4722_v1 = vld [vmem:[#allocation5 + $0xc] ss:$52 sps:$4 sm:$0xff]  }
  0x5d   :  { %2010 = vmatprep.subr.bf16.mxu0 %v4720_v0  ;;  %v4724_v2 = vld [vmem:[#allocation5] ss:$52 sps:$4 sm:$0xff]   ;;  %v4725_v3 = vld [vmem:[#allocation5 + $0x8] ss:$52 sps:$4 sm:$0xff]   ;;  %2092 = vmatprep.subr.bf16.mxu1 %v4722_v1  ;;  %v4731_v7 = vld [vmem:[#allocation5 + $0x70] ss:$52 sps:$4 sm:$0xff]  }
  0x5e   :  { %v4726_v4 = vld [vmem:[#allocation5 + $0x6c] ss:$52 sps:$4 sm:$0xff]   ;;  %2011 = vmatpush1.bf16.msra.mxu0 %v4724_v2  ;;  %2093 = vmatpush1.bf16.msra.mxu1 %v4725_v3  ;;  %v4728_v5 = vld [vmem:[#allocation5 + $0x74] ss:$52 sps:$4 sm:$0xff]   ;;  %v4734_v9 = vld [vmem:[#allocation5 + $0xdc] ss:$52 sps:$4 sm:$0xff]  }
  0x5f   :  { %v4730_v6 = vld [vmem:[#allocation5 + $0x68] ss:$52 sps:$4 sm:$0xff]   ;;  %2012 = vmatprep.subr.bf16.mxu0 %v4726_v4  ;;  %2094 = vmatprep.subr.bf16.mxu1 %v4728_v5  ;;  %v4736_v10 = vld [vmem:[#allocation5 + $0xd0] ss:$52 sps:$4 sm:$0xff]   ;;  %v4737_v11 = vld [vmem:[#allocation5 + $0xd8] ss:$52 sps:$4 sm:$0xff]  }
  0x60   :  { %v4732_v8 = vld [vmem:[#allocation5 + $0xd4] ss:$52 sps:$4 sm:$0xff]   ;;  %v4738_v12 = vld [vmem:[#allocation5 + $0x13c] ss:$52 sps:$4 sm:$0xff]   ;;  %v4740_v13 = vld [vmem:[#allocation5 + $0x144] ss:$52 sps:$4 sm:$0xff]  }
  0x61   :  { %v4742_v14 = vld [vmem:[#allocation5 + $0x138] ss:$52 sps:$4 sm:$0xff]   ;;  %v4743_v15 = vld [vmem:[#allocation5 + $0x140] ss:$52 sps:$4 sm:$0xff]   ;;  %v4749_v19 = vld [vmem:[#allocation5 + $0x1a8] ss:$52 sps:$4 sm:$0xff]  }
  0x62   :  { %2013 = vmatpush1.bf16.msra.mxu0 %v4730_v6  ;;  %2095 = vmatpush1.bf16.msra.mxu1 %v4731_v7  ;;  %v4744_v16 = vld [vmem:[#allocation5 + $0x1a4] ss:$52 sps:$4 sm:$0xff]   ;;  %v4746_v17 = vld [vmem:[#allocation5 + $0x1ac] ss:$52 sps:$4 sm:$0xff]   ;;  %v4752_v21 = vld [vmem:[#allocation5 + $0x214] ss:$52 sps:$4 sm:$0xff]  }
  0x63   :  { %2014 = vmatprep.subr.bf16.mxu0 %v4732_v8  ;;  %2096 = vmatprep.subr.bf16.mxu1 %v4734_v9  ;;  %v4748_v18 = vld [vmem:[#allocation5 + $0x1a0] ss:$52 sps:$4 sm:$0xff]   ;;  %v4754_v22 = vld [vmem:[#allocation5 + $0x208] ss:$52 sps:$4 sm:$0xff]   ;;  %v4755_v23 = vld [vmem:[#allocation5 + $0x210] ss:$52 sps:$4 sm:$0xff]  }
  0x64   :  { %v4750_v20 = vld [vmem:[#allocation5 + $0x20c] ss:$52 sps:$4 sm:$0xff]   ;;  %v4756_v24 = vld [vmem:[#allocation5 + $0x274] ss:$52 sps:$4 sm:$0xff]   ;;  %v4758_v25 = vld [vmem:[#allocation5 + $0x27c] ss:$52 sps:$4 sm:$0xff]  }
  0x65   :  { %v4760_v26 = vld [vmem:[#allocation5 + $0x270] ss:$52 sps:$4 sm:$0xff]   ;;  %v4761_v27 = vld [vmem:[#allocation5 + $0x278] ss:$52 sps:$4 sm:$0xff]   ;;  %v4767_v31 = vld [vmem:[#allocation5 + $0x2e0] ss:$52 sps:$4 sm:$0xff]  }
  0x66   :  { %2015 = vmatpush1.bf16.msra.mxu0 %v4736_v10  ;;  %2097 = vmatpush1.bf16.msra.mxu1 %v4737_v11  ;;  %v4762_v28 = vld [vmem:[#allocation5 + $0x2dc] ss:$52 sps:$4 sm:$0xff]   ;;  %v4764_v29 = vld [vmem:[#allocation5 + $0x2e4] ss:$52 sps:$4 sm:$0xff]   ;;  %v4770_v33 = vld [vmem:[#allocation5 + $0x34c] ss:$52 sps:$4 sm:$0xff]  }
  0x67   :  { %2016 = vmatprep.subr.bf16.mxu0 %v4738_v12  ;;  %2098 = vmatprep.subr.bf16.mxu1 %v4740_v13  ;;  %v4766_v30 = vld [vmem:[#allocation5 + $0x2d8] ss:$52 sps:$4 sm:$0xff]   ;;  %v4772_v34 = vld [vmem:[#allocation5 + $0x340] ss:$52 sps:$4 sm:$0xff]   ;;  %v4773_v35 = vld [vmem:[#allocation5 + $0x348] ss:$52 sps:$4 sm:$0xff]  }
  0x68   :  { %v4768_v32 = vld [vmem:[#allocation5 + $0x344] ss:$52 sps:$4 sm:$0xff]   ;;  %v4774_v36 = vld [vmem:[#allocation5 + $0x3ac] ss:$52 sps:$4 sm:$0xff]   ;;  %v4776_v37 = vld [vmem:[#allocation5 + $0x3b4] ss:$52 sps:$4 sm:$0xff]  }
  0x69   :  { %v4778_v38 = vld [vmem:[#allocation5 + $0x3a8] ss:$52 sps:$4 sm:$0xff]   ;;  %v4779_v39 = vld [vmem:[#allocation5 + $0x3b0] ss:$52 sps:$4 sm:$0xff]   ;;  %v4785_v43 = vld [vmem:[#allocation5 + $0x418] ss:$52 sps:$4 sm:$0xff]  }
  0x6a   :  { %2017 = vmatpush1.bf16.msra.mxu0 %v4742_v14  ;;  %2099 = vmatpush1.bf16.msra.mxu1 %v4743_v15  ;;  %v4780_v40 = vld [vmem:[#allocation5 + $0x414] ss:$52 sps:$4 sm:$0xff]   ;;  %v4782_v41 = vld [vmem:[#allocation5 + $0x41c] ss:$52 sps:$4 sm:$0xff]   ;;  %v4788_v45 = vld [vmem:[#allocation5 + $0x484] ss:$52 sps:$4 sm:$0xff]  }
  0x6b   :  { %2018 = vmatprep.subr.bf16.mxu0 %v4744_v16  ;;  %2100 = vmatprep.subr.bf16.mxu1 %v4746_v17  ;;  %v4784_v42 = vld [vmem:[#allocation5 + $0x410] ss:$52 sps:$4 sm:$0xff]   ;;  %v82_v46 = vld [vmem:[#allocation2] sm:$0xff]  ;;  %v4791_v49 = vld [vmem:[#allocation5 + $0x480] ss:$52 sps:$4 sm:$0xff]   ;;  %v6900_v15 = vmov 0  }
  0x6c   :  { %v4786_v44 = vld [vmem:[#allocation5 + $0x47c] ss:$52 sps:$4 sm:$0xff]   ;;  %v4790_v47 = vld [vmem:[#allocation5 + $0x478] ss:$52 sps:$4 sm:$0xff]   ;;  %v5476_v48 = vpack.c.bf16 %v82_v46, %v82_v46  ;;  %v4796_v53 = vld [vmem:[#allocation5 + $0x4e0] ss:$52 sps:$4 sm:$0xff]  }
  0x6d   :  { %v4792_v50 = vld [vmem:[#allocation5 + $0x4e4] ss:$52 sps:$4 sm:$0xff]   ;;  %v4794_v51 = vld [vmem:[#allocation5 + $0x4ec] ss:$52 sps:$4 sm:$0xff]   ;;  %v4797_v55 = vld [vmem:[#allocation5 + $0x4e8] ss:$52 sps:$4 sm:$0xff]  }
  0x6e   :  { %2019 = vmatpush1.bf16.msra.mxu0 %v4748_v18  ;;  %2101 = vmatpush1.bf16.msra.mxu1 %v4749_v19  ;;  %v84_v52 = vunpack.c.l.bf16 %v5476_v48  ;;  %v4798_v56 = vld [vmem:[#allocation5 + $0x54c] ss:$52 sps:$4 sm:$0xff]   ;;  %v4800_v57 = vld [vmem:[#allocation5 + $0x554] ss:$52 sps:$4 sm:$0xff]   ;;  %v4803_v60 = vld [vmem:[#allocation5 + $0x550] ss:$52 sps:$4 sm:$0xff]  }
  0x6f   :  { %2020 = vmatprep.subr.bf16.mxu0 %v4750_v20  ;;  %2102 = vmatprep.subr.bf16.mxu1 %v4752_v21  ;;  %v4802_v59 = vld [vmem:[#allocation5 + $0x548] ss:$52 sps:$4 sm:$0xff]   ;;  %v4808_v63 = vld [vmem:[#allocation5 + $0x5b0] ss:$52 sps:$4 sm:$0xff]   ;;  %v4809_v0 = vld [vmem:[#allocation5 + $0x5b8] ss:$52 sps:$4 sm:$0xff]  }
  0x70   :  { %v5479_v54 = vsub.f32 %v82_v46, %v84_v52  ;;  %v4804_v61 = vld [vmem:[#allocation5 + $0x5b4] ss:$52 sps:$4 sm:$0xff]   ;;  %v4806_v62 = vld [vmem:[#allocation5 + $0x5bc] ss:$52 sps:$4 sm:$0xff]   ;;  %v4812_v2 = vld [vmem:[#allocation5 + $0x624] ss:$52 sps:$4 sm:$0xff]  }
  0x71   :  { %v4810_v1 = vld [vmem:[#allocation5 + $0x61c] ss:$52 sps:$4 sm:$0xff]   ;;  %v4814_v3 = vld [vmem:[#allocation5 + $0x618] ss:$52 sps:$4 sm:$0xff]   ;;  %v4815_v4 = vld [vmem:[#allocation5 + $0x620] ss:$52 sps:$4 sm:$0xff]  }
  0x72   :  { %2021 = vmatpush1.bf16.msra.mxu0 %v4754_v22  ;;  %2103 = vmatpush1.bf16.msra.mxu1 %v4755_v23  ;;  %v5483_v58 = vpack.c.bf16 %v5479_v54, %v5479_v54  ;;  %v4818_v5 = vld [vmem:[#allocation5 + $0x684] ss:$52 sps:$4 sm:$0xff]   ;;  %v4821_v6 = vld [vmem:[#allocation5 + $0x68c] ss:$52 sps:$4 sm:$0xff]   ;;  %v4819_v8 = vld [vmem:[#allocation5 + $0x688] ss:$52 sps:$4 sm:$0xff]  }
  0x73   :  { %2022 = vmatprep.subr.bf16.mxu0 %v4756_v24  ;;  %2104 = vmatprep.subr.bf16.mxu1 %v4758_v25  ;;  %v4816_v7 = vld [vmem:[#allocation5 + $0x680] ss:$52 sps:$4 sm:$0xff]   ;;  %v4822_v11 = vld [vmem:[#allocation5 + $0x6e8] ss:$52 sps:$4 sm:$0xff]   ;;  %v4825_v12 = vld [vmem:[#allocation5 + $0x6f0] ss:$52 sps:$4 sm:$0xff]  }
  0x74   :  { %2042 = vmatprep.mubr.bf16.mxu0 %v5483_v58  ;;  %2124 = vmatprep.mubr.bf16.mxu1 %v5483_v58  ;;  %v4824_v9 = vld [vmem:[#allocation5 + $0x6ec] ss:$52 sps:$4 sm:$0xff]   ;;  %v4827_v10 = vld [vmem:[#allocation5 + $0x6f4] ss:$52 sps:$4 sm:$0xff]   ;;  %v4833_v14 = vld [vmem:[#allocation5 + $0x75c] ss:$52 sps:$4 sm:$0xff]  }
  0x75   :  { %v4830_v13 = vld [vmem:[#allocation5 + $0x754] ss:$52 sps:$4 sm:$0xff]   ;;  %v4828_v16 = vld [vmem:[#allocation5 + $0x750] ss:$52 sps:$4 sm:$0xff]   ;;  %v4831_v17 = vld [vmem:[#allocation5 + $0x758] ss:$52 sps:$4 sm:$0xff]  }
  0x76   :  { %2023 = vmatpush1.bf16.msra.mxu0 %v4760_v26  ;;  %2105 = vmatpush1.bf16.msra.mxu1 %v4761_v27  ;;  %v4836_v18 = vld [vmem:[#allocation5 + $0x7bc] ss:$52 sps:$4 sm:$0xff]   ;;  %v4839_v19 = vld [vmem:[#allocation5 + $0x7c4] ss:$52 sps:$4 sm:$0xff]   ;;  %v4837_v21 = vld [vmem:[#allocation5 + $0x7c0] ss:$52 sps:$4 sm:$0xff]  }
  0x77   :  { %2024 = vmatprep.subr.bf16.mxu0 %v4762_v28  ;;  %2106 = vmatprep.subr.bf16.mxu1 %v4764_v29  ;;  %v4834_v20 = vld [vmem:[#allocation5 + $0x7b8] ss:$52 sps:$4 sm:$0xff]   ;;  %v4840_v24 = vld [vmem:[#allocation5 + $0x820] ss:$52 sps:$4 sm:$0xff]   ;;  %v4843_v25 = vld [vmem:[#allocation5 + $0x828] ss:$52 sps:$4 sm:$0xff]  }
  0x78   :  { %v4842_v22 = vld [vmem:[#allocation5 + $0x824] ss:$52 sps:$4 sm:$0xff]   ;;  %v4845_v23 = vld [vmem:[#allocation5 + $0x82c] ss:$52 sps:$4 sm:$0xff]   ;;  %v4851_v27 = vld [vmem:[#allocation5 + $0x894] ss:$52 sps:$4 sm:$0xff]  }
  0x79   :  { %v4848_v26 = vld [vmem:[#allocation5 + $0x88c] ss:$52 sps:$4 sm:$0xff]   ;;  %v4846_v28 = vld [vmem:[#allocation5 + $0x888] ss:$52 sps:$4 sm:$0xff]   ;;  %v4849_v29 = vld [vmem:[#allocation5 + $0x890] ss:$52 sps:$4 sm:$0xff]  }
  0x7a   :  { %2025 = vmatpush1.bf16.msra.mxu0 %v4766_v30  ;;  %2107 = vmatpush1.bf16.msra.mxu1 %v4767_v31  ;;  %v4854_v30 = vld [vmem:[#allocation5 + $0x8f4] ss:$52 sps:$4 sm:$0xff]   ;;  %v4857_v31 = vld [vmem:[#allocation5 + $0x8fc] ss:$52 sps:$4 sm:$0xff]   ;;  %v4875_v46 = vld [vmem:[#allocation5 + $0x84] ss:$52 sps:$4 sm:$0xff]  }
  0x7b   :  { %2026 = vmatprep.subr.bf16.mxu0 %v4768_v32  ;;  %2108 = vmatprep.subr.bf16.mxu1 %v4770_v33  ;;  %v4852_v32 = vld [vmem:[#allocation5 + $0x8f0] ss:$52 sps:$4 sm:$0xff]   ;;  %v87_v33 = vunpack.c.l.bf16 %v5483_v58  ;;  %v4876_v52 = vld [vmem:[#allocation5 + $0xe0] ss:$52 sps:$4 sm:$0xff]   ;;  %vm5378_vm0 = vmmov 0   ;;  %s5385_s4 = smov [#allocation11]  }
  0x7c   :  { %s4201_s28 = sshll.u32 %s5385_s4, 4  ;;  %s4202_s28 = int_to_ptr.vmem [resolvable:$true] %s4201_s28 }
  0x7d   :  { %s5339_s3 = scalar_lea.vmem %s4202_s28, 1664  ;;  %p5344_p13 = scmp.lt.s32.totalorder %s4202_s28, %s4202_s28 }
  0x7e   :  { %2027 = vmatpush1.bf16.msra.mxu0 %v4772_v34  ;;  %2109 = vmatpush1.bf16.msra.mxu1 %v4773_v35  ;;  %v4855_v34 = vld [vmem:[#allocation5 + $0x8f8] ss:$52 sps:$4 sm:$0xff]   ;;  %v4860_v35 = vld [vmem:[#allocation5 + $0x95c] ss:$52 sps:$4 sm:$0xff]   ;;  %p5340_p12 = scmp.ne.s32.totalorder %s4202_s28, %s5339_s3  ;;  %p5345_p0 = scmp.lt.s32.totalorder %s5339_s3, %s5339_s3 }
  0x7f   :  { %2028 = vmatprep.subr.bf16.mxu0 %v4774_v36  ;;  %2110 = vmatprep.subr.bf16.mxu1 %v4776_v37  ;;  %v4863_v36 = vld [vmem:[#allocation5 + $0x964] ss:$52 sps:$4 sm:$0xff]  }
  0x80   :  { %v4858_v37 = vld [vmem:[#allocation5 + $0x958] ss:$52 sps:$4 sm:$0xff]   ;;  %p5346_p1 = por %p5345_p0, %p5344_p13 }
  0x82   :  { %2029 = vmatpush1.bf16.msra.mxu0 %v4778_v38  ;;  %2111 = vmatpush1.bf16.msra.mxu1 %v4779_v39  ;;  %v88_v38 = vsub.f32 %v5479_v54, %v87_v33  ;;  %v4861_v39 = vld [vmem:[#allocation5 + $0x960] ss:$52 sps:$4 sm:$0xff]   ;;  %v4947_v33 = vld [vmem:[#allocation5 + $0x564] ss:$52 sps:$4 sm:$0xff]   ;;  %p5347_p2 = pnand %p5346_p1, %p5340_p12 }
  0x83   :  { %2030 = vmatprep.subr.bf16.mxu0 %v4780_v40  ;;  %2112 = vmatprep.subr.bf16.mxu1 %v4782_v41  ;;  %v4866_v40 = vld [vmem:[#allocation5 + $0x14] ss:$52 sps:$4 sm:$0xff]   ;;  %v4869_v41 = vld [vmem:[#allocation5 + $0x1c] ss:$52 sps:$4 sm:$0xff]   ;;  %v4884_v54 = vld [vmem:[#allocation5 + $0x14c] ss:$52 sps:$4 sm:$0xff]  }
  0x86   :  { %2031 = vmatpush1.bf16.msra.mxu0 %v4784_v42  ;;  %2113 = vmatpush1.bf16.msra.mxu1 %v4785_v43  ;;  %v5493_v42 = vpack.c.bf16 %v88_v38, %v88_v38  ;;  %v4864_v43 = vld [vmem:[#allocation5 + $0x10] ss:$52 sps:$4 sm:$0xff]   ;;  %v4948_v38 = vld [vmem:[#allocation5 + $0x5c0] ss:$52 sps:$4 sm:$0xff]  }
  0x87   :  { %2032 = vmatprep.subr.bf16.mxu0 %v4786_v44  ;;  %2114 = vmatprep.subr.bf16.mxu1 %v4788_v45  ;;  %v4867_v44 = vld [vmem:[#allocation5 + $0x18] ss:$52 sps:$4 sm:$0xff]   ;;  %v4872_v45 = vld [vmem:[#allocation5 + $0x7c] ss:$52 sps:$4 sm:$0xff]  }
  0x8a   :  { %2033 = vmatpush1.bf16.msra.mxu0 %v4790_v47  ;;  %2115 = vmatpush1.bf16.msra.mxu1 %v4791_v49  ;;  %v4870_v47 = vld [vmem:[#allocation5 + $0x78] ss:$52 sps:$4 sm:$0xff]   ;;  %v4873_v49 = vld [vmem:[#allocation5 + $0x80] ss:$52 sps:$4 sm:$0xff]  }
  0x8b   :  { %2034 = vmatprep.subr.bf16.mxu0 %v4792_v50  ;;  %2116 = vmatprep.subr.bf16.mxu1 %v4794_v51  ;;  %v4878_v50 = vld [vmem:[#allocation5 + $0xe4] ss:$52 sps:$4 sm:$0xff]   ;;  %v4881_v51 = vld [vmem:[#allocation5 + $0xec] ss:$52 sps:$4 sm:$0xff]  }
  0x8e   :  { %2035 = vmatpush1.bf16.msra.mxu0 %v4796_v53  ;;  %2117 = vmatpush1.bf16.msra.mxu1 %v4797_v55  ;;  %v4879_v53 = vld [vmem:[#allocation5 + $0xe8] ss:$52 sps:$4 sm:$0xff]  }
  0x8f   :  { %2036 = vmatprep.subr.bf16.mxu0 %v4798_v56  ;;  %2118 = vmatprep.subr.bf16.mxu1 %v4800_v57  ;;  %v4887_v55 = vld [vmem:[#allocation5 + $0x154] ss:$52 sps:$4 sm:$0xff]   ;;  %v4885_v57 = vld [vmem:[#allocation5 + $0x150] ss:$52 sps:$4 sm:$0xff]  }
  0x90   :  { %v4882_v56 = vld [vmem:[#allocation5 + $0x148] ss:$52 sps:$4 sm:$0xff]  }
  0x92   :  { %2037 = vmatpush1.bf16.msra.mxu0 %v4802_v59  ;;  %2119 = vmatpush1.bf16.msra.mxu1 %v4803_v60  ;;  %v4890_v59 = vld [vmem:[#allocation5 + $0x1b4] ss:$52 sps:$4 sm:$0xff]   ;;  %v4893_v60 = vld [vmem:[#allocation5 + $0x1bc] ss:$52 sps:$4 sm:$0xff]  }
  0x93   :  { %2038 = vmatprep.subr.bf16.mxu0 %v4804_v61  ;;  %2120 = vmatprep.subr.bf16.mxu1 %v4806_v62  ;;  %v4888_v61 = vld [vmem:[#allocation5 + $0x1b0] ss:$52 sps:$4 sm:$0xff]   ;;  %v4891_v62 = vld [vmem:[#allocation5 + $0x1b8] ss:$52 sps:$4 sm:$0xff]  }
  0x96   :  { %2039 = vmatpush1.bf16.msra.mxu0 %v4808_v63  ;;  %2121 = vmatpush1.bf16.msra.mxu1 %v4809_v0  ;;  %v4896_v63 = vld [vmem:[#allocation5 + $0x21c] ss:$52 sps:$4 sm:$0xff]   ;;  %v4899_v0 = vld [vmem:[#allocation5 + $0x224] ss:$52 sps:$4 sm:$0xff]  }
  0x97   :  { %2040 = vmatprep.subr.bf16.mxu0 %v4810_v1  ;;  %2122 = vmatprep.subr.bf16.mxu1 %v4812_v2  ;;  %v4894_v1 = vld [vmem:[#allocation5 + $0x218] ss:$52 sps:$4 sm:$0xff]   ;;  %v4897_v2 = vld [vmem:[#allocation5 + $0x220] ss:$52 sps:$4 sm:$0xff]  }
  0x9a   :  { %2041 = vmatpush1.bf16.msra.mxu0 %v4814_v3  ;;  %2123 = vmatpush1.bf16.msra.mxu1 %v4815_v4  ;;  %v4902_v3 = vld [vmem:[#allocation5 + $0x284] ss:$52 sps:$4 sm:$0xff]   ;;  %v4905_v4 = vld [vmem:[#allocation5 + $0x28c] ss:$52 sps:$4 sm:$0xff]  }
  0x9b   :  { %2051 = vmatprep.subr.bf16.mxu0 %v4818_v5  ;;  %2133 = vmatprep.subr.bf16.mxu1 %v4821_v6  ;;  %v4900_v5 = vld [vmem:[#allocation5 + $0x280] ss:$52 sps:$4 sm:$0xff]   ;;  %v4903_v6 = vld [vmem:[#allocation5 + $0x288] ss:$52 sps:$4 sm:$0xff]  }
  0x9d   :  { %2043 = vmatmul.mubr.bf16.vlgmr.msra.gmra.mrb[0].mxu0 %v5476_v48  ;;  %2125 = vmatmul.mubr.bf16.vlgmr.msra.gmra.mrb[0].mxu1 %v5476_v48 }
  0x9e   :  { %2052 = vmatpush1.bf16.msra.mxu0 %v4816_v7  ;;  %2134 = vmatpush1.bf16.msra.mxu1 %v4819_v8  ;;  %v4908_v7 = vld [vmem:[#allocation5 + $0x2ec] ss:$52 sps:$4 sm:$0xff]   ;;  %v4911_v8 = vld [vmem:[#allocation5 + $0x2f4] ss:$52 sps:$4 sm:$0xff]  }
  0x9f   :  { %2053 = vmatprep.subr.bf16.mxu0 %v4824_v9  ;;  %2135 = vmatprep.subr.bf16.mxu1 %v4827_v10  ;;  %v4906_v9 = vld [vmem:[#allocation5 + $0x2e8] ss:$52 sps:$4 sm:$0xff]   ;;  %v4909_v10 = vld [vmem:[#allocation5 + $0x2f0] ss:$52 sps:$4 sm:$0xff]  }
  0xa0   :  { %2083 = vmatprep.mubr.bf16.mxu0 %v6900_v15  ;;  %2165 = vmatprep.mubr.bf16.mxu1 %v6900_v15 }
  0xa2   :  { %2054 = vmatpush1.bf16.msra.mxu0 %v4822_v11  ;;  %2136 = vmatpush1.bf16.msra.mxu1 %v4825_v12  ;;  %v4914_v11 = vld [vmem:[#allocation5 + $0x354] ss:$52 sps:$4 sm:$0xff]   ;;  %v4917_v12 = vld [vmem:[#allocation5 + $0x35c] ss:$52 sps:$4 sm:$0xff]  }
  0xa3   :  { %2055 = vmatprep.subr.bf16.mxu0 %v4830_v13  ;;  %2137 = vmatprep.subr.bf16.mxu1 %v4833_v14  ;;  %v4912_v13 = vld [vmem:[#allocation5 + $0x350] ss:$52 sps:$4 sm:$0xff]   ;;  %v4915_v14 = vld [vmem:[#allocation5 + $0x358] ss:$52 sps:$4 sm:$0xff]  }
  0xa6   :  { %2056 = vmatpush1.bf16.msra.mxu0 %v4828_v16  ;;  %2138 = vmatpush1.bf16.msra.mxu1 %v4831_v17  ;;  %v4920_v16 = vld [vmem:[#allocation5 + $0x3bc] ss:$52 sps:$4 sm:$0xff]   ;;  %v4923_v17 = vld [vmem:[#allocation5 + $0x3c4] ss:$52 sps:$4 sm:$0xff]  }
  0xa7   :  { %2057 = vmatprep.subr.bf16.mxu0 %v4836_v18  ;;  %2139 = vmatprep.subr.bf16.mxu1 %v4839_v19  ;;  %v4918_v18 = vld [vmem:[#allocation5 + $0x3b8] ss:$52 sps:$4 sm:$0xff]   ;;  %v4921_v19 = vld [vmem:[#allocation5 + $0x3c0] ss:$52 sps:$4 sm:$0xff]  }
  0xaa   :  { %2058 = vmatpush1.bf16.msra.mxu0 %v4834_v20  ;;  %2140 = vmatpush1.bf16.msra.mxu1 %v4837_v21  ;;  %v4926_v20 = vld [vmem:[#allocation5 + $0x424] ss:$52 sps:$4 sm:$0xff]   ;;  %v4929_v21 = vld [vmem:[#allocation5 + $0x42c] ss:$52 sps:$4 sm:$0xff]  }
  0xab   :  { %2059 = vmatprep.subr.bf16.mxu0 %v4842_v22  ;;  %2141 = vmatprep.subr.bf16.mxu1 %v4845_v23  ;;  %v4924_v22 = vld [vmem:[#allocation5 + $0x420] ss:$52 sps:$4 sm:$0xff]   ;;  %v4927_v23 = vld [vmem:[#allocation5 + $0x428] ss:$52 sps:$4 sm:$0xff]  }
  0xae   :  { %2060 = vmatpush1.bf16.msra.mxu0 %v4840_v24  ;;  %2142 = vmatpush1.bf16.msra.mxu1 %v4843_v25  ;;  %v4932_v24 = vld [vmem:[#allocation5 + $0x48c] ss:$52 sps:$4 sm:$0xff]   ;;  %v4935_v25 = vld [vmem:[#allocation5 + $0x494] ss:$52 sps:$4 sm:$0xff]  }
  0xaf   :  { %2061 = vmatprep.subr.bf16.mxu0 %v4848_v26  ;;  %2143 = vmatprep.subr.bf16.mxu1 %v4851_v27  ;;  %v4930_v26 = vld [vmem:[#allocation5 + $0x488] ss:$52 sps:$4 sm:$0xff]   ;;  %v4933_v27 = vld [vmem:[#allocation5 + $0x490] ss:$52 sps:$4 sm:$0xff]  }
  0xb2   :  { %2062 = vmatpush1.bf16.msra.mxu0 %v4846_v28  ;;  %2144 = vmatpush1.bf16.msra.mxu1 %v4849_v29  ;;  %v4938_v28 = vld [vmem:[#allocation5 + $0x4f4] ss:$52 sps:$4 sm:$0xff]   ;;  %v4941_v29 = vld [vmem:[#allocation5 + $0x4fc] ss:$52 sps:$4 sm:$0xff]  }
  0xb3   :  { %2063 = vmatprep.subr.bf16.mxu0 %v4854_v30  ;;  %2145 = vmatprep.subr.bf16.mxu1 %v4857_v31  ;;  %v4936_v30 = vld [vmem:[#allocation5 + $0x4f0] ss:$52 sps:$4 sm:$0xff]   ;;  %v4939_v31 = vld [vmem:[#allocation5 + $0x4f8] ss:$52 sps:$4 sm:$0xff]  }
  0xb6   :  { %2064 = vmatpush1.bf16.msra.mxu0 %v4852_v32  ;;  %2146 = vmatpush1.bf16.msra.mxu1 %v4855_v34  ;;  %v4944_v32 = vld [vmem:[#allocation5 + $0x55c] ss:$52 sps:$4 sm:$0xff]   ;;  %v4942_v34 = vld [vmem:[#allocation5 + $0x558] ss:$52 sps:$4 sm:$0xff]  }
  0xb7   :  { %2065 = vmatprep.subr.bf16.mxu0 %v4860_v35  ;;  %2147 = vmatprep.subr.bf16.mxu1 %v4863_v36  ;;  %v4945_v35 = vld [vmem:[#allocation5 + $0x560] ss:$52 sps:$4 sm:$0xff]   ;;  %v4950_v36 = vld [vmem:[#allocation5 + $0x5c4] ss:$52 sps:$4 sm:$0xff]  }
  0xba   :  { %2066 = vmatpush1.bf16.msra.mxu0 %v4858_v37  ;;  %2148 = vmatpush1.bf16.msra.mxu1 %v4861_v39  ;;  %v4953_v37 = vld [vmem:[#allocation5 + $0x5cc] ss:$52 sps:$4 sm:$0xff]   ;;  %v4951_v39 = vld [vmem:[#allocation5 + $0x5c8] ss:$52 sps:$4 sm:$0xff]  }
  0xbb   :  { %2174 = vmatprep.subr.bf16.mxu0 %v4866_v40  ;;  %2256 = vmatprep.subr.bf16.mxu1 %v4869_v41  ;;  %v4956_v40 = vld [vmem:[#allocation5 + $0x62c] ss:$52 sps:$4 sm:$0xff]   ;;  %v4959_v41 = vld [vmem:[#allocation5 + $0x634] ss:$52 sps:$4 sm:$0xff]  }
  0xbd   :  { %2084 = vmatmul.mubr.bf16.vlgmr.msra.gmra.mrb[0].mxu0 %v5493_v42  ;;  %2166 = vmatmul.mubr.bf16.vlgmr.msra.gmra.mrb[0].mxu1 %v5493_v42 }
  0xbe   :  { %2175 = vmatpush1.bf16.msra.mxu0 %v4864_v43  ;;  %2257 = vmatpush1.bf16.msra.mxu1 %v4867_v44  ;;  %v4954_v43 = vld [vmem:[#allocation5 + $0x628] ss:$52 sps:$4 sm:$0xff]   ;;  %v4957_v44 = vld [vmem:[#allocation5 + $0x630] ss:$52 sps:$4 sm:$0xff]  }
  0xbf   :  { %2176 = vmatprep.subr.bf16.mxu0 %v4872_v45  ;;  %2258 = vmatprep.subr.bf16.mxu1 %v4875_v46  ;;  %v4962_v45 = vld [vmem:[#allocation5 + $0x694] ss:$52 sps:$4 sm:$0xff]   ;;  %v4965_v46 = vld [vmem:[#allocation5 + $0x69c] ss:$52 sps:$4 sm:$0xff]  }
  0xc0   :  { %2206 = vmatprep.mubr.bf16.mxu0 %v5483_v58  ;;  %2288 = vmatprep.mubr.bf16.mxu1 %v5483_v58 }
  0xc2   :  { %2177 = vmatpush1.bf16.msra.mxu0 %v4870_v47  ;;  %2259 = vmatpush1.bf16.msra.mxu1 %v4873_v49  ;;  %v4960_v47 = vld [vmem:[#allocation5 + $0x690] ss:$52 sps:$4 sm:$0xff]   ;;  %v4963_v49 = vld [vmem:[#allocation5 + $0x698] ss:$52 sps:$4 sm:$0xff]  }
  0xc3   :  { %2178 = vmatprep.subr.bf16.mxu0 %v4878_v50  ;;  %2260 = vmatprep.subr.bf16.mxu1 %v4881_v51  ;;  %v4968_v50 = vld [vmem:[#allocation5 + $0x6fc] ss:$52 sps:$4 sm:$0xff]   ;;  %v4971_v51 = vld [vmem:[#allocation5 + $0x704] ss:$52 sps:$4 sm:$0xff]  }
  0xc6   :  { %2179 = vmatpush1.bf16.msra.mxu0 %v4876_v52  ;;  %2261 = vmatpush1.bf16.msra.mxu1 %v4879_v53  ;;  %v4966_v52 = vld [vmem:[#allocation5 + $0x6f8] ss:$52 sps:$4 sm:$0xff]   ;;  %v4969_v53 = vld [vmem:[#allocation5 + $0x700] ss:$52 sps:$4 sm:$0xff]  }
  0xc7   :  { %2180 = vmatprep.subr.bf16.mxu0 %v4884_v54  ;;  %2262 = vmatprep.subr.bf16.mxu1 %v4887_v55  ;;  %v4974_v54 = vld [vmem:[#allocation5 + $0x764] ss:$52 sps:$4 sm:$0xff]   ;;  %v4977_v55 = vld [vmem:[#allocation5 + $0x76c] ss:$52 sps:$4 sm:$0xff]  }
  0xca   :  { %2181 = vmatpush1.bf16.msra.mxu0 %v4882_v56  ;;  %2263 = vmatpush1.bf16.msra.mxu1 %v4885_v57  ;;  %v4972_v56 = vld [vmem:[#allocation5 + $0x760] ss:$52 sps:$4 sm:$0xff]   ;;  %v4975_v57 = vld [vmem:[#allocation5 + $0x768] ss:$52 sps:$4 sm:$0xff]  }
  0xcb   :  { %2182 = vmatprep.subr.bf16.mxu0 %v4890_v59  ;;  %2264 = vmatprep.subr.bf16.mxu1 %v4893_v60  ;;  %v4980_v59 = vld [vmem:[#allocation5 + $0x7cc] ss:$52 sps:$4 sm:$0xff]   ;;  %v4983_v60 = vld [vmem:[#allocation5 + $0x7d4] ss:$52 sps:$4 sm:$0xff]  }
  0xce   :  { %2183 = vmatpush1.bf16.msra.mxu0 %v4888_v61  ;;  %2265 = vmatpush1.bf16.msra.mxu1 %v4891_v62  ;;  %v4978_v61 = vld [vmem:[#allocation5 + $0x7c8] ss:$52 sps:$4 sm:$0xff]   ;;  %v4981_v62 = vld [vmem:[#allocation5 + $0x7d0] ss:$52 sps:$4 sm:$0xff]  }
  0xcf   :  { %2184 = vmatprep.subr.bf16.mxu0 %v4896_v63  ;;  %2266 = vmatprep.subr.bf16.mxu1 %v4899_v0  ;;  %v4986_v63 = vld [vmem:[#allocation5 + $0x834] ss:$52 sps:$4 sm:$0xff]   ;;  %v4989_v0 = vld [vmem:[#allocation5 + $0x83c] ss:$52 sps:$4 sm:$0xff]  }
  0xd2   :  { %2185 = vmatpush1.bf16.msra.mxu0 %v4894_v1  ;;  %2267 = vmatpush1.bf16.msra.mxu1 %v4897_v2  ;;  %v4984_v1 = vld [vmem:[#allocation5 + $0x830] ss:$52 sps:$4 sm:$0xff]   ;;  %v4987_v2 = vld [vmem:[#allocation5 + $0x838] ss:$52 sps:$4 sm:$0xff]  }
  0xd3   :  { %2186 = vmatprep.subr.bf16.mxu0 %v4902_v3  ;;  %2268 = vmatprep.subr.bf16.mxu1 %v4905_v4  ;;  %v4992_v3 = vld [vmem:[#allocation5 + $0x89c] ss:$52 sps:$4 sm:$0xff]   ;;  %v4995_v4 = vld [vmem:[#allocation5 + $0x8a4] ss:$52 sps:$4 sm:$0xff]  }
  0xd6   :  { %2187 = vmatpush1.bf16.msra.mxu0 %v4900_v5  ;;  %2269 = vmatpush1.bf16.msra.mxu1 %v4903_v6  ;;  %v4990_v5 = vld [vmem:[#allocation5 + $0x898] ss:$52 sps:$4 sm:$0xff]   ;;  %v4993_v6 = vld [vmem:[#allocation5 + $0x8a0] ss:$52 sps:$4 sm:$0xff]  }
  0xd7   :  { %2188 = vmatprep.subr.bf16.mxu0 %v4908_v7  ;;  %2270 = vmatprep.subr.bf16.mxu1 %v4911_v8  ;;  %v4998_v7 = vld [vmem:[#allocation5 + $0x904] ss:$52 sps:$4 sm:$0xff]   ;;  %v5001_v8 = vld [vmem:[#allocation5 + $0x90c] ss:$52 sps:$4 sm:$0xff]  }
  0xda   :  { %2189 = vmatpush1.bf16.msra.mxu0 %v4906_v9  ;;  %2271 = vmatpush1.bf16.msra.mxu1 %v4909_v10  ;;  %v4996_v9 = vld [vmem:[#allocation5 + $0x900] ss:$52 sps:$4 sm:$0xff]   ;;  %v4999_v10 = vld [vmem:[#allocation5 + $0x908] ss:$52 sps:$4 sm:$0xff]  }
  0xdb   :  { %2190 = vmatprep.subr.bf16.mxu0 %v4914_v11  ;;  %2272 = vmatprep.subr.bf16.mxu1 %v4917_v12  ;;  %v5004_v11 = vld [vmem:[#allocation5 + $0x96c] ss:$52 sps:$4 sm:$0xff]   ;;  %v5007_v12 = vld [vmem:[#allocation5 + $0x974] ss:$52 sps:$4 sm:$0xff]  }
  0xde   :  { %2191 = vmatpush1.bf16.msra.mxu0 %v4912_v13  ;;  %2273 = vmatpush1.bf16.msra.mxu1 %v4915_v14  ;;  %v5002_v13 = vld [vmem:[#allocation5 + $0x968] ss:$52 sps:$4 sm:$0xff]   ;;  %v5005_v14 = vld [vmem:[#allocation5 + $0x970] ss:$52 sps:$4 sm:$0xff]  }
  0xdf   :  { %2192 = vmatprep.subr.bf16.mxu0 %v4920_v16  ;;  %2274 = vmatprep.subr.bf16.mxu1 %v4923_v17  ;;  %v5010_v16 = vld [vmem:[#allocation5 + $0x24] ss:$52 sps:$4 sm:$0xff]   ;;  %v5013_v17 = vld [vmem:[#allocation5 + $0x2c] ss:$52 sps:$4 sm:$0xff]  }
  0xe2   :  { %2193 = vmatpush1.bf16.msra.mxu0 %v4918_v18  ;;  %2275 = vmatpush1.bf16.msra.mxu1 %v4921_v19  ;;  %v5008_v18 = vld [vmem:[#allocation5 + $0x20] ss:$52 sps:$4 sm:$0xff]   ;;  %v5011_v19 = vld [vmem:[#allocation5 + $0x28] ss:$52 sps:$4 sm:$0xff]  }
  0xe3   :  { %2194 = vmatprep.subr.bf16.mxu0 %v4926_v20  ;;  %2276 = vmatprep.subr.bf16.mxu1 %v4929_v21  ;;  %v5016_v20 = vld [vmem:[#allocation5 + $0x8c] ss:$52 sps:$4 sm:$0xff]   ;;  %v5019_v21 = vld [vmem:[#allocation5 + $0x94] ss:$52 sps:$4 sm:$0xff]  }
  0xe6   :  { %2195 = vmatpush1.bf16.msra.mxu0 %v4924_v22  ;;  %2277 = vmatpush1.bf16.msra.mxu1 %v4927_v23  ;;  %v5014_v22 = vld [vmem:[#allocation5 + $0x88] ss:$52 sps:$4 sm:$0xff]   ;;  %v5017_v23 = vld [vmem:[#allocation5 + $0x90] ss:$52 sps:$4 sm:$0xff]  }
  0xe7   :  { %2196 = vmatprep.subr.bf16.mxu0 %v4932_v24  ;;  %2278 = vmatprep.subr.bf16.mxu1 %v4935_v25  ;;  %v5022_v24 = vld [vmem:[#allocation5 + $0xf4] ss:$52 sps:$4 sm:$0xff]   ;;  %v5025_v25 = vld [vmem:[#allocation5 + $0xfc] ss:$52 sps:$4 sm:$0xff]  }
  0xea   :  { %2197 = vmatpush1.bf16.msra.mxu0 %v4930_v26  ;;  %2279 = vmatpush1.bf16.msra.mxu1 %v4933_v27  ;;  %v5020_v26 = vld [vmem:[#allocation5 + $0xf0] ss:$52 sps:$4 sm:$0xff]   ;;  %v5023_v27 = vld [vmem:[#allocation5 + $0xf8] ss:$52 sps:$4 sm:$0xff]  }
  0xeb   :  { %2198 = vmatprep.subr.bf16.mxu0 %v4938_v28  ;;  %2280 = vmatprep.subr.bf16.mxu1 %v4941_v29  ;;  %v5028_v28 = vld [vmem:[#allocation5 + $0x15c] ss:$52 sps:$4 sm:$0xff]   ;;  %v5031_v29 = vld [vmem:[#allocation5 + $0x164] ss:$52 sps:$4 sm:$0xff]  }
  0xee   :  { %2199 = vmatpush1.bf16.msra.mxu0 %v4936_v30  ;;  %2281 = vmatpush1.bf16.msra.mxu1 %v4939_v31  ;;  %v5026_v30 = vld [vmem:[#allocation5 + $0x158] ss:$52 sps:$4 sm:$0xff]   ;;  %v5029_v31 = vld [vmem:[#allocation5 + $0x160] ss:$52 sps:$4 sm:$0xff]  }
  0xef   :  { %2200 = vmatprep.subr.bf16.mxu0 %v4944_v32  ;;  %2282 = vmatprep.subr.bf16.mxu1 %v4947_v33  ;;  %v5034_v32 = vld [vmem:[#allocation5 + $0x1c4] ss:$52 sps:$4 sm:$0xff]   ;;  %v5037_v33 = vld [vmem:[#allocation5 + $0x1cc] ss:$52 sps:$4 sm:$0xff]  }
  0xf2   :  { %2201 = vmatpush1.bf16.msra.mxu0 %v4942_v34  ;;  %2283 = vmatpush1.bf16.msra.mxu1 %v4945_v35  ;;  %v5032_v34 = vld [vmem:[#allocation5 + $0x1c0] ss:$52 sps:$4 sm:$0xff]   ;;  %v5035_v35 = vld [vmem:[#allocation5 + $0x1c8] ss:$52 sps:$4 sm:$0xff]  }
  0xf3   :  { %2202 = vmatprep.subr.bf16.mxu0 %v4950_v36  ;;  %2284 = vmatprep.subr.bf16.mxu1 %v4953_v37  ;;  %v5040_v36 = vld [vmem:[#allocation5 + $0x22c] ss:$52 sps:$4 sm:$0xff]   ;;  %v5043_v37 = vld [vmem:[#allocation5 + $0x234] ss:$52 sps:$4 sm:$0xff]  }
  0xf6   :  { %2203 = vmatpush1.bf16.msra.mxu0 %v4948_v38  ;;  %2285 = vmatpush1.bf16.msra.mxu1 %v4951_v39  ;;  %v5038_v38 = vld [vmem:[#allocation5 + $0x228] ss:$52 sps:$4 sm:$0xff]   ;;  %v5041_v39 = vld [vmem:[#allocation5 + $0x230] ss:$52 sps:$4 sm:$0xff]  }
  0xf7   :  { %2204 = vmatprep.subr.bf16.mxu0 %v4956_v40  ;;  %2286 = vmatprep.subr.bf16.mxu1 %v4959_v41  ;;  %v5046_v40 = vld [vmem:[#allocation5 + $0x294] ss:$52 sps:$4 sm:$0xff]   ;;  %v5049_v41 = vld [vmem:[#allocation5 + $0x29c] ss:$52 sps:$4 sm:$0xff]  }
  0xfa   :  { %2205 = vmatpush1.bf16.msra.mxu0 %v4954_v43  ;;  %2287 = vmatpush1.bf16.msra.mxu1 %v4957_v44  ;;  %v5044_v43 = vld [vmem:[#allocation5 + $0x290] ss:$52 sps:$4 sm:$0xff]   ;;  %v5047_v44 = vld [vmem:[#allocation5 + $0x298] ss:$52 sps:$4 sm:$0xff]  }
  0xfb   :  { %2215 = vmatprep.subr.bf16.mxu0 %v4962_v45  ;;  %2297 = vmatprep.subr.bf16.mxu1 %v4965_v46  ;;  %v5052_v45 = vld [vmem:[#allocation5 + $0x2fc] ss:$52 sps:$4 sm:$0xff]   ;;  %v5055_v46 = vld [vmem:[#allocation5 + $0x304] ss:$52 sps:$4 sm:$0xff]  }
  0xfd   :  { %2207 = vmatmul.mubr.bf16.vlgmr.msra.gmra.mrb[4].mxu0 %v5476_v48  ;;  %2289 = vmatmul.mubr.bf16.vlgmr.msra.gmra.mrb[4].mxu1 %v5476_v48 }
  0xfe   :  { %2216 = vmatpush1.bf16.msra.mxu0 %v4960_v47  ;;  %2298 = vmatpush1.bf16.msra.mxu1 %v4963_v49  ;;  %v5050_v47 = vld [vmem:[#allocation5 + $0x2f8] ss:$52 sps:$4 sm:$0xff]   ;;  %v5053_v49 = vld [vmem:[#allocation5 + $0x300] ss:$52 sps:$4 sm:$0xff]  }
  0xff   :  { %2217 = vmatprep.subr.bf16.mxu0 %v4968_v50  ;;  %2299 = vmatprep.subr.bf16.mxu1 %v4971_v51  ;;  %v5058_v50 = vld [vmem:[#allocation5 + $0x364] ss:$52 sps:$4 sm:$0xff]   ;;  %v5061_v51 = vld [vmem:[#allocation5 + $0x36c] ss:$52 sps:$4 sm:$0xff]  }
 0x100   :  { %2247 = vmatprep.mubr.bf16.mxu0 %v6900_v15  ;;  %2329 = vmatprep.mubr.bf16.mxu1 %v6900_v15 }
 0x102   :  { %2218 = vmatpush1.bf16.msra.mxu0 %v4966_v52  ;;  %2300 = vmatpush1.bf16.msra.mxu1 %v4969_v53  ;;  %v5056_v52 = vld [vmem:[#allocation5 + $0x360] ss:$52 sps:$4 sm:$0xff]   ;;  %v5059_v53 = vld [vmem:[#allocation5 + $0x368] ss:$52 sps:$4 sm:$0xff]  }
 0x103   :  { %2219 = vmatprep.subr.bf16.mxu0 %v4974_v54  ;;  %2301 = vmatprep.subr.bf16.mxu1 %v4977_v55  ;;  %v5064_v54 = vld [vmem:[#allocation5 + $0x3cc] ss:$52 sps:$4 sm:$0xff]   ;;  %v5067_v55 = vld [vmem:[#allocation5 + $0x3d4] ss:$52 sps:$4 sm:$0xff]  }
 0x106   :  { %2220 = vmatpush1.bf16.msra.mxu0 %v4972_v56  ;;  %2302 = vmatpush1.bf16.msra.mxu1 %v4975_v57  ;;  %v5062_v56 = vld [vmem:[#allocation5 + $0x3c8] ss:$52 sps:$4 sm:$0xff]   ;;  %v5065_v57 = vld [vmem:[#allocation5 + $0x3d0] ss:$52 sps:$4 sm:$0xff]  }
 0x107   :  { %2221 = vmatprep.subr.bf16.mxu0 %v4980_v59  ;;  %2303 = vmatprep.subr.bf16.mxu1 %v4983_v60  ;;  %v5070_v59 = vld [vmem:[#allocation5 + $0x434] ss:$52 sps:$4 sm:$0xff]   ;;  %v5073_v60 = vld [vmem:[#allocation5 + $0x43c] ss:$52 sps:$4 sm:$0xff]  }
 0x10a   :  { %2222 = vmatpush1.bf16.msra.mxu0 %v4978_v61  ;;  %2304 = vmatpush1.bf16.msra.mxu1 %v4981_v62  ;;  %v5068_v61 = vld [vmem:[#allocation5 + $0x430] ss:$52 sps:$4 sm:$0xff]   ;;  %v5071_v62 = vld [vmem:[#allocation5 + $0x438] ss:$52 sps:$4 sm:$0xff]  }
 0x10b   :  { %2223 = vmatprep.subr.bf16.mxu0 %v4986_v63  ;;  %2305 = vmatprep.subr.bf16.mxu1 %v4989_v0  ;;  %v5076_v63 = vld [vmem:[#allocation5 + $0x49c] ss:$52 sps:$4 sm:$0xff]   ;;  %v5079_v0 = vld [vmem:[#allocation5 + $0x4a4] ss:$52 sps:$4 sm:$0xff]  }
 0x10e   :  { %2224 = vmatpush1.bf16.msra.mxu0 %v4984_v1  ;;  %2306 = vmatpush1.bf16.msra.mxu1 %v4987_v2  ;;  %v5074_v1 = vld [vmem:[#allocation5 + $0x498] ss:$52 sps:$4 sm:$0xff]   ;;  %v5077_v2 = vld [vmem:[#allocation5 + $0x4a0] ss:$52 sps:$4 sm:$0xff]  }
 0x10f   :  { %2225 = vmatprep.subr.bf16.mxu0 %v4992_v3  ;;  %2307 = vmatprep.subr.bf16.mxu1 %v4995_v4  ;;  %v5082_v3 = vld [vmem:[#allocation5 + $0x504] ss:$52 sps:$4 sm:$0xff]   ;;  %v5085_v4 = vld [vmem:[#allocation5 + $0x50c] ss:$52 sps:$4 sm:$0xff]  }
 0x112   :  { %2226 = vmatpush1.bf16.msra.mxu0 %v4990_v5  ;;  %2308 = vmatpush1.bf16.msra.mxu1 %v4993_v6  ;;  %v5080_v5 = vld [vmem:[#allocation5 + $0x500] ss:$52 sps:$4 sm:$0xff]   ;;  %v5083_v6 = vld [vmem:[#allocation5 + $0x508] ss:$52 sps:$4 sm:$0xff]  }
 0x113   :  { %2227 = vmatprep.subr.bf16.mxu0 %v4998_v7  ;;  %2309 = vmatprep.subr.bf16.mxu1 %v5001_v8  ;;  %v5088_v7 = vld [vmem:[#allocation5 + $0x56c] ss:$52 sps:$4 sm:$0xff]   ;;  %v5091_v8 = vld [vmem:[#allocation5 + $0x574] ss:$52 sps:$4 sm:$0xff]  }
 0x116   :  { %2228 = vmatpush1.bf16.msra.mxu0 %v4996_v9  ;;  %2310 = vmatpush1.bf16.msra.mxu1 %v4999_v10  ;;  %v5086_v9 = vld [vmem:[#allocation5 + $0x568] ss:$52 sps:$4 sm:$0xff]   ;;  %v5089_v10 = vld [vmem:[#allocation5 + $0x570] ss:$52 sps:$4 sm:$0xff]  }
 0x117   :  { %2229 = vmatprep.subr.bf16.mxu0 %v5004_v11  ;;  %2311 = vmatprep.subr.bf16.mxu1 %v5007_v12  ;;  %v5094_v11 = vld [vmem:[#allocation5 + $0x5d4] ss:$52 sps:$4 sm:$0xff]   ;;  %v5097_v12 = vld [vmem:[#allocation5 + $0x5dc] ss:$52 sps:$4 sm:$0xff]  }
 0x11a   :  { %2230 = vmatpush1.bf16.msra.mxu0 %v5002_v13  ;;  %2312 = vmatpush1.bf16.msra.mxu1 %v5005_v14  ;;  %v5092_v13 = vld [vmem:[#allocation5 + $0x5d0] ss:$52 sps:$4 sm:$0xff]   ;;  %v5095_v14 = vld [vmem:[#allocation5 + $0x5d8] ss:$52 sps:$4 sm:$0xff]  }
 0x11b   :  { %2338 = vmatprep.subr.bf16.mxu0 %v5010_v16  ;;  %2420 = vmatprep.subr.bf16.mxu1 %v5013_v17  ;;  %v5100_v16 = vld [vmem:[#allocation5 + $0x63c] ss:$52 sps:$4 sm:$0xff]   ;;  %v5103_v17 = vld [vmem:[#allocation5 + $0x644] ss:$52 sps:$4 sm:$0xff]  }
 0x11d   :  { %2248 = vmatmul.mubr.bf16.vlgmr.msra.gmra.mrb[4].mxu0 %v5493_v42  ;;  %2330 = vmatmul.mubr.bf16.vlgmr.msra.gmra.mrb[4].mxu1 %v5493_v42 }
 0x11e   :  { %2339 = vmatpush1.bf16.msra.mxu0 %v5008_v18  ;;  %2421 = vmatpush1.bf16.msra.mxu1 %v5011_v19  ;;  %v5098_v18 = vld [vmem:[#allocation5 + $0x638] ss:$52 sps:$4 sm:$0xff]   ;;  %v5101_v19 = vld [vmem:[#allocation5 + $0x640] ss:$52 sps:$4 sm:$0xff]  }
 0x11f   :  { %2340 = vmatprep.subr.bf16.mxu0 %v5016_v20  ;;  %2422 = vmatprep.subr.bf16.mxu1 %v5019_v21  ;;  %v5106_v20 = vld [vmem:[#allocation5 + $0x6a4] ss:$52 sps:$4 sm:$0xff]   ;;  %v5109_v21 = vld [vmem:[#allocation5 + $0x6ac] ss:$52 sps:$4 sm:$0xff]  }
 0x120   :  { %2370 = vmatprep.mubr.bf16.mxu0 %v5483_v58  ;;  %2452 = vmatprep.mubr.bf16.mxu1 %v5483_v58 }
 0x122   :  { %2341 = vmatpush1.bf16.msra.mxu0 %v5014_v22  ;;  %2423 = vmatpush1.bf16.msra.mxu1 %v5017_v23  ;;  %v5104_v22 = vld [vmem:[#allocation5 + $0x6a0] ss:$52 sps:$4 sm:$0xff]   ;;  %v5107_v23 = vld [vmem:[#allocation5 + $0x6a8] ss:$52 sps:$4 sm:$0xff]  }
 0x123   :  { %2342 = vmatprep.subr.bf16.mxu0 %v5022_v24  ;;  %2424 = vmatprep.subr.bf16.mxu1 %v5025_v25  ;;  %v5112_v24 = vld [vmem:[#allocation5 + $0x70c] ss:$52 sps:$4 sm:$0xff]   ;;  %v5115_v25 = vld [vmem:[#allocation5 + $0x714] ss:$52 sps:$4 sm:$0xff]  }
 0x126   :  { %2343 = vmatpush1.bf16.msra.mxu0 %v5020_v26  ;;  %2425 = vmatpush1.bf16.msra.mxu1 %v5023_v27  ;;  %v5110_v26 = vld [vmem:[#allocation5 + $0x708] ss:$52 sps:$4 sm:$0xff]   ;;  %v5113_v27 = vld [vmem:[#allocation5 + $0x710] ss:$52 sps:$4 sm:$0xff]  }
 0x127   :  { %2344 = vmatprep.subr.bf16.mxu0 %v5028_v28  ;;  %2426 = vmatprep.subr.bf16.mxu1 %v5031_v29  ;;  %v5118_v28 = vld [vmem:[#allocation5 + $0x774] ss:$52 sps:$4 sm:$0xff]   ;;  %v5121_v29 = vld [vmem:[#allocation5 + $0x77c] ss:$52 sps:$4 sm:$0xff]  }
 0x12a   :  { %2345 = vmatpush1.bf16.msra.mxu0 %v5026_v30  ;;  %2427 = vmatpush1.bf16.msra.mxu1 %v5029_v31  ;;  %v5116_v30 = vld [vmem:[#allocation5 + $0x770] ss:$52 sps:$4 sm:$0xff]   ;;  %v5119_v31 = vld [vmem:[#allocation5 + $0x778] ss:$52 sps:$4 sm:$0xff]  }
 0x12b   :  { %2346 = vmatprep.subr.bf16.mxu0 %v5034_v32  ;;  %2428 = vmatprep.subr.bf16.mxu1 %v5037_v33  ;;  %v5124_v32 = vld [vmem:[#allocation5 + $0x7dc] ss:$52 sps:$4 sm:$0xff]   ;;  %v5127_v33 = vld [vmem:[#allocation5 + $0x7e4] ss:$52 sps:$4 sm:$0xff]  }
 0x12e   :  { %2347 = vmatpush1.bf16.msra.mxu0 %v5032_v34  ;;  %2429 = vmatpush1.bf16.msra.mxu1 %v5035_v35  ;;  %v5122_v34 = vld [vmem:[#allocation5 + $0x7d8] ss:$52 sps:$4 sm:$0xff]   ;;  %v5125_v35 = vld [vmem:[#allocation5 + $0x7e0] ss:$52 sps:$4 sm:$0xff]  }
 0x12f   :  { %2348 = vmatprep.subr.bf16.mxu0 %v5040_v36  ;;  %2430 = vmatprep.subr.bf16.mxu1 %v5043_v37  ;;  %v5130_v36 = vld [vmem:[#allocation5 + $0x844] ss:$52 sps:$4 sm:$0xff]   ;;  %v5133_v37 = vld [vmem:[#allocation5 + $0x84c] ss:$52 sps:$4 sm:$0xff]  }
 0x132   :  { %2349 = vmatpush1.bf16.msra.mxu0 %v5038_v38  ;;  %2431 = vmatpush1.bf16.msra.mxu1 %v5041_v39  ;;  %v5128_v38 = vld [vmem:[#allocation5 + $0x840] ss:$52 sps:$4 sm:$0xff]   ;;  %v5131_v39 = vld [vmem:[#allocation5 + $0x848] ss:$52 sps:$4 sm:$0xff]  }
 0x133   :  { %2350 = vmatprep.subr.bf16.mxu0 %v5046_v40  ;;  %2432 = vmatprep.subr.bf16.mxu1 %v5049_v41  ;;  %v5136_v40 = vld [vmem:[#allocation5 + $0x8ac] ss:$52 sps:$4 sm:$0xff]   ;;  %v5139_v41 = vld [vmem:[#allocation5 + $0x8b4] ss:$52 sps:$4 sm:$0xff]  }
 0x136   :  { %2351 = vmatpush1.bf16.msra.mxu0 %v5044_v43  ;;  %2433 = vmatpush1.bf16.msra.mxu1 %v5047_v44  ;;  %v5134_v43 = vld [vmem:[#allocation5 + $0x8a8] ss:$52 sps:$4 sm:$0xff]   ;;  %v5137_v44 = vld [vmem:[#allocation5 + $0x8b0] ss:$52 sps:$4 sm:$0xff]  }
 0x137   :  { %2352 = vmatprep.subr.bf16.mxu0 %v5052_v45  ;;  %2434 = vmatprep.subr.bf16.mxu1 %v5055_v46  ;;  %v5142_v45 = vld [vmem:[#allocation5 + $0x914] ss:$52 sps:$4 sm:$0xff]   ;;  %v5145_v46 = vld [vmem:[#allocation5 + $0x91c] ss:$52 sps:$4 sm:$0xff]  }
 0x13a   :  { %2353 = vmatpush1.bf16.msra.mxu0 %v5050_v47  ;;  %2435 = vmatpush1.bf16.msra.mxu1 %v5053_v49  ;;  %v5140_v47 = vld [vmem:[#allocation5 + $0x910] ss:$52 sps:$4 sm:$0xff]   ;;  %v5143_v49 = vld [vmem:[#allocation5 + $0x918] ss:$52 sps:$4 sm:$0xff]  }
 0x13b   :  { %2354 = vmatprep.subr.bf16.mxu0 %v5058_v50  ;;  %2436 = vmatprep.subr.bf16.mxu1 %v5061_v51  ;;  %v5148_v50 = vld [vmem:[#allocation5 + $0x97c] ss:$52 sps:$4 sm:$0xff]   ;;  %v5151_v51 = vld [vmem:[#allocation5 + $0x984] ss:$52 sps:$4 sm:$0xff]  }
 0x13e   :  { %2355 = vmatpush1.bf16.msra.mxu0 %v5056_v52  ;;  %2437 = vmatpush1.bf16.msra.mxu1 %v5059_v53  ;;  %v5146_v52 = vld [vmem:[#allocation5 + $0x978] ss:$52 sps:$4 sm:$0xff]   ;;  %v5149_v53 = vld [vmem:[#allocation5 + $0x980] ss:$52 sps:$4 sm:$0xff]  }
 0x13f   :  { %2356 = vmatprep.subr.bf16.mxu0 %v5064_v54  ;;  %2438 = vmatprep.subr.bf16.mxu1 %v5067_v55  ;;  %v5152_v54 = vld [vmem:[#allocation5 + $0x370] ss:$52 sps:$4 sm:$0xff]  }
 0x140   :  { %v5153_v55 = vld [vmem:[#allocation5 + $0x30] ss:$52 sps:$4 sm:$0xff]  }
 0x142   :  { %2357 = vmatpush1.bf16.msra.mxu0 %v5062_v56  ;;  %2439 = vmatpush1.bf16.msra.mxu1 %v5065_v57  ;;  %v5154_v56 = vld [vmem:[#allocation5 + $0x6b0] ss:$52 sps:$4 sm:$0xff]   ;;  %v5377_v57 = vmov 0.0  }
 0x143   :  { %2358 = vmatprep.subr.bf16.mxu0 %v5070_v59  ;;  %2440 = vmatprep.subr.bf16.mxu1 %v5073_v60  ;;  %v5155_v59 = vld [vmem:[#allocation5 + $0x3d8] ss:$52 sps:$4 sm:$0xff]  }
 0x144   :  { %v5156_v60 = vld [vmem:[#allocation5 + $0x98] ss:$52 sps:$4 sm:$0xff]  }
 0x146   :  { %2359 = vmatpush1.bf16.msra.mxu0 %v5068_v61  ;;  %2441 = vmatpush1.bf16.msra.mxu1 %v5071_v62  ;;  %v5157_v61 = vld [vmem:[#allocation5 + $0x718] ss:$52 sps:$4 sm:$0xff]   ;;  %v5158_v62 = vld [vmem:[#allocation5 + $0x440] ss:$52 sps:$4 sm:$0xff]  }
 0x147   :  { %2360 = vmatprep.subr.bf16.mxu0 %v5076_v63  ;;  %2442 = vmatprep.subr.bf16.mxu1 %v5079_v0  ;;  %v2586_v63 = vlaneseq  ;;  %v5159_v0 = vld [vmem:[#allocation5 + $0x100] ss:$52 sps:$4 sm:$0xff]  }
 0x14a   :  { %2361 = vmatpush1.bf16.msra.mxu0 %v5074_v1  ;;  %2443 = vmatpush1.bf16.msra.mxu1 %v5077_v2  ;;  %v5160_v1 = vld [vmem:[#allocation5 + $0x780] ss:$52 sps:$4 sm:$0xff]   ;;  %v5161_v2 = vld [vmem:[#allocation5 + $0x4a8] ss:$52 sps:$4 sm:$0xff]  }
 0x14b   :  { %2362 = vmatprep.subr.bf16.mxu0 %v5082_v3  ;;  %2444 = vmatprep.subr.bf16.mxu1 %v5085_v4  ;;  %v5518_v3 = vshrl.u32 %v2586_v63, 7  ;;  %v5162_v4 = vld [vmem:[#allocation5 + $0x168] ss:$52 sps:$4 sm:$0xff]  }
 0x14e   :  { %2363 = vmatpush1.bf16.msra.mxu0 %v5080_v5  ;;  %2445 = vmatpush1.bf16.msra.mxu1 %v5083_v6  ;;  %v5163_v5 = vld [vmem:[#allocation5 + $0x7e8] ss:$52 sps:$4 sm:$0xff]   ;;  %v5522_v6 = vsub.s32 0, %v5518_v3 }
 0x14f   :  { %2364 = vmatprep.subr.bf16.mxu0 %v5088_v7  ;;  %2446 = vmatprep.subr.bf16.mxu1 %v5091_v8  ;;  %v5525_v7 = vsub.s32 2, %v5518_v3  ;;  %v5165_v8 = vld [vmem:[#allocation5 + $0x1d0] ss:$52 sps:$4 sm:$0xff]  }
 0x152   :  { %2365 = vmatpush1.bf16.msra.mxu0 %v5086_v9  ;;  %2447 = vmatpush1.bf16.msra.mxu1 %v5089_v10  ;;  %v5166_v9 = vld [vmem:[#allocation5 + $0x850] ss:$52 sps:$4 sm:$0xff]  }
 0x153   :  { %2366 = vmatprep.subr.bf16.mxu0 %v5094_v11  ;;  %2448 = vmatprep.subr.bf16.mxu1 %v5097_v12  ;;  %v5527_v10 = vld [vmem:[#allocation7] sm:$0xff]  ;;  %v5530_v11 = vsub.s32 1, %v5518_v3  ;;  %v5167_v12 = vld [vmem:[#allocation5 + $0x578] ss:$52 sps:$4 sm:$0xff]  }
 0x156   :  { %2367 = vmatpush1.bf16.msra.mxu0 %v5092_v13  ;;  %2449 = vmatpush1.bf16.msra.mxu1 %v5095_v14  ;;  %v5533_v13 = vld [vmem:[#allocation8] sm:$0xff]  ;;  %v2589_v14 = vrot.slane %v5527_v10, %v5522_v6 }
 0x157   :  { %2368 = vmatprep.subr.bf16.mxu0 %v5100_v16  ;;  %2450 = vmatprep.subr.bf16.mxu1 %v5103_v17  ;;  %v2597_v16 = vrot.slane %v5527_v10, %v5525_v7  ;;  %v2593_v17 = vrot.slane %v5527_v10, %v5530_v11 }
 0x15a   :  { %2369 = vmatpush1.bf16.msra.mxu0 %v5098_v18  ;;  %2451 = vmatpush1.bf16.msra.mxu1 %v5101_v19  ;;  %v5168_v18 = vld [vmem:[#allocation5 + $0x238] ss:$52 sps:$4 sm:$0xff]  }
 0x15b   :  { %2379 = vmatprep.subr.bf16.mxu0 %v5106_v20  ;;  %2461 = vmatprep.subr.bf16.mxu1 %v5109_v21  ;;  %v5169_v19 = vld [vmem:[#allocation5 + $0x8b8] ss:$52 sps:$4 sm:$0xff]   ;;  %v2671_v20 = vrot.slane %v5533_v13, %v5522_v6  ;;  %v2679_v21 = vrot.slane %v5533_v13, %v5525_v7 }
 0x15d   :  { %2371 = vmatmul.mubr.bf16.vlgmr.msra.gmra.mrb[8].mxu0 %v5476_v48  ;;  %2453 = vmatmul.mubr.bf16.vlgmr.msra.gmra.mrb[8].mxu1 %v5476_v48 }
 0x15e   :  { %2380 = vmatpush1.bf16.msra.mxu0 %v5104_v22  ;;  %2462 = vmatpush1.bf16.msra.mxu1 %v5107_v23  ;;  %v5170_v22 = vld [vmem:[#allocation5 + $0x5e0] ss:$52 sps:$4 sm:$0xff]  }
 0x15f   :  { %2381 = vmatprep.subr.bf16.mxu0 %v5112_v24  ;;  %2463 = vmatprep.subr.bf16.mxu1 %v5115_v25  ;;  %v2675_v25 = vrot.slane %v5533_v13, %v5530_v11 }
 0x160   :  { %2411 = vmatprep.mubr.bf16.mxu0 %v6900_v15  ;;  %2493 = vmatprep.mubr.bf16.mxu1 %v6900_v15 }
 0x162   :  { %2382 = vmatpush1.bf16.msra.mxu0 %v5110_v26  ;;  %2464 = vmatpush1.bf16.msra.mxu1 %v5113_v27 }
 0x163   :  { %2383 = vmatprep.subr.bf16.mxu0 %v5118_v28  ;;  %2465 = vmatprep.subr.bf16.mxu1 %v5121_v29 }
 0x166   :  { %2384 = vmatpush1.bf16.msra.mxu0 %v5116_v30  ;;  %2466 = vmatpush1.bf16.msra.mxu1 %v5119_v31 }
 0x167   :  { %2385 = vmatprep.subr.bf16.mxu0 %v5124_v32  ;;  %2467 = vmatprep.subr.bf16.mxu1 %v5127_v33  ;;  %v5171_v33 = vld [vmem:[#allocation5 + $0x2a0] ss:$52 sps:$4 sm:$0xff]  }
 0x16a   :  { %2386 = vmatpush1.bf16.msra.mxu0 %v5122_v34  ;;  %2468 = vmatpush1.bf16.msra.mxu1 %v5125_v35  ;;  %v5172_v34 = vld [vmem:[#allocation5 + $0x920] ss:$52 sps:$4 sm:$0xff]  }
 0x16b   :  { %2387 = vmatprep.subr.bf16.mxu0 %v5130_v36  ;;  %2469 = vmatprep.subr.bf16.mxu1 %v5133_v37  ;;  %v5564_v37 = vsub.s32 3, %v5518_v3 }
 0x16e   :  { %2388 = vmatpush1.bf16.msra.mxu0 %v5128_v38  ;;  %2470 = vmatpush1.bf16.msra.mxu1 %v5131_v39 }
 0x16f   :  { %2389 = vmatprep.subr.bf16.mxu0 %v5136_v40  ;;  %2471 = vmatprep.subr.bf16.mxu1 %v5139_v41  ;;  %v5173_v40 = vld [vmem:[#allocation5 + $0x648] ss:$52 sps:$4 sm:$0xff]  }
 0x172   :  { %2390 = vmatpush1.bf16.msra.mxu0 %v5134_v43  ;;  %2472 = vmatpush1.bf16.msra.mxu1 %v5137_v44 }
 0x173   :  { %2391 = vmatprep.subr.bf16.mxu0 %v5142_v45  ;;  %2473 = vmatprep.subr.bf16.mxu1 %v5145_v46  ;;  %v5174_v45 = vld [vmem:[#allocation5 + $0x308] ss:$52 sps:$4 sm:$0xff]  }
 0x176   :  { %2392 = vmatpush1.bf16.msra.mxu0 %v5140_v47  ;;  %2474 = vmatpush1.bf16.msra.mxu1 %v5143_v49  ;;  %v5175_v49 = vld [vmem:[#allocation5 + $0x988] ss:$52 sps:$4 sm:$0xff]  }
 0x177   :  { %2393 = vmatprep.subr.bf16.mxu0 %v5148_v50  ;;  %2475 = vmatprep.subr.bf16.mxu1 %v5151_v51 }
 0x17a   :  { %2394 = vmatpush1.bf16.msra.mxu0 %v5146_v52  ;;  %2476 = vmatpush1.bf16.msra.mxu1 %v5149_v53  ;;  %v2601_v52 = vrot.slane %v5527_v10, %v5564_v37 }
 0x17b   :  { %4576 = vmatprep.subr.bf16.mxu0 %v5152_v54  ;;  %4607 = vmatprep.subr.bf16.mxu1 %v5377_v57 }
 0x17d   :  { %2412 = vmatmul.mubr.bf16.vlgmr.msra.gmra.mrb[8].mxu0 %v5493_v42  ;;  %2494 = vmatmul.mubr.bf16.vlgmr.msra.gmra.mrb[8].mxu1 %v5493_v42 }
 0x17e   :  { %4577 = vmatpush3.bf16.msra.mxu0 %v5153_v55  ;;  %4608 = vmatpush3.bf16.msra.mxu1 %v5154_v56 }
 0x17f   :  { %4578 = vmatprep.subr.bf16.mxu0 %v5155_v59  ;;  %4609 = vmatprep.subr.bf16.mxu1 %v5377_v57 }
 0x180   :  { %2534 = vmatprep.mubr.bf16.mxu0 %v5483_v58  ;;  %4623 = vmatprep.mubr.msk.bf16.mxu1 %vm5378_vm0, %v5377_v57  ;;  %v5164_v58 = vld [vmem:[#allocation5 + $0x510] ss:$52 sps:$4 sm:$0xff]  }
 0x182   :  { %4579 = vmatpush3.bf16.msra.mxu0 %v5156_v60  ;;  %4610 = vmatpush3.bf16.msra.mxu1 %v5157_v61 }
 0x183   :  { %4580 = vmatprep.subr.bf16.mxu0 %v5158_v62  ;;  %4611 = vmatprep.subr.bf16.mxu1 %v5377_v57 }
 0x186   :  { %4581 = vmatpush3.bf16.msra.mxu0 %v5159_v0  ;;  %4612 = vmatpush3.bf16.msra.mxu1 %v5160_v1  ;;  %v2683_v0 = vrot.slane %v5533_v13, %v5564_v37 }
 0x187   :  { %4582 = vmatprep.subr.bf16.mxu0 %v5161_v2  ;;  %4613 = vmatprep.subr.bf16.mxu1 %v5377_v57 }
 0x18a   :  { %4583 = vmatpush3.bf16.msra.mxu0 %v5162_v4  ;;  %4614 = vmatpush3.bf16.msra.mxu1 %v5163_v5 }
 0x18b   :  { %4584 = vmatprep.subr.bf16.mxu0 %v5164_v58  ;;  %4615 = vmatprep.subr.bf16.mxu1 %v5377_v57 }
 0x18e   :  { %4585 = vmatpush3.bf16.msra.mxu0 %v5165_v8  ;;  %4616 = vmatpush3.bf16.msra.mxu1 %v5166_v9 }
 0x18f   :  { %4586 = vmatprep.subr.bf16.mxu0 %v5167_v12  ;;  %4617 = vmatprep.subr.bf16.mxu1 %v5377_v57 }
 0x190   :  { %v5546_v23 = vpop.f32.mrb[0].mxu0  ;;  %v5548_v24 = vpop.f32.mrb[0].mxu1 }
 0x191   :  { %v2651_v26 = vmul.f32 %v2589_v14, %v5546_v23  ;;  %v2653_v27 = vmul.f32 %v2597_v16, %v5548_v24  ;;  %v5554_v28 = vpop.f32.mrb[1].mxu0  ;;  %v5556_v29 = vpop.f32.mrb[1].mxu1 }
 0x192   :  { %v2652_v30 = vmul.f32 %v2593_v17, %v5554_v28  ;;  %v2089_v31 = vpop.f32.mrb[2].mxu0  ;;  %v2171_v32 = vpop.f32.mrb[2].mxu1  ;;  %4587 = vmatpush3.bf16.msra.mxu0 %v5168_v18  ;;  %4618 = vmatpush3.bf16.msra.mxu1 %v5169_v19  ;;  %v2654_v63 = vmul.f32 %v2601_v52, %v5556_v29  ;;  %v5379_v19 = vmov 683565275  }
 0x193   :  { %v5559_v35 = vadd.f32 %v2671_v20, %v2651_v26  ;;  %v5561_v36 = vadd.f32 %v2679_v21, %v2653_v27  ;;  %v2090_v38 = vpop.f32.mrb[3].mxu0  ;;  %v2172_v39 = vpop.f32.mrb[3].mxu1  ;;  %4588 = vmatprep.subr.bf16.mxu0 %v5170_v22  ;;  %4619 = vmatprep.subr.bf16.mxu1 %v5377_v57  ;;  %v5380_v22 = vmov 2475754826   ;;  %v5381_v26 = vmov 2131351028  }
 0x194   :  { %v5567_v41 = vadd.f32 %v2675_v25, %v2652_v30  ;;  %v5587_v12 = vadd.f32 %v2683_v0, %v2654_v63  ;;  %v5382_v30 = vmov 2102212464   ;;  %v5383_v32 = vmov 920167782  }
 0x195   :  { %v2746_v43 = vand.u32 2147483647, %v5559_v35  ;;  %v2749_v44 = vand.u32 2139095040, %v5559_v35  ;;  %v2954_v46 = vand.u32 2147483647, %v5561_v36  ;;  %v2957_v47 = vand.u32 2139095040, %v5561_v36 }
 0x196   :  { %4589 = vmatpush3.bf16.msra.mxu0 %v5171_v33  ;;  %4620 = vmatpush3.bf16.msra.mxu1 %v5172_v34  ;;  %v2853_v55 = vand.u32 2139095040, %v5567_v41  ;;  %v2850_v2 = vand.u32 2147483647, %v5567_v41  ;;  %vm2748_vm15 = vcmp.lt.s32.totalorder %v5559_v35, 0 }
 0x197   :  { %v2750_v50 = vshrl.u32 %v2749_v44, 23  ;;  %v2753_v51 = vand.u32 8388607, %v2746_v43  ;;  %4590 = vmatprep.subr.bf16.mxu0 %v5173_v40  ;;  %4621 = vmatprep.subr.bf16.mxu1 %v5377_v57  ;;  %v2958_v53 = vshrl.u32 %v2957_v47, 23  ;;  %v2961_v54 = vand.u32 8388607, %v2954_v46 }
 0x198   :  { %v2854_v60 = vshrl.u32 %v2853_v55, 23  ;;  %v5595_v17 = vand.u32 8388607, %v2850_v2  ;;  %vm5692_vm0 = vcmp.le.f32.partialorder %v2746_v43, 0.7853982 }
 0x199   :  { %v4524_v56 = vadd.s32 4294967169, %v2750_v50  ;;  %v4532_v59 = vadd.s32 4294967169, %v2958_v53  ;;  %v2754_v61 = vor.u32 8388608, %v2753_v51  ;;  %v2962_v1 = vor.u32 8388608, %v2961_v54 }
 0x19a   :  { %4591 = vmatpush3.bf16.msra.mxu0 %v5174_v45  ;;  %4622 = vmatpush3.bf16.msra.mxu1 %v5175_v49  ;;  %v4528_v4 = vadd.s32 4294967169, %v2854_v60  ;;  %v5384_v45 = vmov 1326507024  }
 0x19b   :  { %v2756_v62 = vadd.s32 1, %v4524_v56  ;;  %v2964_v57 = vadd.s32 1, %v4532_v59  ;;  %v5589_v14 = vshll.u32 %v2754_v61, 8  ;;  %v5591_v16 = vshll.u32 %v2962_v1, 8  ;;  %v4098_v61 = vld [vmem:[#allocation10] sm:$0xff] }
 0x19c   :  { %v5597_v18 = vadd.s32 1, %v4528_v4  ;;  %vm4100_vm8 = vcmp.ne.f32.partialorder %v4098_v61, 0.0 }
 0x19d   :  { %vm2757_vm1 = vcmp.gt.s32.totalorder %v2756_v62, 0  ;;  %2535 = vmatmul.mubr.bf16.vlgmr.msra.gmra.mrb[12].mxu0 %v5476_v48  ;;  %4624 = vmatmul.mubr.bf16.vlgmr.msra.gmra.mrb[12].mxu1 %v5493_v42  ;;  %vm2965_vm2 = vcmp.gt.s32.totalorder %v2964_v57, 0 }
 0x19e   :  { %v2758_v5 = vsel %vm2757_vm1, %v2756_v62, 0  ;;  %v2966_v9 = vsel %vm2965_vm2, %v2964_v57, 0  ;;  %vm2861_vm7 = vcmp.gt.s32.totalorder %v5597_v18, 0 }
 0x19f   :  { %v2759_v58 = vshrl.u32 %v2758_v5, 5  ;;  %v2760_v8 = vand.u32 31, %v2758_v5  ;;  %v5600_v20 = vshrl.u32 %v2966_v9, 5  ;;  %v2968_v21 = vand.u32 31, %v2966_v9 }
 0x1a1   :  { %v2761_v48 = vsub.s32 32, %v2760_v8  ;;  %v2763_v42 = vshll.u32 %v5379_v19, %v2760_v8  ;;  %v2766_v25 = vshll.u32 %v5380_v22, %v2760_v8  ;;  %v2769_v27 = vshll.u32 %v5381_v26, %v2760_v8 }
 0x1a2   :  { %v2772_v31 = vshll.u32 %v5382_v30, %v2760_v8  ;;  %v2775_v33 = vshll.u32 %v5383_v32, %v2760_v8  ;;  %vm2778_vm3 = vcmp.lt.s32.totalorder %v2759_v58, 1  ;;  %vm2779_vm4 = vcmp.lt.s32.totalorder %v2759_v58, 2 }
 0x1a3   :  { %v2764_v34 = vshrl.u32 %v5380_v22, %v2761_v48  ;;  %v2767_v38 = vshrl.u32 %v5381_v26, %v2761_v48  ;;  %v2770_v39 = vshrl.u32 %v5382_v30, %v2761_v48  ;;  %v2762_v40 = vshrl.u32 %v5379_v19, %v2761_v48 }
 0x1a4   :  { %v2773_v44 = vshrl.u32 %v5383_v32, %v2761_v48  ;;  %v2776_v47 = vshrl.u32 %v5384_v45, %v2761_v48  ;;  %v2969_v52 = vsub.s32 32, %v2968_v21  ;;  %vm2780_vm5 = vcmp.lt.s32.totalorder %v2759_v58, 3 }
 0x1a5   :  { %v2765_v49 = vor.u32 %v2764_v34, %v2763_v42  ;;  %v2768_v50 = vor.u32 %v2767_v38, %v2766_v25  ;;  %v2771_v51 = vor.u32 %v2770_v39, %v2769_v27  ;;  %vm2781_vm6 = vcmp.lt.s32.totalorder %v2759_v58, 4 }
 0x1a6   :  { %v2774_v53 = vor.u32 %v2773_v44, %v2772_v31  ;;  %v2777_v54 = vor.u32 %v2776_v47, %v2775_v33  ;;  %v2971_v1 = vshll.u32 %v5379_v19, %v2968_v21  ;;  %v2972_v5 = vshrl.u32 %v5380_v22, %v2969_v52 }
 0x1a7   :  { %v2782_v55 = vsel %vm2778_vm3, %v2762_v40, %v2765_v49  ;;  %v2783_v56 = vsel %vm2781_vm6, %v2771_v51, 2102212464  ;;  %v2786_v59 = vsel %vm2778_vm3, %v2765_v49, %v2768_v50  ;;  %v2790_v60 = vsel %vm2778_vm3, %v2768_v50, %v2771_v51 }
 0x1a8   :  { %v2784_v62 = vsel %vm2780_vm5, %v2768_v50, %v2783_v56  ;;  %v2787_v63 = vsel %vm2781_vm6, %v2774_v53, 920167782  ;;  %v2791_v0 = vsel %vm2781_vm6, %v2777_v54, 1326507024  ;;  %v2974_v8 = vshll.u32 %v5380_v22, %v2968_v21 }
 0x1a9   :  { %v2788_v57 = vsel %vm2780_vm5, %v2771_v51, %v2787_v63  ;;  %v2792_v4 = vsel %vm2780_vm5, %v2774_v53, %v2791_v0  ;;  %v2785_v9 = vsel %vm2779_vm4, %v2782_v55, %v2784_v62  ;;  %v2975_v25 = vshrl.u32 %v5381_v26, %v2969_v52 }
 0x1aa   :  { %v2789_v48 = vsel %vm2779_vm4, %v2786_v59, %v2788_v57  ;;  %v2793_v42 = vsel %vm2779_vm4, %v2790_v60, %v2792_v4  ;;  %v2973_v38 = vor.u32 %v2972_v5, %v2971_v1  ;;  %v2977_v40 = vshll.u32 %v5381_v26, %v2968_v21 }
 0x1ab   :  { %v5624_v27 = vmul.u32.u64.low %v5589_v14, %v2793_v42  ;;  %v5625_v31 = vmul.u32.u64.high %v5589_v14, %v2793_v42, %v5624_v27  ;;  %v5628_v33 = vmul.u32.u64.low %v5589_v14, %v2789_v48  ;;  %v5629_v34 = vmul.u32.u64.high %v5589_v14, %v2789_v48, %v5628_v33 }
 0x1ac   :  { %v2976_v39 = vor.u32 %v2975_v25, %v2974_v8  ;;  %v2978_v44 = vshrl.u32 %v5382_v30, %v2969_v52  ;;  %v2970_v58 = vshrl.u32 %v5379_v19, %v2969_v52  ;;  %v2980_v47 = vshll.u32 %v5382_v30, %v2968_v21 }
 0x1ad   :  { %v2981_v49 = vshrl.u32 %v5383_v32, %v2969_v52  ;;  %v2984_v50 = vshrl.u32 %v5384_v45, %v2969_v52  ;;  %v2801_v51 = vmul.u32 %v5589_v14, %v2785_v9  ;;  %v2983_v54 = vshll.u32 %v5383_v32, %v2968_v21 }
 0x1ae   :  { %v2979_v53 = vor.u32 %v2978_v44, %v2977_v40  ;;  %vm2986_vm9 = vcmp.lt.s32.totalorder %v5600_v20, 1  ;;  %vm2803_vm10 = vc.u32 %v5625_v31, %v5628_v33  ;;  %v2804_v55 = vadd.s32 1, %v5629_v34 }
 0x1af   :  { %v2982_v56 = vor.u32 %v2981_v49, %v2980_v47  ;;  %vm2987_vm11 = vcmp.lt.s32.totalorder %v5600_v20, 2  ;;  %v2985_v59 = vor.u32 %v2984_v50, %v2983_v54  ;;  %vm2988_vm12 = vcmp.lt.s32.totalorder %v5600_v20, 3 }
 0x1b0   :  { %vm2989_vm13 = vcmp.lt.s32.totalorder %v5600_v20, 4  ;;  %v2994_v52 = vsel %vm2986_vm9, %v2973_v38, %v2976_v39  ;;  %v2805_v14 = vsel %vm2803_vm10, %v2804_v55, %v5629_v34  ;;  %v2998_v62 = vsel %vm2986_vm9, %v2976_v39, %v2979_v53 }
 0x1b1   :  { %v2991_v60 = vsel %vm2989_vm13, %v2979_v53, 2102212464  ;;  %v2995_v21 = vsel %vm2989_vm13, %v2982_v56, 920167782  ;;  %v2806_v63 = vadd.s32 %v2805_v14, %v2801_v51  ;;  %v2990_v0 = vsel %vm2986_vm9, %v2970_v58, %v2973_v38 }
 0x1b2   :  { %v2996_v1 = vsel %vm2988_vm12, %v2979_v53, %v2995_v21  ;;  %v2999_v57 = vsel %vm2989_vm13, %v2985_v59, 1326507024  ;;  %v2992_v4 = vsel %vm2988_vm12, %v2976_v39, %v2991_v60  ;;  %v2862_v9 = vsel %vm2861_vm7, %v5597_v18, 0 }
 0x1b3   :  { %v2997_v5 = vsel %vm2987_vm11, %v2994_v52, %v2996_v1  ;;  %v3000_v8 = vsel %vm2988_vm12, %v2982_v56, %v2999_v57  ;;  %v2807_v48 = vadd.s32 536870912, %v2806_v63  ;;  %v5662_v34 = vsel %vm4100_vm8, 1, %v6900_v15 }
 0x1b4   :  { %v3001_v42 = vsel %vm2987_vm11, %v2998_v62, %v3000_v8  ;;  %v5656_v25 = vmul.u32.u64.low %v5591_v16, %v2997_v5  ;;  %v5657_v27 = vmul.u32.u64.high %v5591_v16, %v2997_v5, %v5656_v25  ;;  %v2993_v18 = vsel %vm2987_vm11, %v2990_v0, %v2992_v4 }
 0x1b5   :  { %v5665_v38 = vmul.u32.u64.low %v5591_v16, %v3001_v42  ;;  %v5666_v39 = vmul.u32.u64.high %v5591_v16, %v3001_v42, %v5665_v38  ;;  %v2808_v40 = vshrl.u32 %v2807_v48, 30  ;;  %v2864_v44 = vand.u32 31, %v2862_v9 }
 0x1b6   :  { %v3058_v58 = vand.u32 2147483647, %v5587_v12  ;;  %v2858_v47 = vor.u32 8388608, %v5595_v17  ;;  %v3061_v49 = vand.u32 2139095040, %v5587_v12  ;;  %v3012_v61 = vadd.s32 1, %v5657_v27 }
 0x1b7   :  { %v2809_v50 = vshll.u32 %v2808_v40, 30  ;;  %v2865_v51 = vsub.s32 32, %v2864_v44  ;;  %v4107_v53 = vrot.slane %v5662_v34, %v5522_v6  ;;  %v3009_v54 = vmul.u32 %v5591_v16, %v2993_v18 }
 0x1b8   :  { %vm3011_vm14 = vc.u32 %v5666_v39, %v5656_v25  ;;  %v5685_v55 = vand.u32 8388607, %v3058_v58  ;;  %v5688_v52 = vshll.u32 %v2858_v47, 8  ;;  %v3062_v14 = vshrl.u32 %v3061_v49, 23 }
 0x1b9   :  { %v5680_v20 = vsub.s32 %v2806_v63, %v2809_v50  ;;  %v3013_v17 = vsel %vm3011_vm14, %v3012_v61, %v5657_v27  ;;  %v2868_v59 = vshrl.u32 %v5380_v22, %v2865_v51  ;;  %v2802_v60 = vadd.s32 %v5628_v33, %v5625_v31 }
 0x1ba   :  { %v3014_v56 = vadd.s32 %v3013_v17, %v3009_v54  ;;  %v2871_v62 = vshrl.u32 %v5381_v26, %v2865_v51  ;;  %v2874_v63 = vshrl.u32 %v5382_v30, %v2865_v51  ;;  %v2832_v0 = vsub.s32 4, %v2808_v40 }
 0x1bb   :  { %v2812_v21 = vsub.s32 0, %v5680_v20  ;;  %v5701_v57 = vshrl.u32 %v2862_v9, 5  ;;  %v2867_v4 = vshll.u32 %v5379_v19, %v2864_v44  ;;  %v2870_v5 = vshll.u32 %v5380_v22, %v2864_v44 }
 0x1bc   :  { %v3015_v1 = vadd.s32 536870912, %v3014_v56  ;;  %v2873_v8 = vshll.u32 %v5381_v26, %v2864_v44  ;;  %v2877_v31 = vshrl.u32 %v5383_v32, %v2865_v51  ;;  %v2876_v42 = vshll.u32 %v5382_v30, %v2864_v44 }
 0x1bd   :  { %v4525_v43 = vmin.u32 %v2812_v21, %v5680_v20  ;;  %v2869_v48 = vor.u32 %v2868_v59, %v2867_v4  ;;  %v2880_v27 = vshrl.u32 %v5384_v45, %v2865_v51  ;;  %v2872_v9 = vor.u32 %v2871_v62, %v2870_v5 }
 0x1be   :  { %v5708_v33 = vshrl.u32 %v3015_v1, 30  ;;  %v2875_v18 = vor.u32 %v2874_v63, %v2873_v8  ;;  %v2879_v47 = vshll.u32 %v5383_v32, %v2864_v44  ;;  %v2878_v50 = vor.u32 %v2877_v31, %v2876_v42 }
 0x1bf   :  { %v2814_v38 = vclz %v4525_v43  ;;  %vm2882_vm1 = vcmp.lt.s32.totalorder %v5701_v57, 1  ;;  %v4536_v61 = vadd.s32 4294967169, %v3062_v14  ;;  %v2833_v17 = vsel %vm2748_vm15, %v2832_v0, %v2808_v40 }
 0x1c0   :  { %v3017_v49 = vshll.u32 %v5708_v33, 30  ;;  %v2881_v59 = vor.u32 %v2880_v27, %v2879_v47  ;;  %vm2885_vm2 = vcmp.lt.s32.totalorder %v5701_v57, 4  ;;  %vm2883_vm3 = vcmp.lt.s32.totalorder %v5701_v57, 2 }
 0x1c1   :  { %v4526_v54 = vadd.s32 4294967294, %v2814_v38  ;;  %vm2884_vm4 = vcmp.lt.s32.totalorder %v5701_v57, 3  ;;  %v2891_v44 = vsel %vm2885_vm2, %v2878_v50, 920167782  ;;  %v2866_v62 = vshrl.u32 %v5379_v19, %v2865_v51 }
 0x1c2   :  { %v5718_v21 = vsub.s32 %v3014_v56, %v3017_v49  ;;  %v2890_v14 = vsel %vm2882_vm1, %v2869_v48, %v2872_v9  ;;  %v2892_v40 = vsel %vm2884_vm4, %v2875_v18, %v2891_v44  ;;  %v2835_v56 = vsel %vm5692_vm0, 0, %v2833_v17 }
 0x1c3   :  { %vm4527_vm5 = vcmp.lt.s32.totalorder %v4526_v54, 0  ;;  %v2894_v1 = vsel %vm2882_vm1, %v2872_v9, %v2875_v18  ;;  %vm2956_vm6 = vcmp.lt.s32.totalorder %v5561_v36, 0  ;;  %v2887_v51 = vsel %vm2885_vm2, %v2875_v18, 2102212464 }
 0x1c4   :  { %v2817_v63 = vsel %vm4527_vm5, 0, %v4526_v54  ;;  %v3020_v0 = vsub.s32 0, %v5718_v21  ;;  %v2895_v5 = vsel %vm2885_vm2, %v2881_v59, 1326507024  ;;  %v2893_v42 = vsel %vm2883_vm3, %v2890_v14, %v2892_v40 }
 0x1c5   :  { %v2818_v4 = vsub.s32 32, %v2817_v63  ;;  %v2822_v43 = vsub.s32 4294967266, %v2817_v63  ;;  %v2819_v8 = vshll.u32 %v5680_v20, %v2817_v63  ;;  %v2896_v27 = vsel %vm2884_vm4, %v2878_v50, %v2895_v5 }
 0x1c6   :  { %v4533_v31 = vmin.u32 %v3020_v0, %v5718_v21  ;;  %v2897_v49 = vsel %vm2883_vm3, %v2894_v1, %v2896_v27  ;;  %v3068_v54 = vadd.s32 1, %v4536_v61  ;;  %v3040_v17 = vsub.s32 4, %v5708_v33 }
 0x1c7   :  { %v2820_v38 = vshrl.u32 %v2802_v60, %v2818_v4  ;;  %v2823_v47 = vadd.s32 127, %v2822_v43  ;;  %v2886_v20 = vsel %vm2882_vm1, %v2866_v62, %v2869_v48  ;;  %v2888_v59 = vsel %vm2884_vm4, %v2872_v9, %v2887_v51 }
 0x1c8   :  { %v3022_v18 = vclz %v4533_v31  ;;  %v5753_v40 = vmul.u32.u64.low %v5688_v52, %v2897_v49  ;;  %v5754_v50 = vmul.u32.u64.high %v5688_v52, %v2897_v49, %v5753_v40  ;;  %vm3069_vm7 = vcmp.gt.s32.totalorder %v3068_v54, 0 }
 0x1c9   :  { %v2821_v44 = vor.u32 %v2820_v38, %v2819_v8  ;;  %v2824_v14 = vshll.u32 %v2823_v47, 23  ;;  %v5757_v63 = vmul.u32.u64.low %v5688_v52, %v2893_v42  ;;  %v5758_v0 = vmul.u32.u64.high %v5688_v52, %v2893_v42, %v5757_v63 }
 0x1ca   :  { %v4534_v60 = vadd.s32 4294967294, %v3022_v18  ;;  %v3010_v48 = vadd.s32 %v5656_v25, %v5666_v39  ;;  %v3066_v62 = vor.u32 8388608, %v5685_v55  ;;  %v3070_v9 = vsel %vm3069_vm7, %v3068_v54, 0 }
 0x1cb   :  { %v2825_v61 = vor.u32 4788187, %v2824_v14  ;;  %v2839_v1 = vadd.s32 3, %v2835_v56  ;;  %v2889_v4 = vsel %vm2883_vm3, %v2886_v20, %v2888_v59  ;;  %v3072_v43 = vand.u32 31, %v3070_v9 }
 0x1cc   :  { %vm4535_vm8 = vcmp.lt.s32.totalorder %v4534_v60, 0  ;;  %v2828_v5 = vcvt.s32.f32 %v2821_v44  ;;  %vm2907_vm9 = vc.u32 %v5754_v50, %v5757_v63  ;;  %v5771_v25 = vsel %vm2956_vm6, %v3040_v17, %v5708_v33 }
 0x1cd   :  { %v2826_v51 = vand.u32 2147483647, %v2825_v61  ;;  %v3025_v8 = vsel %vm4535_vm8, 0, %v4534_v60  ;;  %v2908_v39 = vadd.s32 1, %v5758_v0  ;;  %v2905_v57 = vmul.u32 %v5688_v52, %v2889_v4 }
 0x1ce   :  { %v3026_v31 = vsub.s32 32, %v3025_v8  ;;  %v3030_v42 = vsub.s32 4294967266, %v3025_v8  ;;  %v5775_v56 = vshrl.u32 %v3070_v9, 5  ;;  %v3073_v27 = vsub.s32 32, %v3072_v43 }
 0x1cf   :  { %v2829_v55 = vmul.f32 %v2828_v5, %v2826_v51  ;;  %v3027_v38 = vshll.u32 %v5718_v21, %v3025_v8  ;;  %v2909_v54 = vsel %vm2907_vm9, %v2908_v39, %v5758_v0  ;;  %v3075_v59 = vshll.u32 %v5379_v19, %v3072_v43 }
 0x1d0   :  { %v3028_v47 = vshrl.u32 %v3010_v48, %v3026_v31  ;;  %v3031_v49 = vadd.s32 127, %v3030_v42  ;;  %v2910_v20 = vadd.s32 %v2909_v54, %v2905_v57  ;;  %v3076_v33 = vshrl.u32 %v5380_v22, %v3073_v27 }
 0x1d1   :  { %v2830_v18 = vxor.u32 2147483648, %v2829_v55  ;;  %v3078_v14 = vshll.u32 %v5380_v22, %v3072_v43  ;;  %v3079_v52 = vshrl.u32 %v5381_v26, %v3073_v27  ;;  %v3081_v60 = vshll.u32 %v5381_v26, %v3072_v43 }
 0x1d2   :  { %v3029_v17 = vor.u32 %v3028_v47, %v3027_v38  ;;  %v3032_v44 = vshll.u32 %v3031_v49, 23  ;;  %v2911_v21 = vadd.s32 536870912, %v2910_v20  ;;  %v3082_v0 = vshrl.u32 %v5382_v30, %v3073_v27 }
 0x1d3   :  { %v2831_v40 = vsel %vm2748_vm15, %v2830_v18, %v2829_v55  ;;  %v3077_v9 = vor.u32 %v3076_v33, %v3075_v59  ;;  %v3084_v4 = vshll.u32 %v5382_v30, %v3072_v43  ;;  %v3085_v8 = vshrl.u32 %v5383_v32, %v3073_v27 }
 0x1d4   :  { %v2834_v61 = vsel %vm5692_vm0, %v5559_v35, %v2831_v40  ;;  %v3033_v48 = vor.u32 4788187, %v3032_v44  ;;  %v3036_v51 = vcvt.s32.f32 %v3029_v17  ;;  %v5791_v5 = vshrl.u32 %v2911_v21, 30 }
 0x1d5   :  { %5176 = vcosq.f32 %v2834_v61  ;;  %v3080_v42 = vor.u32 %v3079_v52, %v3078_v14  ;;  %v3088_v39 = vshrl.u32 %v5384_v45, %v3073_v27  ;;  %vm5797_vm10 = vcmp.le.f32.partialorder %v2954_v46, 0.7853982 }
 0x1d6   :  { %5178 = vsinq.f32 %v2834_v61  ;;  %v3034_v31 = vand.u32 2147483647, %v3033_v48  ;;  %v4115_v55 = vrot.slane %v5662_v34, %v5525_v7  ;;  %v2913_v57 = vshll.u32 %v5791_v5, 30 }
 0x1d7   :  { %v3086_v38 = vor.u32 %v3085_v8, %v3084_v4  ;;  %v2840_v47 = vand.u32 3, %v2839_v1  ;;  %v3083_v54 = vor.u32 %v3082_v0, %v3081_v60  ;;  %v3087_v18 = vshll.u32 %v5383_v32, %v3072_v43 }
 0x1d8   :  { %v3037_v49 = vmul.f32 %v3036_v51, %v3034_v31  ;;  %v3043_v59 = vsel %vm5797_vm10, 0, %v5771_v25  ;;  %v5808_v33 = vsub.s32 %v2910_v20, %v2913_v57  ;;  %vm3090_vm11 = vcmp.lt.s32.totalorder %v5775_v56, 1 }
 0x1d9   :  { %v5811_v46 = vshll.u32 %v3066_v62, 8  ;;  %v3089_v44 = vor.u32 %v3088_v39, %v3087_v18  ;;  %vm3093_vm12 = vcmp.lt.s32.totalorder %v5775_v56, 4  ;;  %v3098_v1 = vsel %vm3090_vm11, %v3077_v9, %v3080_v42 }
 0x1da   :  { %v3038_v17 = vxor.u32 2147483648, %v3037_v49  ;;  %vm5819_vm13 = vcmp.eq.s32.totalorder %v4107_v53, 1  ;;  %v2916_v25 = vsub.s32 0, %v5808_v33  ;;  %v3074_v20 = vshrl.u32 %v5379_v19, %v3073_v27 }
 0x1db   :  { %vm3092_vm14 = vcmp.lt.s32.totalorder %v5775_v56, 3  ;;  %v3099_v62 = vsel %vm3093_vm12, %v3086_v38, 920167782  ;;  %vm3091_vm15 = vcmp.lt.s32.totalorder %v5775_v56, 2  ;;  %v3095_v53 = vsel %vm3093_vm12, %v3083_v54, 2102212464 }
 0x1dc   :  { %v3039_v14 = vsel %vm2956_vm6, %v3038_v17, %v3037_v49  ;;  %v3100_v52 = vsel %vm3092_vm14, %v3083_v54, %v3099_v62  ;;  %v4529_v40 = vmin.u32 %v2916_v25, %v5808_v33  ;;  %v3102_v60 = vsel %vm3090_vm11, %v3080_v42, %v3083_v54 }
 0x1dd   :  { %v3042_v27 = vsel %vm5797_vm10, %v5561_v36, %v3039_v14  ;;  %v3101_v21 = vsel %vm3091_vm15, %v3098_v1, %v3100_v52  ;;  %v3103_v0 = vsel %vm3093_vm12, %v3089_v44, 1326507024  ;;  %vm2841_vm0 = vcmp.lt.s32.totalorder %v2840_v47, 2 }
 0x1de   :  { %5180 = vcosq.f32 %v3042_v27  ;;  %v5846_v61 = vmul.u32.u64.low %v5811_v46, %v3101_v21  ;;  %v5847_v48 = vmul.u32.u64.high %v5811_v46, %v3101_v21, %v5846_v61  ;;  %v3047_v51 = vadd.s32 3, %v3043_v59 }
 0x1df   :  { %v5177_v4 = vpop.eup %5176  ;;  %5182 = vsinq.f32 %v3042_v27  ;;  %v2918_v8 = vclz %v4529_v40  ;;  %v3094_v16 = vsel %vm3090_vm11, %v3074_v20, %v3077_v9  ;;  %v3096_v57 = vsel %vm3092_vm14, %v3080_v42, %v3095_v53 }
 0x1e0   :  { %v5179_v31 = vpop.eup %5178  ;;  %v2846_v39 = vxor.u32 2147483648, %v5177_v4  ;;  %v3104_v49 = vsel %vm3092_vm14, %v3086_v38, %v3103_v0  ;;  %vm2845_vm1 = vcmp.eq.s32.totalorder %v2840_v47, 2  ;;  %vm2842_vm2 = vcmp.eq.s32.totalorder %v2840_v47, 0 }
 0x1e1   :  { %v2843_v54 = vxor.u32 2147483648, %v5179_v31  ;;  %v4530_v18 = vadd.s32 4294967294, %v2918_v8  ;;  %v3105_v17 = vsel %vm3091_vm15, %v3102_v60, %v3104_v49  ;;  %v3097_v9 = vsel %vm3091_vm15, %v3094_v16, %v3096_v57 }
 0x1e2   :  { %v2847_v59 = vsel %vm2845_vm1, %v2846_v39, %v5179_v31  ;;  %v5859_v44 = vmul.u32.u64.low %v5811_v46, %v3105_v17  ;;  %v5860_v1 = vmul.u32.u64.high %v5811_v46, %v3105_v17, %v5859_v44  ;;  %v3116_v42 = vadd.s32 1, %v5847_v48 }
 0x1e3   :  { %v2844_v25 = vsel %vm2842_vm2, %v5177_v4, %v2843_v54  ;;  %vm4531_vm3 = vcmp.lt.s32.totalorder %v4530_v18, 0  ;;  %vm2838_vm4 = vweird.f32 %v5559_v35  ;;  %v3048_v20 = vand.u32 3, %v3047_v51 }
 0x1e4   :  { %v2848_v38 = vsel %vm2841_vm0, %v2844_v25, %v2847_v59  ;;  %vm5867_vm5 = vcmp.eq.s32.totalorder %v4115_v55, 1  ;;  %v2921_v14 = vsel %vm4531_vm3, 0, %v4530_v18  ;;  %vm3046_vm6 = vweird.f32 %v5561_v36 }
 0x1e5   :  { %v2849_v53 = vsel %vm2838_vm4, nan, %v2848_v38  ;;  %v2906_v52 = vadd.s32 %v5757_v63, %v5754_v50  ;;  %v2922_v56 = vsub.s32 32, %v2921_v14  ;;  %v2926_v27 = vsub.s32 4294967266, %v2921_v14 }
 0x1e6   :  { %v4169_v35 = vsel %vm5819_vm13, %v5546_v23, %v2849_v53  ;;  %v2936_v47 = vsub.s32 4, %v5791_v5  ;;  %v3113_v55 = vmul.u32 %v5811_v46, %v3097_v9  ;;  %vm3115_vm7 = vc.u32 %v5860_v1, %v5846_v61 }
 0x1e7   :  { %4182 = vst [vmem:[#allocation11] sm:$0xff] %v4169_v35  ;;  %v2923_v40 = vshll.u32 %v5808_v33, %v2921_v14  ;;  %v2924_v21 = vshrl.u32 %v2906_v52, %v2922_v56  ;;  %v2927_v60 = vadd.s32 127, %v2926_v27  ;;  %v3117_v50 = vsel %vm3115_vm7, %v3116_v42, %v5847_v48 }
 0x1e8   :  { %v5181_v63 = vpop.eup %5180  ;;  %vm2852_vm8 = vcmp.lt.s32.totalorder %v5567_v41, 0  ;;  %v3118_v0 = vadd.s32 %v3117_v50, %v3113_v55  ;;  %v5885_v23 = vsub.s32 4, %v5518_v3  ;;  %v5888_v43 = vsub.s32 6, %v5518_v3 }
 0x1e9   :  { %v5183_v46 = vpop.eup %5182  ;;  %v3054_v4 = vxor.u32 2147483648, %v5181_v63  ;;  %vm5892_vm9 = vcmp.le.f32.partialorder %v2850_v2, 0.7853982  ;;  %v2925_v51 = vor.u32 %v2924_v21, %v2923_v40  ;;  %v2928_v48 = vshll.u32 %v2927_v60, 23 }
 0x1ea   :  { %v3051_v8 = vxor.u32 2147483648, %v5183_v46  ;;  %vm3053_vm10 = vcmp.eq.s32.totalorder %v3048_v20, 2  ;;  %v2937_v31 = vsel %vm2852_vm8, %v2936_v47, %v5791_v5  ;;  %v3119_v39 = vadd.s32 536870912, %v3118_v0 }
 0x1eb   :  { %vm3049_vm11 = vcmp.lt.s32.totalorder %v3048_v20, 2  ;;  %vm3050_vm12 = vcmp.eq.s32.totalorder %v3048_v20, 0  ;;  %v3055_v16 = vsel %vm3053_vm10, %v3054_v4, %v5183_v46  ;;  %v2929_v57 = vor.u32 4788187, %v2928_v48 }
 0x1ec   :  { %v3052_v49 = vsel %vm3050_vm12, %v5181_v63, %v3051_v8  ;;  %v3120_v54 = vshrl.u32 %v3119_v39, 30  ;;  %v2605_v2 = vrot.slane %v5527_v10, %v5885_v23  ;;  %v2613_v18 = vrot.slane %v5527_v10, %v5888_v43 }
 0x1ed   :  { %v3056_v17 = vsel %vm3049_vm11, %v3052_v49, %v3055_v16  ;;  %v2930_v59 = vand.u32 2147483647, %v2929_v57  ;;  %v2932_v44 = vcvt.s32.f32 %v2925_v51  ;;  %v2939_v25 = vsel %vm5892_vm9, 0, %v2937_v31 }
 0x1ee   :  { %v3057_v5 = vsel %vm3046_vm6, nan, %v3056_v17  ;;  %v3121_v9 = vshll.u32 %v3120_v54, 30  ;;  %v2687_v42 = vrot.slane %v5533_v13, %v5885_v23  ;;  %v5910_v38 = vsub.s32 5, %v5518_v3 }
 0x1ef   :  { %v4171_v20 = vsel %vm5867_vm5, %v5548_v24, %v3057_v5  ;;  %v2933_v14 = vmul.f32 %v2932_v44, %v2930_v59  ;;  %v3144_v53 = vsub.s32 4, %v3120_v54  ;;  %v2695_v47 = vrot.slane %v5533_v13, %v5888_v43 }
 0x1f0   :  { %v5915_v52 = vpop.f32.mrb[4].mxu0  ;;  %v5917_v56 = vpop.f32.mrb[4].mxu1  ;;  %4184 = vst [vmem:[#allocation11 + $0x10] sm:$0xff] %v4171_v20  ;;  %v5919_v36 = vsub.s32 %v3118_v0, %v3121_v9  ;;  %v2943_v40 = vadd.s32 3, %v2939_v25  ;;  %vm3060_vm13 = vcmp.lt.s32.totalorder %v5587_v12, 0  ;;  %v2609_v0 = vrot.slane %v5527_v10, %v5910_v38 }
 0x1f1   :  { %v2655_v27 = vmul.f32 %v2605_v2, %v5915_v52  ;;  %v2657_v35 = vmul.f32 %v2613_v18, %v5917_v56  ;;  %v5925_v55 = vpop.f32.mrb[5].mxu0  ;;  %v5927_v62 = vpop.f32.mrb[5].mxu1  ;;  %v2934_v24 = vxor.u32 2147483648, %v2933_v14  ;;  %vm5939_vm14 = vcmp.le.f32.partialorder %v3058_v58, 0.7853982 }
 0x1f2   :  { %v2253_v21 = vpop.f32.mrb[6].mxu0  ;;  %v2335_v60 = vpop.f32.mrb[6].mxu1  ;;  %v3124_v50 = vsub.s32 0, %v5919_v36  ;;  %v3145_v8 = vsel %vm3060_vm13, %v3144_v53, %v3120_v54  ;;  %v5952_v49 = vand.u32 3, %v2943_v40  ;;  %v2691_v2 = vrot.slane %v5533_v13, %v5910_v38 }
 0x1f3   :  { %v5931_v63 = vadd.f32 %v2687_v42, %v2655_v27  ;;  %v2254_v46 = vpop.f32.mrb[7].mxu0  ;;  %v2336_v4 = vpop.f32.mrb[7].mxu1  ;;  %v2935_v51 = vsel %vm2852_vm8, %v2934_v24, %v2933_v14  ;;  %v5950_v57 = vadd.f32 %v2695_v47, %v2657_v35  ;;  %v3147_v33 = vsel %vm5939_vm14, 0, %v3145_v8 }
 0x1f4   :  { %v2938_v31 = vsel %vm5892_vm9, %v5567_v41, %v2935_v51  ;;  %v4537_v39 = vmin.u32 %v3124_v50, %v5919_v36  ;;  %v2656_v18 = vmul.f32 %v2609_v0, %v5925_v55  ;;  %v4111_v17 = vrot.slane %v5662_v34, %v5530_v11 }
 0x1f5   :  { %v3162_v16 = vand.u32 2147483647, %v5931_v63  ;;  %5184 = vcosq.f32 %v2938_v31  ;;  %v3165_v58 = vand.u32 2139095040, %v5931_v63  ;;  %v3370_v5 = vand.u32 2147483647, %v5950_v57 }
 0x1f6   :  { %5186 = vsinq.f32 %v2938_v31  ;;  %v3126_v54 = vclz %v4537_v39  ;;  %v3373_v9 = vand.u32 2139095040, %v5950_v57  ;;  %v3151_v13 = vadd.s32 3, %v3147_v33 }
 0x1f7   :  { %v3166_v59 = vshrl.u32 %v3165_v58, 23  ;;  %v3169_v44 = vand.u32 8388607, %v3162_v16  ;;  %v5967_v20 = vsub.s32 7, %v5518_v3  ;;  %vm2946_vm15 = vcmp.eq.s32.totalorder %v5952_v49, 0 }
 0x1f8   :  { %v4538_v25 = vadd.s32 4294967294, %v3126_v54  ;;  %vm2949_vm0 = vcmp.eq.s32.totalorder %v5952_v49, 2  ;;  %v3374_v14 = vshrl.u32 %v3373_v9, 23  ;;  %v5971_v53 = vadd.f32 %v2691_v2, %v2656_v18 }
 0x1f9   :  { %v4540_v42 = vadd.s32 4294967169, %v3166_v59  ;;  %vm2945_vm2 = vcmp.lt.s32.totalorder %v5952_v49, 2  ;;  %vm5974_vm3 = vcmp.eq.s32.totalorder %v4111_v17, 1  ;;  %v3170_v47 = vor.u32 8388608, %v3169_v44 }
 0x1fa   :  { %vm4539_vm1 = vcmp.lt.s32.totalorder %v4538_v25, 0  ;;  %v5980_v3 = vand.u32 8388607, %v3370_v5  ;;  %vm2942_vm4 = vweird.f32 %v5567_v41  ;;  %v3114_v40 = vadd.s32 %v5846_v61, %v5860_v1 }
 0x1fb   :  { %v3129_v35 = vsel %vm4539_vm1, 0, %v4538_v25  ;;  %v3172_v24 = vadd.s32 1, %v4540_v42  ;;  %v4548_v50 = vadd.s32 4294967169, %v3374_v14  ;;  %v5986_v46 = vand.u32 3, %v3151_v13 }
 0x1fc   :  { %v3130_v21 = vsub.s32 32, %v3129_v35  ;;  %v3134_v60 = vsub.s32 4294967266, %v3129_v35  ;;  %v3131_v0 = vshll.u32 %v5919_v36, %v3129_v35  ;;  %v2617_v4 = vrot.slane %v5527_v10, %v5967_v20 }
 0x1fd   :  { %vm3173_vm5 = vcmp.gt.s32.totalorder %v3172_v24, 0  ;;  %v5990_v39 = vadd.s32 1, %v4548_v50  ;;  %v5992_v54 = vshll.u32 %v3170_v47, 8  ;;  %v3378_v61 = vor.u32 8388608, %v5980_v3 }
 0x1fe   :  { %v3132_v51 = vshrl.u32 %v3114_v40, %v3130_v21  ;;  %v3135_v8 = vadd.s32 127, %v3134_v60  ;;  %v3174_v31 = vsel %vm3173_vm5, %v3172_v24, 0  ;;  %v3269_v1 = vand.u32 2139095040, %v5971_v53 }
 0x1ff   :  { %v5185_v58 = vpop.eup %5184  ;;  %v3176_v2 = vand.u32 31, %v3174_v31  ;;  %v3175_v59 = vshrl.u32 %v3174_v31, 5  ;;  %vm3381_vm6 = vcmp.gt.s32.totalorder %v5990_v39, 0  ;;  %vm3157_vm11 = vcmp.eq.s32.totalorder %v5986_v46, 2 }
 0x200   :  { %v5187_v36 = vpop.eup %5186  ;;  %v2950_v33 = vxor.u32 2147483648, %v5185_v58  ;;  %v3133_v18 = vor.u32 %v3132_v51, %v3131_v0  ;;  %v3136_v17 = vshll.u32 %v3135_v8, 23  ;;  %v3382_v48 = vsel %vm3381_vm6, %v5990_v39, 0  ;;  %v6055_v39 = vld [vmem:[#allocation8] sm:$0xff] }
 0x201   :  { %v2947_v44 = vxor.u32 2147483648, %v5187_v36  ;;  %v3177_v25 = vsub.s32 32, %v3176_v2  ;;  %v3179_v9 = vshll.u32 %v5379_v19, %v3176_v2  ;;  %v3182_v13 = vshll.u32 %v5380_v22, %v3176_v2 }
 0x202   :  { %v2951_v42 = vsel %vm2949_vm0, %v2950_v33, %v5187_v36  ;;  %v3137_v14 = vor.u32 4788187, %v3136_v17  ;;  %v3140_v35 = vcvt.s32.f32 %v3133_v18  ;;  %v3185_v47 = vshll.u32 %v5381_v26, %v3176_v2 }
 0x203   :  { %v2948_v24 = vsel %vm2946_vm15, %v5185_v58, %v2947_v44  ;;  %v3178_v40 = vshrl.u32 %v5379_v19, %v3177_v25  ;;  %v3180_v21 = vshrl.u32 %v5380_v22, %v3177_v25  ;;  %v3183_v60 = vshrl.u32 %v5381_v26, %v3177_v25 }
 0x204   :  { %v2952_v50 = vsel %vm2945_vm2, %v2948_v24, %v2951_v42  ;;  %v3138_v0 = vand.u32 2147483647, %v3137_v14  ;;  %v3186_v51 = vshrl.u32 %v5382_v30, %v3177_v25  ;;  %v3188_v8 = vshll.u32 %v5382_v30, %v3176_v2 }
 0x205   :  { %v2953_v31 = vsel %vm2942_vm4, nan, %v2952_v50  ;;  %v3181_v36 = vor.u32 %v3180_v21, %v3179_v9  ;;  %v3184_v33 = vor.u32 %v3183_v60, %v3182_v13  ;;  %v3189_v58 = vshrl.u32 %v5383_v32, %v3177_v25 }
 0x206   :  { %v4170_v18 = vsel %vm5974_vm3, %v5554_v28, %v2953_v31  ;;  %v3141_v17 = vmul.f32 %v3140_v35, %v3138_v0  ;;  %v3187_v44 = vor.u32 %v3186_v51, %v3185_v47  ;;  %v3191_v49 = vshll.u32 %v5383_v32, %v3176_v2 }
 0x207   :  { %4183 = vst [vmem:[#allocation11 + $0x8] sm:$0xff] %v4170_v18  ;;  %v3190_v42 = vor.u32 %v3189_v58, %v3188_v8  ;;  %v3192_v14 = vshrl.u32 %v5384_v45, %v3177_v25  ;;  %vm3194_vm7 = vcmp.lt.s32.totalorder %v3175_v59, 1  ;;  %vm3195_vm8 = vcmp.lt.s32.totalorder %v3175_v59, 2 }
 0x208   :  { %v3142_v41 = vxor.u32 2147483648, %v3141_v17  ;;  %vm3196_vm9 = vcmp.lt.s32.totalorder %v3175_v59, 3  ;;  %vm3197_vm10 = vcmp.lt.s32.totalorder %v3175_v59, 4  ;;  %v3198_v9 = vsel %vm3194_vm7, %v3178_v40, %v3181_v36 }
 0x209   :  { %v3193_v13 = vor.u32 %v3192_v14, %v3191_v49  ;;  %v3199_v24 = vsel %vm3197_vm10, %v3187_v44, 2102212464  ;;  %v3202_v21 = vsel %vm3194_vm7, %v3181_v36, %v3184_v33  ;;  %v3203_v60 = vsel %vm3197_vm10, %v3190_v42, 920167782 }
 0x20a   :  { %v3143_v28 = vsel %vm3060_vm13, %v3142_v41, %v3141_v17  ;;  %v3200_v27 = vsel %vm3196_vm9, %v3184_v33, %v3199_v24  ;;  %v3204_v2 = vsel %vm3196_vm9, %v3187_v44, %v3203_v60  ;;  %v3206_v35 = vsel %vm3194_vm7, %v3184_v33, %v3187_v44 }
 0x20b   :  { %v3146_v25 = vsel %vm5939_vm14, %v5587_v12, %v3143_v28  ;;  %v3205_v47 = vsel %vm3195_vm8, %v3202_v21, %v3204_v2  ;;  %v3207_v50 = vsel %vm3197_vm10, %v3193_v13, 1326507024  ;;  %v3270_v40 = vshrl.u32 %v3269_v1, 23 }
 0x20c   :  { %5188 = vcosq.f32 %v3146_v25  ;;  %v3208_v0 = vsel %vm3196_vm9, %v3190_v42, %v3207_v50  ;;  %v6029_v51 = vmul.u32.u64.low %v5992_v54, %v3205_v47  ;;  %v6030_v8 = vmul.u32.u64.high %v5992_v54, %v3205_v47, %v6029_v51 }
 0x20d   :  { %5190 = vsinq.f32 %v3146_v25  ;;  %v3201_v31 = vsel %vm3195_vm8, %v3198_v9, %v3200_v27  ;;  %v3209_v36 = vsel %vm3195_vm8, %v3206_v35, %v3208_v0  ;;  %v4119_v1 = vrot.slane %v5662_v34, %v5564_v37 }
 0x20e   :  { %v6041_v33 = vmul.u32.u64.low %v5992_v54, %v3209_v36  ;;  %v6042_v58 = vmul.u32.u64.high %v5992_v54, %v3209_v36, %v6041_v33  ;;  %v3384_v18 = vand.u32 31, %v3382_v48  ;;  %v6046_v17 = vshll.u32 %v3378_v61, 8 }
 0x20f   :  { %v3266_v44 = vand.u32 2147483647, %v5971_v53  ;;  %v6053_v59 = vmul.f32 %v2617_v4, %v5927_v62  ;;  %v2699_v49 = vrot.slane %v6055_v39, %v5967_v20  ;;  %v3217_v42 = vmul.u32 %v5992_v54, %v3201_v31 }
 0x210   :  { %v3220_v3 = vadd.s32 1, %v6030_v8  ;;  %v6062_v61 = vshrl.u32 %v3382_v48, 5  ;;  %v3385_v14 = vsub.s32 32, %v3384_v18  ;;  %vm3154_vm12 = vcmp.eq.s32.totalorder %v5986_v46, 0 }
 0x211   :  { %v3387_v10 = vshll.u32 %v5379_v19, %v3384_v18  ;;  %v3390_v4 = vshll.u32 %v5380_v22, %v3384_v18  ;;  %v3393_v41 = vshll.u32 %v5381_v26, %v3384_v18  ;;  %v4544_v9 = vadd.s32 4294967169, %v3270_v40 }
 0x212   :  { %vm3153_vm13 = vcmp.lt.s32.totalorder %v5986_v46, 2  ;;  %vm6069_vm14 = vcmp.eq.s32.totalorder %v4119_v1, 1  ;;  %vm3219_vm15 = vc.u32 %v6042_v58, %v6029_v51  ;;  %v3388_v54 = vshrl.u32 %v5380_v22, %v3385_v14 }
 0x213   :  { %v3396_v24 = vshll.u32 %v5382_v30, %v3384_v18  ;;  %v3399_v21 = vshll.u32 %v5383_v32, %v3384_v18  ;;  %vm3150_vm0 = vweird.f32 %v5587_v12  ;;  %v3221_v60 = vsel %vm3219_vm15, %v3220_v3, %v6030_v8 }
 0x214   :  { %v3391_v28 = vshrl.u32 %v5381_v26, %v3385_v14  ;;  %v3394_v27 = vshrl.u32 %v5382_v30, %v3385_v14  ;;  %v3397_v2 = vshrl.u32 %v5383_v32, %v3385_v14  ;;  %v3222_v35 = vadd.s32 %v3221_v60, %v3217_v42 }
 0x215   :  { %v3389_v25 = vor.u32 %v3388_v54, %v3387_v10  ;;  %v3400_v47 = vshrl.u32 %v5384_v45, %v3385_v14  ;;  %vm3402_vm1 = vcmp.lt.s32.totalorder %v6062_v61, 1  ;;  %v3386_v50 = vshrl.u32 %v5379_v19, %v3385_v14 }
 0x216   :  { %v3392_v40 = vor.u32 %v3391_v28, %v3390_v4  ;;  %v3395_v0 = vor.u32 %v3394_v27, %v3393_v41  ;;  %v3398_v31 = vor.u32 %v3397_v2, %v3396_v24  ;;  %v5189_v36 = vpop.eup %5188  ;;  %v3223_v48 = vadd.s32 536870912, %v3222_v35 }
 0x217   :  { %v3401_v8 = vor.u32 %v3400_v47, %v3399_v21  ;;  %vm3404_vm2 = vcmp.lt.s32.totalorder %v6062_v61, 3  ;;  %vm3405_vm3 = vcmp.lt.s32.totalorder %v6062_v61, 4  ;;  %v5191_v1 = vpop.eup %5190  ;;  %v3158_v33 = vxor.u32 2147483648, %v5189_v36 }
 0x218   :  { %v3407_v18 = vsel %vm3405_vm3, %v3395_v0, 2102212464  ;;  %v3410_v42 = vsel %vm3402_vm1, %v3389_v25, %v3392_v40  ;;  %v3411_v3 = vsel %vm3405_vm3, %v3398_v31, 920167782  ;;  %v3155_v14 = vxor.u32 2147483648, %v5191_v1 }
 0x219   :  { %v3224_v10 = vshrl.u32 %v3223_v48, 30  ;;  %vm3403_vm4 = vcmp.lt.s32.totalorder %v6062_v61, 2  ;;  %v3412_v4 = vsel %vm3404_vm2, %v3395_v0, %v3411_v3  ;;  %v3159_v41 = vsel %vm3157_vm11, %v3158_v33, %v5191_v1 }
 0x21a   :  { %v3406_v54 = vsel %vm3402_vm1, %v3386_v50, %v3389_v25  ;;  %v3413_v24 = vsel %vm3403_vm4, %v3410_v42, %v3412_v4  ;;  %v3414_v21 = vsel %vm3402_vm1, %v3392_v40, %v3395_v0  ;;  %v3156_v60 = vsel %vm3154_vm12, %v5189_v36, %v3155_v14 }
 0x21b   :  { %v3225_v28 = vshll.u32 %v3224_v10, 30  ;;  %v3408_v27 = vsel %vm3404_vm2, %v3392_v40, %v3407_v18  ;;  %v3415_v2 = vsel %vm3405_vm3, %v3401_v8, 1326507024  ;;  %v3160_v47 = vsel %vm3153_vm13, %v3156_v60, %v3159_v41 }
 0x21c   :  { %v3416_v25 = vsel %vm3404_vm2, %v3398_v31, %v3415_v2  ;;  %v6116_v50 = vmul.u32.u64.low %v6046_v17, %v3413_v24  ;;  %v6117_v48 = vmul.u32.u64.high %v6046_v17, %v3413_v24, %v6116_v50  ;;  %v3161_v0 = vsel %vm3150_vm0, nan, %v3160_v47 }
 0x21d   :  { %v3226_v36 = vsub.s32 %v3222_v35, %v3225_v28  ;;  %v3248_v1 = vsub.s32 4, %v3224_v10  ;;  %v3417_v40 = vsel %vm3403_vm4, %v3414_v21, %v3416_v25  ;;  %v4172_v46 = vsel %vm6069_vm14, %v5556_v29, %v3161_v0 }
 0x21e   :  { %v6127_v8 = vmul.u32.u64.low %v6046_v17, %v3417_v40  ;;  %v6128_v33 = vmul.u32.u64.high %v6046_v17, %v3417_v40, %v6127_v8  ;;  %4185 = vst [vmem:[#allocation11 + $0x18] sm:$0xff] %v4172_v46  ;;  %vm3164_vm5 = vcmp.lt.s32.totalorder %v5931_v63, 0  ;;  %v3409_v12 = vsel %vm3403_vm4, %v3406_v54, %v3408_v27 }
 0x21f   :  { %v3228_v31 = vsub.s32 0, %v3226_v36  ;;  %v3428_v35 = vadd.s32 1, %v6117_v48  ;;  %v3273_v18 = vand.u32 8388607, %v3266_v44  ;;  %v3276_v42 = vadd.s32 1, %v4544_v9 }
 0x220   :  { %v3249_v29 = vsel %vm3164_vm5, %v3248_v1, %v3224_v10  ;;  %v6142_v13 = vadd.f32 %v2699_v49, %v6053_v59  ;;  %vm3427_vm6 = vc.u32 %v6128_v33, %v6116_v50  ;;  %vm6147_vm8 = vcmp.le.f32.partialorder %v3162_v16, 0.7853982 }
 0x221   :  { %v4541_v3 = vmin.u32 %v3228_v31, %v3226_v36  ;;  %vm3277_vm7 = vcmp.gt.s32.totalorder %v3276_v42, 0  ;;  %v3425_v14 = vmul.u32 %v6046_v17, %v3409_v12  ;;  %v3251_v10 = vsel %vm6147_vm8, 0, %v3249_v29 }
 0x222   :  { %v3429_v4 = vsel %vm3427_vm6, %v3428_v35, %v6117_v48  ;;  %v3274_v39 = vor.u32 8388608, %v3273_v18  ;;  %v3278_v59 = vsel %vm3277_vm7, %v3276_v42, 0  ;;  %v3477_v24 = vand.u32 2139095040, %v6142_v13 }
 0x223   :  { %v3230_v9 = vclz %v4541_v3  ;;  %v3430_v41 = vadd.s32 %v3429_v4, %v3425_v14  ;;  %v3280_v54 = vand.u32 31, %v3278_v59  ;;  %v3218_v16 = vadd.s32 %v6029_v51, %v6042_v58 }
 0x224   :  { %v4123_v21 = vrot.slane %v5662_v34, %v5885_v23  ;;  %v6160_v17 = vadd.s32 3, %v3251_v10  ;;  %v6163_v2 = vadd.s32 %v6116_v50, %v6128_v33  ;;  %v6165_v47 = vshll.u32 %v3274_v39, 8 }
 0x225   :  { %v4542_v49 = vadd.s32 4294967294, %v3230_v9  ;;  %v3431_v60 = vadd.s32 536870912, %v3430_v41  ;;  %v3281_v28 = vsub.s32 32, %v3280_v54  ;;  %v3474_v25 = vand.u32 2147483647, %v6142_v13 }
 0x226   :  { %v3478_v51 = vshrl.u32 %v3477_v24, 23  ;;  %v6168_v40 = vshrl.u32 %v3278_v59, 5  ;;  %vm3372_vm10 = vcmp.lt.s32.totalorder %v5950_v57, 0  ;;  %v3283_v35 = vshll.u32 %v5379_v19, %v3280_v54  ;;  %v6292_v24 = vld [vmem:[#allocation7 + $0x8] sm:$0x1f] }
 0x227   :  { %vm4543_vm9 = vcmp.lt.s32.totalorder %v4542_v49, 0  ;;  %v3432_v1 = vshrl.u32 %v3431_v60, 30  ;;  %v3284_v46 = vshrl.u32 %v5380_v22, %v3281_v28  ;;  %v3287_v8 = vshrl.u32 %v5381_v26, %v3281_v28 }
 0x228   :  { %v3233_v27 = vsel %vm4543_vm9, 0, %v4542_v49  ;;  %v3290_v33 = vshrl.u32 %v5382_v30, %v3281_v28  ;;  %v3286_v18 = vshll.u32 %v5380_v22, %v3280_v54  ;;  %v3292_v42 = vshll.u32 %v5382_v30, %v3280_v54 }
 0x229   :  { %v3234_v48 = vsub.s32 32, %v3233_v27  ;;  %v3238_v0 = vsub.s32 4294967266, %v3233_v27  ;;  %v3235_v58 = vshll.u32 %v3226_v36, %v3233_v27  ;;  %v3433_v50 = vshll.u32 %v3432_v1, 30 }
 0x22a   :  { %v3293_v36 = vshrl.u32 %v5383_v32, %v3281_v28  ;;  %v3289_v14 = vshll.u32 %v5381_v26, %v3280_v54  ;;  %v3285_v10 = vor.u32 %v3284_v46, %v3283_v35  ;;  %v3288_v4 = vor.u32 %v3287_v8, %v3286_v18 }
 0x22b   :  { %v3236_v31 = vshrl.u32 %v3218_v16, %v3234_v48  ;;  %v3239_v12 = vadd.s32 127, %v3238_v0  ;;  %v6178_v9 = vsub.s32 %v3430_v41, %v3433_v50  ;;  %v3296_v59 = vshrl.u32 %v5384_v45, %v3281_v28 }
 0x22c   :  { %v3294_v39 = vor.u32 %v3293_v36, %v3292_v42  ;;  %vm6184_vm11 = vcmp.le.f32.partialorder %v3370_v5, 0.7853982  ;;  %v3291_v60 = vor.u32 %v3290_v33, %v3289_v14  ;;  %v6191_v41 = vand.u32 8388607, %v3474_v25 }
 0x22d   :  { %v3237_v3 = vor.u32 %v3236_v31, %v3235_v58  ;;  %v3240_v29 = vshll.u32 %v3239_v12, 23  ;;  %v3436_v16 = vsub.s32 0, %v6178_v9  ;;  %v3456_v48 = vsub.s32 4, %v3432_v1 }
 0x22e   :  { %v3295_v0 = vshll.u32 %v5383_v32, %v3280_v54  ;;  %v4552_v58 = vadd.s32 4294967169, %v3478_v51  ;;  %vm3298_vm12 = vcmp.lt.s32.totalorder %v6168_v40, 1  ;;  %vm3301_vm13 = vcmp.lt.s32.totalorder %v6168_v40, 4 }
 0x22f   :  { %v3241_v49 = vor.u32 4788187, %v3240_v29  ;;  %v3244_v27 = vcvt.s32.f32 %v3237_v3  ;;  %v4549_v8 = vmin.u32 %v3436_v16, %v6178_v9  ;;  %v3282_v5 = vshrl.u32 %v5379_v19, %v3281_v28 }
 0x230   :  { %v3297_v31 = vor.u32 %v3296_v59, %v3295_v0  ;;  %v3306_v12 = vsel %vm3298_vm12, %v3285_v10, %v3288_v4  ;;  %v3307_v50 = vsel %vm3301_vm13, %v3294_v39, 920167782  ;;  %vm3300_vm14 = vcmp.lt.s32.totalorder %v6168_v40, 3 }
 0x231   :  { %v3242_v46 = vand.u32 2147483647, %v3241_v49  ;;  %v3438_v35 = vclz %v4549_v8  ;;  %v3303_v54 = vsel %vm3301_vm13, %v3291_v60, 2102212464  ;;  %v3457_v51 = vsel %vm3372_vm10, %v3456_v48, %v3432_v1 }
 0x232   :  { %vm3299_vm15 = vcmp.lt.s32.totalorder %v6168_v40, 2  ;;  %v3302_v28 = vsel %vm3298_vm12, %v3282_v5, %v3285_v10  ;;  %v3308_v18 = vsel %vm3300_vm14, %v3291_v60, %v3307_v50  ;;  %v3310_v29 = vsel %vm3298_vm12, %v3288_v4, %v3291_v60 }
 0x233   :  { %v3245_v33 = vmul.f32 %v3244_v27, %v3242_v46  ;;  %v4550_v36 = vadd.s32 4294967294, %v3438_v35  ;;  %v3309_v3 = vsel %vm3299_vm15, %v3306_v12, %v3308_v18  ;;  %v3304_v14 = vsel %vm3300_vm14, %v3288_v4, %v3303_v54 }
 0x234   :  { %v3311_v59 = vsel %vm3301_vm13, %v3297_v31, 1326507024  ;;  %v6217_v1 = vmul.u32.u64.low %v6165_v47, %v3309_v3  ;;  %v6218_v49 = vmul.u32.u64.high %v6165_v47, %v3309_v3, %v6217_v1  ;;  %v3484_v27 = vadd.s32 1, %v4552_v58 }
 0x235   :  { %v3246_v42 = vxor.u32 2147483648, %v3245_v33  ;;  %vm4551_vm0 = vcmp.lt.s32.totalorder %v4550_v36, 0  ;;  %v3312_v16 = vsel %vm3300_vm14, %v3294_v39, %v3311_v59  ;;  %v3459_v4 = vsel %vm6184_vm11, 0, %v3457_v51 }
 0x236   :  { %v3441_v60 = vsel %vm4551_vm0, 0, %v4550_v36  ;;  %v3313_v0 = vsel %vm3299_vm15, %v3310_v29, %v3312_v16  ;;  %v3305_v5 = vsel %vm3299_vm15, %v3302_v28, %v3304_v14  ;;  %v3324_v50 = vadd.s32 1, %v6218_v49 }
 0x237   :  { %v3247_v10 = vsel %vm3164_vm5, %v3246_v42, %v3245_v33  ;;  %v3442_v46 = vsub.s32 32, %v3441_v60  ;;  %v3446_v8 = vsub.s32 4294967266, %v3441_v60  ;;  %v3443_v39 = vshll.u32 %v6178_v9, %v3441_v60 }
 0x238   :  { %v3250_v48 = vsel %vm6147_vm8, %v5931_v63, %v3247_v10  ;;  %v6234_v58 = vmul.u32.u64.low %v6165_v47, %v3313_v0  ;;  %v6235_v61 = vmul.u32.u64.high %v6165_v47, %v3313_v0, %v6234_v58  ;;  %vm3485_vm1 = vcmp.gt.s32.totalorder %v3484_v27, 0 }
 0x239   :  { %5192 = vcosq.f32 %v3250_v48  ;;  %v3444_v31 = vshrl.u32 %v6163_v2, %v3442_v46  ;;  %v3447_v12 = vadd.s32 127, %v3446_v8  ;;  %v3256_v33 = vand.u32 3, %v6160_v17  ;;  %v6299_v17 = vld [vmem:[#allocation8 + $0x8] sm:$0x1f] }
 0x23a   :  { %5194 = vsinq.f32 %v3250_v48  ;;  %v3482_v35 = vor.u32 8388608, %v6191_v41  ;;  %v3486_v54 = vsel %vm3485_vm1, %v3484_v27, 0  ;;  %v3463_v28 = vadd.s32 3, %v3459_v4 }
 0x23b   :  { %v3445_v40 = vor.u32 %v3444_v31, %v3443_v39  ;;  %v3448_v51 = vshll.u32 %v3447_v12, 23  ;;  %v3488_v18 = vand.u32 31, %v3486_v54  ;;  %v4131_v9 = vrot.slane %v5662_v34, %v5888_v43 }
 0x23c   :  { %v3321_v42 = vmul.u32 %v6165_v47, %v3305_v5  ;;  %vm3323_vm2 = vc.u32 %v6235_v61, %v6217_v1  ;;  %vm6249_vm3 = vcmp.eq.s32.totalorder %v4123_v21, 1  ;;  %vm3254_vm4 = vweird.f32 %v5931_v63 }
 0x23d   :  { %v3449_v2 = vor.u32 4788187, %v3448_v51  ;;  %v3325_v41 = vsel %vm3323_vm2, %v3324_v50, %v6218_v49  ;;  %v3489_v36 = vsub.s32 32, %v3488_v18  ;;  %vm3257_vm5 = vcmp.lt.s32.totalorder %v3256_v33, 2 }
 0x23e   :  { %vm3258_vm6 = vcmp.eq.s32.totalorder %v3256_v33, 0  ;;  %vm3261_vm7 = vcmp.eq.s32.totalorder %v3256_v33, 2  ;;  %v3326_v47 = vadd.s32 %v3325_v41, %v3321_v42  ;;  %v3452_v29 = vcvt.s32.f32 %v3445_v40 }
 0x23f   :  { %v3450_v3 = vand.u32 2147483647, %v3449_v2  ;;  %v6255_v14 = vand.u32 3, %v3463_v28  ;;  %v6257_v59 = vshll.u32 %v3482_v35, 8  ;;  %v6259_v10 = vshrl.u32 %v3486_v54, 5 }
 0x240   :  { %v3327_v21 = vadd.s32 536870912, %v3326_v47  ;;  %v3492_v16 = vshrl.u32 %v5380_v22, %v3489_v36  ;;  %v3495_v49 = vshrl.u32 %v5381_v26, %v3489_v36  ;;  %v3491_v60 = vshll.u32 %v5379_v19, %v3488_v18 }
 0x241   :  { %v3453_v48 = vmul.f32 %v3452_v29, %v3450_v3  ;;  %v3494_v4 = vshll.u32 %v5380_v22, %v3488_v18  ;;  %v3501_v0 = vshrl.u32 %v5383_v32, %v3489_v36  ;;  %v3497_v39 = vshll.u32 %v5381_v26, %v3488_v18 }
 0x242   :  { %v6266_v5 = vshrl.u32 %v3327_v21, 30  ;;  %v3498_v58 = vshrl.u32 %v5382_v30, %v3489_v36  ;;  %v3500_v50 = vshll.u32 %v5382_v30, %v3488_v18  ;;  %v3504_v35 = vshrl.u32 %v5384_v45, %v3489_v36 }
 0x243   :  { %v5193_v27 = vpop.eup %5192  ;;  %v3454_v12 = vxor.u32 2147483648, %v3453_v48  ;;  %v3493_v51 = vor.u32 %v3492_v16, %v3491_v60  ;;  %v3496_v28 = vor.u32 %v3495_v49, %v3494_v4  ;;  %v3503_v3 = vshll.u32 %v5383_v32, %v3488_v18 }
 0x244   :  { %v5195_v46 = vpop.eup %5194  ;;  %v3262_v8 = vxor.u32 2147483648, %v5193_v27  ;;  %v3329_v40 = vshll.u32 %v6266_v5, 30  ;;  %v3502_v41 = vor.u32 %v3501_v0, %v3500_v50  ;;  %vm3506_vm8 = vcmp.lt.s32.totalorder %v6259_v10, 1 }
 0x245   :  { %v3259_v31 = vxor.u32 2147483648, %v5195_v46  ;;  %v3455_v2 = vsel %vm3372_vm10, %v3454_v12, %v3453_v48  ;;  %v3505_v49 = vor.u32 %v3504_v35, %v3503_v3  ;;  %vm3509_vm9 = vcmp.lt.s32.totalorder %v6259_v10, 4 }
 0x246   :  { %v3263_v54 = vsel %vm3261_vm7, %v3262_v8, %v5195_v46  ;;  %v3458_v21 = vsel %vm6184_vm11, %v5950_v57, %v3455_v2  ;;  %v6282_v15 = vsub.s32 %v3326_v47, %v3329_v40  ;;  %v3499_v46 = vor.u32 %v3498_v58, %v3497_v39 }
 0x247   :  { %v3260_v42 = vsel %vm3258_vm6, %v5193_v27, %v3259_v31  ;;  %5196 = vcosq.f32 %v3458_v21  ;;  %vm3268_vm10 = vcmp.lt.s32.totalorder %v5971_v53, 0  ;;  %v3490_v63 = vshrl.u32 %v5379_v19, %v3489_v36 }
 0x248   :  { %v3264_v29 = vsel %vm3257_vm5, %v3260_v42, %v3263_v54  ;;  %5198 = vsinq.f32 %v3458_v21  ;;  %v3332_v33 = vsub.s32 0, %v6282_v15  ;;  %vm3508_vm11 = vcmp.lt.s32.totalorder %v6259_v10, 3 }
 0x249   :  { %v3265_v16 = vsel %vm3254_vm4, nan, %v3264_v29  ;;  %v3514_v47 = vsel %vm3506_vm8, %v3493_v51, %v3496_v28  ;;  %v3515_v27 = vsel %vm3509_vm9, %v3502_v41, 920167782  ;;  %vm3507_vm12 = vcmp.lt.s32.totalorder %v6259_v10, 2 }
 0x24a   :  { %v4173_v18 = vsel %vm6249_vm3, %v5915_v52, %v3265_v16  ;;  %v4545_v52 = vmin.u32 %v3332_v33, %v6282_v15  ;;  %v3511_v48 = vsel %vm3509_vm9, %v3499_v46, 2102212464  ;;  %v3516_v60 = vsel %vm3508_vm11, %v3499_v46, %v3515_v27 }
 0x24b   :  { %4186 = vst [vmem:[#allocation11 + $0x20] sm:$0xff] %v4173_v18  ;;  %v3517_v4 = vsel %vm3507_vm12, %v3514_v47, %v3516_v60  ;;  %v3518_v36 = vsel %vm3506_vm8, %v3496_v28, %v3499_v46  ;;  %v3519_v0 = vsel %vm3509_vm9, %v3505_v49, 1326507024  ;;  %v2621_v8 = vrot.slane %v6292_v24, %v5522_v6 }
 0x24c   :  { %v3334_v39 = vclz %v4545_v52  ;;  %v3510_v58 = vsel %vm3506_vm8, %v3490_v63, %v3493_v51  ;;  %v2703_v31 = vrot.slane %v6299_v17, %v5522_v6  ;;  %v2629_v12 = vrot.slane %v6292_v24, %v5525_v7 }
 0x24d   :  { %vm3465_vm13 = vcmp.lt.s32.totalorder %v6255_v14, 2  ;;  %vm6321_vm14 = vcmp.eq.s32.totalorder %v4131_v9, 1  ;;  %v3512_v35 = vsel %vm3508_vm11, %v3496_v28, %v3511_v48  ;;  %v3520_v54 = vsel %vm3508_vm11, %v3502_v41, %v3519_v0 }
 0x24e   :  { %v6330_v40 = vmul.u32.u64.low %v6257_v59, %v3517_v4  ;;  %v6331_v51 = vmul.u32.u64.high %v6257_v59, %v3517_v4, %v6330_v40  ;;  %vm3462_vm15 = vweird.f32 %v5950_v57  ;;  %vm3466_vm0 = vcmp.eq.s32.totalorder %v6255_v14, 0 }
 0x24f   :  { %v4546_v43 = vadd.s32 4294967294, %v3334_v39  ;;  %v3352_v9 = vsub.s32 4, %v6266_v5  ;;  %v3521_v42 = vsel %vm3507_vm12, %v3518_v36, %v3520_v54  ;;  %vm3469_vm1 = vcmp.eq.s32.totalorder %v6255_v14, 2 }
 0x250   :  { %v6339_v2 = vpop.f32.mrb[8].mxu0  ;;  %v6341_v28 = vpop.f32.mrb[8].mxu1  ;;  %v6345_v41 = vmul.u32.u64.low %v6257_v59, %v3521_v42  ;;  %v6346_v3 = vmul.u32.u64.high %v6257_v59, %v3521_v42, %v6345_v41  ;;  %v3322_v16 = vadd.s32 %v6217_v1, %v6235_v61  ;;  %v3513_v49 = vsel %vm3507_vm12, %v3510_v58, %v3512_v35 }
 0x251   :  { %v2659_v29 = vmul.f32 %v2621_v8, %v6339_v2  ;;  %v6349_v21 = vpop.f32.mrb[9].mxu0  ;;  %v6351_v46 = vpop.f32.mrb[9].mxu1  ;;  %vm4547_vm2 = vcmp.lt.s32.totalorder %v4546_v43, 0  ;;  %v2711_v18 = vrot.slane %v6299_v17, %v5525_v7  ;;  %v3532_v52 = vadd.s32 1, %v6331_v51 }
 0x252   :  { %v2417_v33 = vpop.f32.mrb[10].mxu0  ;;  %v2499_v63 = vpop.f32.mrb[10].mxu1  ;;  %v3337_v27 = vsel %vm4547_vm2, 0, %v4546_v43  ;;  %v2661_v60 = vmul.f32 %v2629_v12, %v6341_v28  ;;  %v3353_v8 = vsel %vm3268_vm10, %v3352_v9, %v6266_v5  ;;  %v3529_v35 = vmul.u32 %v6257_v59, %v3513_v49 }
 0x253   :  { %v5197_v47 = vpop.eup %5196  ;;  %v6360_v48 = vadd.f32 %v2703_v31, %v2659_v29  ;;  %v2418_v4 = vpop.f32.mrb[11].mxu0  ;;  %v3338_v0 = vsub.s32 32, %v3337_v27  ;;  %v3342_v10 = vsub.s32 4294967266, %v3337_v27  ;;  %v3339_v58 = vshll.u32 %v6282_v15, %v3337_v27 }
 0x254   :  { %v2500_v36 = vpop.f32.mrb[11].mxu1  ;;  %v5199_v1 = vpop.eup %5198  ;;  %v3470_v61 = vxor.u32 2147483648, %v5197_v47  ;;  %vm3531_vm3 = vc.u32 %v6346_v3, %v6330_v40  ;;  %v6376_v9 = vadd.f32 %v2711_v18, %v2661_v60  ;;  %vm6388_vm4 = vcmp.le.f32.partialorder %v3266_v44, 0.7853982 }
 0x255   :  { %v3467_v39 = vxor.u32 2147483648, %v5199_v1  ;;  %v3340_v12 = vshrl.u32 %v3322_v16, %v3338_v0  ;;  %v3343_v54 = vadd.s32 127, %v3342_v10  ;;  %v3533_v43 = vsel %vm3531_vm3, %v3532_v52, %v6331_v51 }
 0x256   :  { %v3471_v31 = vsel %vm3469_vm1, %v3470_v61, %v5199_v1  ;;  %v3534_v41 = vadd.s32 %v3533_v43, %v3529_v35  ;;  %v3578_v5 = vand.u32 2147483647, %v6360_v48  ;;  %v3581_v49 = vand.u32 2139095040, %v6360_v48 }
 0x257   :  { %v3468_v42 = vsel %vm3466_vm0, %v5197_v47, %v3467_v39  ;;  %v3341_v59 = vor.u32 %v3340_v12, %v3339_v58  ;;  %v3344_v29 = vshll.u32 %v3343_v54, 23  ;;  %v3355_v47 = vsel %vm6388_vm4, 0, %v3353_v8 }
 0x258   :  { %v3472_v15 = vsel %vm3465_vm13, %v3468_v42, %v3471_v31  ;;  %v3535_v33 = vadd.s32 536870912, %v3534_v41  ;;  %v3582_v63 = vshrl.u32 %v3581_v49, 23  ;;  %v3585_v57 = vand.u32 8388607, %v3578_v5 }
 0x259   :  { %v3473_v16 = vsel %vm3462_vm15, nan, %v3472_v15  ;;  %v3345_v14 = vor.u32 4788187, %v3344_v29  ;;  %v3348_v60 = vcvt.s32.f32 %v3341_v59  ;;  %v3359_v36 = vadd.s32 3, %v3355_v47 }
 0x25a   :  { %v4175_v51 = vsel %vm6321_vm14, %v5917_v56, %v3473_v16  ;;  %v3536_v27 = vshrl.u32 %v3535_v33, 30  ;;  %v4556_v50 = vadd.s32 4294967169, %v3582_v63  ;;  %v3789_v56 = vand.u32 2139095040, %v6376_v9 }
 0x25b   :  { %4188 = vst [vmem:[#allocation11 + $0x30] sm:$0xff] %v4175_v51  ;;  %v3346_v52 = vand.u32 2147483647, %v3345_v14  ;;  %v3586_v58 = vor.u32 8388608, %v3585_v57  ;;  %v4127_v8 = vrot.slane %v5662_v34, %v5910_v38  ;;  %v6404_v43 = vand.u32 3, %v3359_v36 }
 0x25c   :  { %v3537_v4 = vshll.u32 %v3536_v27, 30  ;;  %v3588_v1 = vadd.s32 1, %v4556_v50  ;;  %v3790_v61 = vshrl.u32 %v3789_v56, 23  ;;  %v3560_v39 = vsub.s32 4, %v3536_v27 }
 0x25d   :  { %v3349_v44 = vmul.f32 %v3348_v60, %v3346_v52  ;;  %vm3476_vm6 = vcmp.lt.s32.totalorder %v6142_v13, 0  ;;  %v3530_v15 = vadd.s32 %v6330_v40, %v6346_v3  ;;  %v3786_v59 = vand.u32 2147483647, %v6376_v9 }
 0x25e   :  { %v6397_v0 = vsub.s32 %v3534_v41, %v3537_v4  ;;  %vm3589_vm5 = vcmp.gt.s32.totalorder %v3588_v1, 0  ;;  %v4564_v12 = vadd.s32 4294967169, %v3790_v61  ;;  %v6416_v29 = vsel %vm3476_vm6, %v3560_v39, %v3536_v27  ;;  %v4099_v61 = vld [vmem:[#allocation10 + $0x8] sm:$0x1f] }
 0x25f   :  { %v3350_v10 = vxor.u32 2147483648, %v3349_v44  ;;  %v3590_v31 = vsel %vm3589_vm5, %v3588_v1, 0  ;;  %v6418_v16 = vshll.u32 %v3586_v58, 8  ;;  %vm3365_vm7 = vcmp.eq.s32.totalorder %v6404_v43, 2 }
 0x260   :  { %v3540_v35 = vsub.s32 0, %v6397_v0  ;;  %v3592_v42 = vand.u32 31, %v3590_v31  ;;  %v3591_v51 = vshrl.u32 %v3590_v31, 5  ;;  %v6420_v18 = vadd.s32 1, %v4564_v12 }
 0x261   :  { %v3351_v54 = vsel %vm3268_vm10, %v3350_v10, %v3349_v44  ;;  %vm3362_vm8 = vcmp.eq.s32.totalorder %v6404_v43, 0  ;;  %vm3361_vm10 = vcmp.lt.s32.totalorder %v6404_v43, 2  ;;  %vm6436_vm11 = vcmp.eq.s32.totalorder %v4127_v8, 1 }
 0x262   :  { %v3354_v41 = vsel %vm6388_vm4, %v5971_v53, %v3351_v54  ;;  %v4553_v38 = vmin.u32 %v3540_v35, %v6397_v0  ;;  %v3593_v49 = vsub.s32 32, %v3592_v42  ;;  %v3595_v14 = vshll.u32 %v5379_v19, %v3592_v42 }
 0x263   :  { %5200 = vcosq.f32 %v3354_v41  ;;  %v3598_v3 = vshll.u32 %v5380_v22, %v3592_v42  ;;  %v3601_v57 = vshll.u32 %v5381_v26, %v3592_v42  ;;  %v3604_v56 = vshll.u32 %v5382_v30, %v3592_v42 }
 0x264   :  { %5202 = vsinq.f32 %v3354_v41  ;;  %v3542_v33 = vclz %v4553_v38  ;;  %v3596_v40 = vshrl.u32 %v5380_v22, %v3593_v49  ;;  %v3599_v63 = vshrl.u32 %v5381_v26, %v3593_v49 }
 0x265   :  { %v3594_v27 = vshrl.u32 %v5379_v19, %v3593_v49  ;;  %v3602_v52 = vshrl.u32 %v5382_v30, %v3593_v49  ;;  %v3605_v4 = vshrl.u32 %v5383_v32, %v3593_v49  ;;  %v3607_v36 = vshll.u32 %v5383_v32, %v3592_v42 }
 0x266   :  { %v4554_v47 = vadd.s32 4294967294, %v3542_v33  ;;  %v3597_v60 = vor.u32 %v3596_v40, %v3595_v14  ;;  %v3600_v50 = vor.u32 %v3599_v63, %v3598_v3  ;;  %v3608_v1 = vshrl.u32 %v5384_v45, %v3593_v49 }
 0x267   :  { %v3603_v44 = vor.u32 %v3602_v52, %v3601_v57  ;;  %v3606_v39 = vor.u32 %v3605_v4, %v3604_v56  ;;  %vm3610_vm12 = vcmp.lt.s32.totalorder %v3591_v51, 1  ;;  %vm3611_vm13 = vcmp.lt.s32.totalorder %v3591_v51, 2 }
 0x268   :  { %vm4555_vm9 = vcmp.lt.s32.totalorder %v4554_v47, 0  ;;  %vm3358_vm14 = vweird.f32 %v5971_v53  ;;  %v3609_v31 = vor.u32 %v3608_v1, %v3607_v36  ;;  %vm3612_vm15 = vcmp.lt.s32.totalorder %v3591_v51, 3 }
 0x269   :  { %v3545_v10 = vsel %vm4555_vm9, 0, %v4554_v47  ;;  %vm6443_vm0 = vcmp.le.f32.partialorder %v3474_v25, 0.7853982  ;;  %vm3613_vm1 = vcmp.lt.s32.totalorder %v3591_v51, 4  ;;  %v3614_v54 = vsel %vm3610_vm12, %v3594_v27, %v3597_v60 }
 0x26a   :  { %v3546_v58 = vsub.s32 32, %v3545_v10  ;;  %v3550_v35 = vsub.s32 4294967266, %v3545_v10  ;;  %v3547_v8 = vshll.u32 %v6397_v0, %v3545_v10  ;;  %v3618_v42 = vsel %vm3610_vm12, %v3597_v60, %v3600_v50 }
 0x26b   :  { %v3615_v49 = vsel %vm3613_vm1, %v3603_v44, 2102212464  ;;  %v3619_v33 = vsel %vm3613_vm1, %v3606_v39, 920167782  ;;  %v3622_v25 = vsel %vm3610_vm12, %v3600_v50, %v3603_v44  ;;  %v3623_v63 = vsel %vm3613_vm1, %v3609_v31, 1326507024 }
 0x26c   :  { %v3548_v41 = vshrl.u32 %v3530_v15, %v3546_v58  ;;  %v3551_v38 = vadd.s32 127, %v3550_v35  ;;  %v3616_v40 = vsel %vm3612_vm15, %v3600_v50, %v3615_v49  ;;  %v3620_v3 = vsel %vm3612_vm15, %v3603_v44, %v3619_v33 }
 0x26d   :  { %v5201_v14 = vpop.eup %5200  ;;  %vm3797_vm2 = vcmp.gt.s32.totalorder %v6420_v18, 0  ;;  %v3617_v15 = vsel %vm3611_vm13, %v3614_v54, %v3616_v40  ;;  %v3621_v60 = vsel %vm3611_vm13, %v3618_v42, %v3620_v3  ;;  %v3624_v56 = vsel %vm3612_vm15, %v3606_v39, %v3623_v63 }
 0x26e   :  { %v5203_v47 = vpop.eup %5202  ;;  %v3366_v57 = vxor.u32 2147483648, %v5201_v14  ;;  %v3549_v0 = vor.u32 %v3548_v41, %v3547_v8  ;;  %v3552_v52 = vshll.u32 %v3551_v38, 23  ;;  %v3625_v10 = vsel %vm3611_vm13, %v3622_v25, %v3624_v56 }
 0x26f   :  { %v3363_v27 = vxor.u32 2147483648, %v5203_v47  ;;  %v6469_v8 = vmul.u32.u64.low %v6418_v16, %v3625_v10  ;;  %v6470_v39 = vmul.u32.u64.high %v6418_v16, %v3625_v10, %v6469_v8  ;;  %v3798_v54 = vsel %vm3797_vm2, %v6420_v18, 0 }
 0x270   :  { %v6457_v4 = vpop.f32.mrb[12].mxu0  ;;  %v6459_v36 = vpop.f32.mrb[12].mxu1  ;;  %v3367_v50 = vsel %vm3365_vm7, %v3366_v57, %v5203_v47  ;;  %v3553_v44 = vor.u32 4788187, %v3552_v52  ;;  %v3556_v1 = vcvt.s32.f32 %v3549_v0  ;;  %v4135_v25 = vrot.slane %v5662_v34, %v5967_v20 }
 0x271   :  { %v6464_v58 = vpop.f32.mrb[13].mxu0  ;;  %v4625_v35 = vpop.f32.mrb[13].mxu1  ;;  %v3364_v31 = vsel %vm3362_vm8, %v5201_v14, %v3363_v27  ;;  %v6476_v51 = vmul.u32.u64.low %v6418_v16, %v3621_v60  ;;  %v6477_v33 = vmul.u32.u64.high %v6418_v16, %v3621_v60, %v6476_v51  ;;  %v3800_v18 = vand.u32 31, %v3798_v54 }
 0x272   :  { %v4595_v42 = vpop.f32.mrb[14].mxu0  ;;  %v2579_v41 = vpop.f32.mrb[14].mxu1  ;;  %v3368_v38 = vsel %vm3361_vm10, %v3364_v31, %v3367_v50  ;;  %v3554_v49 = vand.u32 2147483647, %v3553_v44  ;;  %v2625_v63 = vrot.slane %v6292_v24, %v5530_v11  ;;  %v3563_v57 = vsel %vm6443_vm0, 0, %v6416_v29 }
 0x273   :  { %v4596_v40 = vpop.f32.mrb[15].mxu0  ;;  %v4626_v3 = vpop.f32.mrb[15].mxu1  ;;  %v3369_v14 = vsel %vm3358_vm14, nan, %v3368_v38  ;;  %v3793_v53 = vand.u32 8388607, %v3786_v59  ;;  %v3633_v0 = vmul.u32 %v6418_v16, %v3617_v15  ;;  %vm3635_vm3 = vc.u32 %v6470_v39, %v6476_v51 }
 0x274   :  { %v4174_v43 = vsel %vm6436_vm11, %v5925_v55, %v3369_v14  ;;  %v3557_v47 = vmul.f32 %v3556_v1, %v3554_v49  ;;  %v6497_v52 = vshrl.u32 %v3798_v54, 5  ;;  %v3801_v27 = vsub.s32 32, %v3800_v18 }
 0x275   :  { %4187 = vst [vmem:[#allocation11 + $0x28] sm:$0xff] %v4174_v43  ;;  %v3636_v55 = vadd.s32 1, %v6477_v33  ;;  %v3803_v56 = vshll.u32 %v5379_v19, %v3800_v18  ;;  %v3806_v29 = vshll.u32 %v5380_v22, %v3800_v18  ;;  %v3809_v16 = vshll.u32 %v5381_v26, %v3800_v18 }
 0x276   :  { %v3558_v60 = vxor.u32 2147483648, %v3557_v47  ;;  %v3804_v50 = vshrl.u32 %v5380_v22, %v3801_v27  ;;  %v3807_v44 = vshrl.u32 %v5381_v26, %v3801_v27  ;;  %v3810_v15 = vshrl.u32 %v5382_v30, %v3801_v27 }
 0x277   :  { %v3637_v10 = vsel %vm3635_vm3, %v3636_v55, %v6477_v33  ;;  %v3812_v35 = vshll.u32 %v5382_v30, %v3800_v18  ;;  %v3813_v31 = vshrl.u32 %v5383_v32, %v3801_v27  ;;  %vm4101_vm4 = vcmp.ne.f32.partialorder %v4099_v61, 0.0 }
 0x278   :  { %v3559_v1 = vsel %vm3476_vm6, %v3558_v60, %v3557_v47  ;;  %v3638_v54 = vadd.s32 %v3637_v10, %v3633_v0  ;;  %v3805_v42 = vor.u32 %v3804_v50, %v3803_v56  ;;  %v3808_v41 = vor.u32 %v3807_v44, %v3806_v29 }
 0x279   :  { %v3562_v8 = vsel %vm6443_vm0, %v6142_v13, %v3559_v1  ;;  %v3811_v38 = vor.u32 %v3810_v15, %v3809_v16  ;;  %v3814_v49 = vor.u32 %v3813_v31, %v3812_v35  ;;  %v2660_v40 = vmul.f32 %v2625_v63, %v6349_v21 }
 0x27a   :  { %5204 = vcosq.f32 %v3562_v8  ;;  %v3639_v3 = vadd.s32 536870912, %v3638_v54  ;;  %v3815_v33 = vshll.u32 %v5383_v32, %v3800_v18  ;;  %v3816_v14 = vshrl.u32 %v5384_v45, %v3801_v27 }
 0x27b   :  { %5206 = vsinq.f32 %v3562_v8  ;;  %v3567_v43 = vadd.s32 3, %v3563_v57  ;;  %v3794_v47 = vor.u32 8388608, %v3793_v53  ;;  %vm3818_vm5 = vcmp.lt.s32.totalorder %v6497_v52, 1 }
 0x27c   :  { %v2707_v12 = vrot.slane %v6299_v17, %v5530_v11  ;;  %v3640_v0 = vshrl.u32 %v3639_v3, 30  ;;  %v3817_v60 = vor.u32 %v3816_v14, %v3815_v33  ;;  %vm3821_vm6 = vcmp.lt.s32.totalorder %v6497_v52, 4 }
 0x27d   :  { %v3826_v63 = vsel %vm3818_vm5, %v3805_v42, %v3808_v41  ;;  %v3802_v55 = vshrl.u32 %v5379_v19, %v3801_v27  ;;  %vm3819_vm7 = vcmp.lt.s32.totalorder %v6497_v52, 2  ;;  %vm3820_vm8 = vcmp.lt.s32.totalorder %v6497_v52, 3 }
 0x27e   :  { %v3827_v18 = vsel %vm3821_vm6, %v3814_v49, 920167782  ;;  %v3641_v57 = vshll.u32 %v3640_v0, 30  ;;  %v3823_v53 = vsel %vm3821_vm6, %v3811_v38, 2102212464  ;;  %v3830_v29 = vsel %vm3818_vm5, %v3808_v41, %v3811_v38 }
 0x27f   :  { %v3828_v56 = vsel %vm3820_vm8, %v3811_v38, %v3827_v18  ;;  %v3831_v44 = vsel %vm3821_vm6, %v3817_v60, 1326507024  ;;  %v3834_v16 = vshll.u32 %v3794_v47, 8  ;;  %v6530_v15 = vadd.f32 %v2707_v12, %v2660_v40 }
 0x280   :  { %v3829_v50 = vsel %vm3819_vm7, %v3826_v63, %v3828_v56  ;;  %v3568_v1 = vand.u32 3, %v3567_v43  ;;  %v6532_v27 = vsub.s32 %v3638_v54, %v3641_v57  ;;  %v3822_v10 = vsel %vm3818_vm5, %v3802_v55, %v3805_v42 }
 0x281   :  { %v3832_v35 = vsel %vm3820_vm8, %v3814_v49, %v3831_v44  ;;  %v3824_v31 = vsel %vm3820_vm8, %v3808_v41, %v3823_v53  ;;  %v6538_v3 = vmul.u32.u64.low %v3834_v16, %v3829_v50  ;;  %v6539_v38 = vmul.u32.u64.high %v3834_v16, %v3829_v50, %v6538_v3 }
 0x282   :  { %v3833_v8 = vsel %vm3819_vm7, %v3830_v29, %v3832_v35  ;;  %v3644_v33 = vsub.s32 0, %v6532_v27  ;;  %vm3566_vm9 = vweird.f32 %v6142_v13  ;;  %vm6550_vm10 = vcmp.eq.s32.totalorder %v4135_v25, 1 }
 0x283   :  { %v6543_v14 = vmul.u32.u64.low %v3834_v16, %v3833_v8  ;;  %v6544_v40 = vmul.u32.u64.high %v3834_v16, %v3833_v8, %v6543_v14  ;;  %v6933_v42 = vmov 0   ;;  %v3685_v49 = vand.u32 2139095040, %v6530_v15 }
 0x284   :  { %v5205_v43 = vpop.eup %5204  ;;  %v6556_v41 = vsel %vm4101_vm4, 1, %v6933_v42  ;;  %vm6561_vm11 = vcmp.le.f32.partialorder %v3578_v5, 0.7853982  ;;  %v4557_v34 = vmin.u32 %v3644_v33, %v6532_v27  ;;  %v3825_v20 = vsel %vm3819_vm7, %v3822_v10, %v3824_v31 }
 0x285   :  { %v5207_v47 = vpop.eup %5206  ;;  %v3574_v12 = vxor.u32 2147483648, %v5205_v43  ;;  %vm3573_vm12 = vcmp.eq.s32.totalorder %v3568_v1, 2  ;;  %v3844_v61 = vadd.s32 1, %v6539_v38  ;;  %v3686_v63 = vshrl.u32 %v3685_v49, 23 }
 0x286   :  { %v3571_v25 = vxor.u32 2147483648, %v5207_v47  ;;  %vm3570_vm13 = vcmp.eq.s32.totalorder %v3568_v1, 0  ;;  %v3646_v18 = vclz %v4557_v34  ;;  %v3664_v57 = vsub.s32 4, %v3640_v0 }
 0x287   :  { %v3575_v55 = vsel %vm3573_vm12, %v3574_v12, %v5207_v47  ;;  %vm3569_vm14 = vcmp.lt.s32.totalorder %v3568_v1, 2  ;;  %v3841_v5 = vmul.u32 %v3834_v16, %v3825_v20  ;;  %vm3843_vm15 = vc.u32 %v6544_v40, %v6538_v3 }
 0x288   :  { %v3572_v53 = vsel %vm3570_vm13, %v5205_v43, %v3571_v25  ;;  %v4558_v29 = vadd.s32 4294967294, %v3646_v18  ;;  %v3845_v52 = vsel %vm3843_vm15, %v3844_v61, %v6539_v38  ;;  %v4560_v50 = vadd.s32 4294967169, %v3686_v63 }
 0x289   :  { %v3576_v56 = vsel %vm3569_vm14, %v3572_v53, %v3575_v55  ;;  %vm3580_vm0 = vcmp.lt.s32.totalorder %v6360_v48, 0  ;;  %v3846_v10 = vadd.s32 %v3845_v52, %v3841_v5  ;;  %v3682_v35 = vand.u32 2147483647, %v6530_v15 }
 0x28a   :  { %v3577_v44 = vsel %vm3566_vm9, nan, %v3576_v56  ;;  %vm4559_vm1 = vcmp.lt.s32.totalorder %v4558_v29, 0  ;;  %v3665_v1 = vsel %vm3580_vm0, %v3664_v57, %v3640_v0  ;;  %v3692_v31 = vadd.s32 1, %v4560_v50 }
 0x28b   :  { %v4176_v16 = vsel %vm6550_vm10, %v5927_v62, %v3577_v44  ;;  %v3649_v8 = vsel %vm4559_vm1, 0, %v4558_v29  ;;  %v3847_v38 = vadd.s32 536870912, %v3846_v10  ;;  %v2633_v13 = vrot.slane %v6292_v24, %v5564_v37 }
 0x28c   :  { %4189 = vst [vmem:[#allocation11 + $0x38] sm:$0xff] %v4176_v16  ;;  %v6585_v33 = vadd.f32 %v6464_v58, %v6457_v4  ;;  %v3634_v14 = vadd.s32 %v6476_v51, %v6470_v39  ;;  %v3650_v43 = vsub.s32 32, %v3649_v8  ;;  %v3654_v62 = vsub.s32 4294967266, %v3649_v8 }
 0x28d   :  { %vm3693_vm2 = vcmp.gt.s32.totalorder %v3692_v31, 0  ;;  %v3667_v0 = vsel %vm6561_vm11, 0, %v3665_v1  ;;  %v3848_v54 = vshrl.u32 %v3847_v38, 30  ;;  %v3689_v42 = vand.u32 8388607, %v3682_v35 }
 0x28e   :  { %v3694_v49 = vsel %vm3693_vm2, %v3692_v31, 0  ;;  %v3651_v47 = vshll.u32 %v6532_v27, %v3649_v8  ;;  %v3652_v12 = vshrl.u32 %v3634_v14, %v3650_v43  ;;  %v3655_v34 = vadd.s32 127, %v3654_v62 }
 0x28f   :  { %v3696_v4 = vand.u32 31, %v3694_v49  ;;  %v4139_v58 = vrot.slane %v6556_v41, %v5522_v6  ;;  %vm3788_vm3 = vcmp.lt.s32.totalorder %v6376_v9, 0  ;;  %v3849_v39 = vshll.u32 %v3848_v54, 30 }
 0x290   :  { %v3653_v51 = vor.u32 %v3652_v12, %v3651_v47  ;;  %v3656_v20 = vshll.u32 %v3655_v34, 23  ;;  %v6597_v25 = vadd.s32 3, %v3667_v0  ;;  %v3842_v63 = vadd.s32 %v6538_v3, %v6544_v40 }
 0x291   :  { %v3697_v61 = vsub.s32 32, %v3696_v4  ;;  %v6601_v55 = vsub.s32 %v3846_v10, %v3849_v39  ;;  %v3690_v27 = vor.u32 8388608, %v3689_v42  ;;  %v2662_v18 = vmul.f32 %v2633_v13, %v6351_v46 }
 0x292   :  { %v3657_v57 = vor.u32 4788187, %v3656_v20  ;;  %v3872_v53 = vsub.s32 4, %v3848_v54  ;;  %v3695_v5 = vshrl.u32 %v3694_v49, 5  ;;  %v2715_v56 = vrot.slane %v6299_v17, %v5564_v37 }
 0x293   :  { %v3852_v29 = vsub.s32 0, %v6601_v55  ;;  %v3700_v52 = vshrl.u32 %v5380_v22, %v3697_v61  ;;  %v3703_v50 = vshrl.u32 %v5381_v26, %v3697_v61  ;;  %v3705_v44 = vshll.u32 %v5381_v26, %v3696_v4 }
 0x294   :  { %v3658_v3 = vand.u32 2147483647, %v3657_v57  ;;  %v3660_v40 = vcvt.s32.f32 %v3653_v51  ;;  %v3706_v10 = vshrl.u32 %v5382_v30, %v3697_v61  ;;  %v3709_v16 = vshrl.u32 %v5383_v32, %v3697_v61 }
 0x295   :  { %v4565_v1 = vmin.u32 %v3852_v29, %v6601_v55  ;;  %v3699_v31 = vshll.u32 %v5379_v19, %v3696_v4  ;;  %v3702_v8 = vshll.u32 %v5380_v22, %v3696_v4  ;;  %v3708_v38 = vshll.u32 %v5382_v30, %v3696_v4 }
 0x296   :  { %v3661_v13 = vmul.f32 %v3660_v40, %v3658_v3  ;;  %v3707_v14 = vor.u32 %v3706_v10, %v3705_v44  ;;  %v6616_v43 = vshll.u32 %v3690_v27, 8  ;;  %v6618_v62 = vadd.f32 %v2715_v56, %v2662_v18 }
 0x297   :  { %v3854_v0 = vclz %v4565_v1  ;;  %v3701_v42 = vor.u32 %v3700_v52, %v3699_v31  ;;  %v3704_v49 = vor.u32 %v3703_v50, %v3702_v8  ;;  %v3710_v47 = vor.u32 %v3709_v16, %v3708_v38 }
 0x298   :  { %v3662_v12 = vxor.u32 2147483648, %v3661_v13  ;;  %v6622_v34 = vsel %vm3788_vm3, %v3872_v53, %v3848_v54  ;;  %v3711_v39 = vshll.u32 %v5383_v32, %v3696_v4  ;;  %v3712_v51 = vshrl.u32 %v5384_v45, %v3697_v61 }
 0x299   :  { %v4566_v20 = vadd.s32 4294967294, %v3854_v0  ;;  %v3698_v57 = vshrl.u32 %v5379_v19, %v3697_v61  ;;  %vm3714_vm4 = vcmp.lt.s32.totalorder %v3695_v5, 1  ;;  %vm3717_vm5 = vcmp.lt.s32.totalorder %v3695_v5, 4 }
 0x29a   :  { %v3663_v27 = vsel %vm3580_vm0, %v3662_v12, %v3661_v13  ;;  %v3713_v18 = vor.u32 %v3712_v51, %v3711_v39  ;;  %vm3716_vm6 = vcmp.lt.s32.totalorder %v3695_v5, 3  ;;  %v3719_v56 = vsel %vm3717_vm5, %v3707_v14, 2102212464 }
 0x29b   :  { %v3666_v54 = vsel %vm6561_vm11, %v6360_v48, %v3663_v27  ;;  %vm4567_vm7 = vcmp.lt.s32.totalorder %v4566_v20, 0  ;;  %v3722_v4 = vsel %vm3714_vm4, %v3701_v42, %v3704_v49  ;;  %v3723_v53 = vsel %vm3717_vm5, %v3710_v47, 920167782 }
 0x29c   :  { %5208 = vcosq.f32 %v3666_v54  ;;  %v3857_v61 = vsel %vm4567_vm7, 0, %v4566_v20  ;;  %vm3715_vm8 = vcmp.lt.s32.totalorder %v3695_v5, 2  ;;  %v3724_v29 = vsel %vm3716_vm6, %v3707_v14, %v3723_v53 }
 0x29d   :  { %5210 = vsinq.f32 %v3666_v54  ;;  %v3858_v52 = vsub.s32 32, %v3857_v61  ;;  %v3862_v50 = vsub.s32 4294967266, %v3857_v61  ;;  %v3718_v44 = vsel %vm3714_vm4, %v3698_v57, %v3701_v42 }
 0x29e   :  { %v3720_v3 = vsel %vm3716_vm6, %v3704_v49, %v3719_v56  ;;  %v3725_v60 = vsel %vm3715_vm8, %v3722_v4, %v3724_v29  ;;  %v3726_v40 = vsel %vm3714_vm4, %v3704_v49, %v3707_v14  ;;  %v3727_v10 = vsel %vm3717_vm5, %v3713_v18, 1326507024 }
 0x29f   :  { %v3859_v16 = vshll.u32 %v6601_v55, %v3857_v61  ;;  %v3860_v1 = vshrl.u32 %v3842_v63, %v3858_v52  ;;  %v3863_v31 = vadd.s32 127, %v3862_v50  ;;  %v3728_v8 = vsel %vm3716_vm6, %v3710_v47, %v3727_v10 }
 0x2a0   :  { %v3729_v38 = vsel %vm3715_vm8, %v3726_v40, %v3728_v8  ;;  %v6645_v13 = vmul.u32.u64.low %v6616_v43, %v3725_v60  ;;  %v6646_v0 = vmul.u32.u64.high %v6616_v43, %v3725_v60, %v6645_v13  ;;  %v3893_v42 = vand.u32 2139095040, %v6618_v62 }
 0x2a1   :  { %v3861_v12 = vor.u32 %v3860_v1, %v3859_v16  ;;  %v3864_v39 = vshll.u32 %v3863_v31, 23  ;;  %v6651_v14 = vmul.u32.u64.low %v6616_v43, %v3729_v38  ;;  %v6652_v49 = vmul.u32.u64.high %v6616_v43, %v3729_v38, %v6651_v14 }
 0x2a2   :  { %v3721_v63 = vsel %vm3715_vm8, %v3718_v44, %v3720_v3  ;;  %v3894_v55 = vshrl.u32 %v3893_v42, 23  ;;  %v6657_v47 = vadd.f32 %v6585_v33, %v6459_v36  ;;  %v3672_v51 = vand.u32 3, %v6597_v25 }
 0x2a3   :  { %vm6662_vm9 = vcmp.le.f32.partialorder %v3786_v59, 0.7853982  ;;  %v3865_v57 = vor.u32 4788187, %v3864_v39  ;;  %vm6669_vm10 = vcmp.eq.s32.totalorder %v4139_v58, 1  ;;  %v3740_v33 = vadd.s32 1, %v6646_v0 }
 0x2a4   :  { %v3875_v36 = vsel %vm6662_vm9, 0, %v6622_v34  ;;  %v4568_v25 = vadd.s32 4294967169, %v3894_v55  ;;  %v3868_v59 = vcvt.s32.f32 %v3861_v12  ;;  %v3737_v18 = vmul.u32 %v6616_v43, %v3721_v63 }
 0x2a5   :  { %v3866_v27 = vand.u32 2147483647, %v3865_v57  ;;  %vm3739_vm11 = vc.u32 %v6652_v49, %v6645_v13  ;;  %vm3670_vm12 = vweird.f32 %v6360_v48  ;;  %v3890_v58 = vand.u32 2147483647, %v6618_v62 }
 0x2a6   :  { %v5209_v56 = vpop.eup %5208  ;;  %v3741_v6 = vsel %vm3739_vm11, %v3740_v33, %v6646_v0  ;;  %v3900_v54 = vadd.s32 1, %v4568_v25  ;;  %vm3674_vm13 = vcmp.eq.s32.totalorder %v3672_v51, 0  ;;  %vm3677_vm14 = vcmp.eq.s32.totalorder %v3672_v51, 2 }
 0x2a7   :  { %v5211_v4 = vpop.eup %5210  ;;  %v3678_v34 = vxor.u32 2147483648, %v5209_v56  ;;  %v3869_v53 = vmul.f32 %v3868_v59, %v3866_v27  ;;  %v3742_v61 = vadd.s32 %v3741_v6, %v3737_v18  ;;  %v3879_v52 = vadd.s32 3, %v3875_v36 }
 0x2a8   :  { %v3675_v29 = vxor.u32 2147483648, %v5211_v4  ;;  %vm3901_vm15 = vcmp.gt.s32.totalorder %v3900_v54, 0  ;;  %vm3673_vm0 = vcmp.lt.s32.totalorder %v3672_v51, 2  ;;  %v3897_v40 = vand.u32 8388607, %v3890_v58 }
 0x2a9   :  { %v3679_v43 = vsel %vm3677_vm14, %v3678_v34, %v5211_v4  ;;  %v3870_v50 = vxor.u32 2147483648, %v3869_v53  ;;  %v3743_v44 = vadd.s32 536870912, %v3742_v61  ;;  %v3902_v3 = vsel %vm3901_vm15, %v3900_v54, 0 }
 0x2aa   :  { %v3676_v60 = vsel %vm3674_vm13, %v5209_v56, %v3675_v29  ;;  %v3904_v10 = vand.u32 31, %v3902_v3  ;;  %v2637_v8 = vrot.slane %v6292_v24, %v5885_v23  ;;  %v4147_v42 = vrot.slane %v6556_v41, %v5525_v7 }
 0x2ab   :  { %v3680_v16 = vsel %vm3673_vm0, %v3676_v60, %v3679_v43  ;;  %v3871_v1 = vsel %vm3788_vm3, %v3870_v50, %v3869_v53  ;;  %v6687_v31 = vshrl.u32 %v3743_v44, 30  ;;  %v6701_v14 = vand.u32 3, %v3879_v52 }
 0x2ac   :  { %v3681_v38 = vsel %vm3670_vm12, nan, %v3680_v16  ;;  %v3874_v0 = vsel %vm6662_vm9, %v6376_v9, %v3871_v1  ;;  %v3905_v12 = vsub.s32 32, %v3904_v10  ;;  %v3898_v48 = vor.u32 8388608, %v3897_v40 }
 0x2ad   :  { %v4177_v39 = vsel %vm6669_vm10, %v6339_v2, %v3681_v38  ;;  %5212 = vcosq.f32 %v3874_v0  ;;  %v3745_v24 = vshll.u32 %v6687_v31, 30  ;;  %v2719_v55 = vrot.slane %v6299_v17, %v5885_v23 }
 0x2ae   :  { %4190 = vst [vmem:[#allocation11 + $0x40] sm:$0xff] %v4177_v39  ;;  %5214 = vsinq.f32 %v3874_v0  ;;  %v3908_v63 = vshrl.u32 %v5380_v22, %v3905_v12  ;;  %v3907_v7 = vshll.u32 %v5379_v19, %v3904_v10  ;;  %v3911_v20 = vshrl.u32 %v5381_v26, %v3905_v12 }
 0x2af   :  { %v6707_v51 = vsub.s32 %v3742_v61, %v3745_v24  ;;  %v2663_v2 = vmul.f32 %v2637_v8, %v6657_v47  ;;  %v6712_v57 = vshrl.u32 %v3902_v3, 5  ;;  %v3910_v5 = vshll.u32 %v5380_v22, %v3904_v10 }
 0x2b0   :  { %v3913_v36 = vshll.u32 %v5381_v26, %v3904_v10  ;;  %v3914_v33 = vshrl.u32 %v5382_v30, %v3905_v12  ;;  %v3909_v27 = vor.u32 %v3908_v63, %v3907_v7  ;;  %v3916_v17 = vshll.u32 %v5382_v30, %v3904_v10 }
 0x2b1   :  { %v3748_v25 = vsub.s32 0, %v6707_v51  ;;  %v3917_v59 = vshrl.u32 %v5383_v32, %v3905_v12  ;;  %vm3882_vm1 = vcmp.eq.s32.totalorder %v6701_v14, 0  ;;  %v3912_v18 = vor.u32 %v3911_v20, %v3910_v5 }
 0x2b2   :  { %v3915_v56 = vor.u32 %v3914_v33, %v3913_v36  ;;  %v3919_v6 = vshll.u32 %v5383_v32, %v3904_v10  ;;  %v3920_v54 = vshrl.u32 %v5384_v45, %v3905_v12  ;;  %vm3881_vm2 = vcmp.lt.s32.totalorder %v6701_v14, 2 }
 0x2b3   :  { %vm3885_vm3 = vcmp.eq.s32.totalorder %v6701_v14, 2  ;;  %vm6725_vm4 = vcmp.eq.s32.totalorder %v4147_v42, 1  ;;  %v3738_v34 = vadd.s32 %v6645_v13, %v6652_v49  ;;  %v4561_v53 = vmin.u32 %v3748_v25, %v6707_v51 }
 0x2b4   :  { %v3918_v61 = vor.u32 %v3917_v59, %v3916_v17  ;;  %vm3878_vm5 = vweird.f32 %v6376_v9  ;;  %v3768_v29 = vsub.s32 4, %v6687_v31  ;;  %v3921_v52 = vor.u32 %v3920_v54, %v3919_v6 }
 0x2b5   :  { %v3938_v43 = vshll.u32 %v3898_v48, 8  ;;  %v6734_v50 = vadd.f32 %v2719_v55, %v2663_v2  ;;  %v3750_v44 = vclz %v4561_v53  ;;  %v3906_v3 = vshrl.u32 %v5379_v19, %v3905_v12 }
 0x2b6   :  { %vm3922_vm6 = vcmp.lt.s32.totalorder %v6712_v57, 1  ;;  %vm3925_vm7 = vcmp.lt.s32.totalorder %v6712_v57, 4  ;;  %vm3924_vm8 = vcmp.lt.s32.totalorder %v6712_v57, 3  ;;  %vm3923_vm9 = vcmp.lt.s32.totalorder %v6712_v57, 2 }
 0x2b7   :  { %v3930_v13 = vsel %vm3922_vm6, %v3909_v27, %v3912_v18  ;;  %v3931_v49 = vsel %vm3925_vm7, %v3918_v61, 920167782  ;;  %v3934_v60 = vsel %vm3922_vm6, %v3912_v18, %v3915_v56  ;;  %v5213_v40 = vpop.eup %5212  ;;  %v4562_v10 = vadd.s32 4294967294, %v3750_v44 }
 0x2b8   :  { %v3932_v16 = vsel %vm3924_vm8, %v3915_v56, %v3931_v49  ;;  %v3935_v1 = vsel %vm3925_vm7, %v3921_v52, 1326507024  ;;  %v5215_v8 = vpop.eup %5214  ;;  %v3886_v38 = vxor.u32 2147483648, %v5213_v40  ;;  %v3926_v0 = vsel %vm3922_vm6, %v3906_v3, %v3909_v27 }
 0x2b9   :  { %v3927_v42 = vsel %vm3925_vm7, %v3915_v56, 2102212464  ;;  %v3936_v12 = vsel %vm3924_vm8, %v3918_v61, %v3935_v1  ;;  %v3883_v39 = vxor.u32 2147483648, %v5215_v8  ;;  %vm4563_vm10 = vcmp.lt.s32.totalorder %v4562_v10, 0 }
 0x2ba   :  { %v3933_v24 = vsel %vm3923_vm9, %v3930_v13, %v3932_v16  ;;  %v3937_v48 = vsel %vm3923_vm9, %v3934_v60, %v3936_v12  ;;  %v3887_v63 = vsel %vm3885_vm3, %v3886_v38, %v5215_v8  ;;  %v3753_v55 = vsel %vm4563_vm10, 0, %v4562_v10 }
 0x2bb   :  { %v6751_v7 = vmul.u32.u64.low %v3938_v43, %v3937_v48  ;;  %v6752_v20 = vmul.u32.u64.high %v3938_v43, %v3937_v48, %v6751_v7  ;;  %v3884_v2 = vsel %vm3882_vm1, %v5213_v40, %v3883_v39  ;;  %v3754_v5 = vsub.s32 32, %v3753_v55 }
 0x2bc   :  { %v3758_v36 = vsub.s32 4294967266, %v3753_v55  ;;  %v3928_v33 = vsel %vm3924_vm8, %v3912_v18, %v3927_v42  ;;  %v3888_v25 = vsel %vm3881_vm2, %v3884_v2, %v3887_v63  ;;  %v3755_v27 = vshll.u32 %v6707_v51, %v3753_v55 }
 0x2bd   :  { %v6761_v17 = vmul.u32.u64.low %v3938_v43, %v3933_v24  ;;  %v6762_v59 = vmul.u32.u64.high %v3938_v43, %v3933_v24, %v6761_v17  ;;  %v3889_v56 = vsel %vm3878_vm5, nan, %v3888_v25  ;;  %v3756_v6 = vshrl.u32 %v3738_v34, %v3754_v5 }
 0x2be   :  { %v3759_v54 = vadd.s32 127, %v3758_v36  ;;  %v3997_v53 = vand.u32 2139095040, %v6734_v50  ;;  %v4179_v18 = vsel %vm6725_vm4, %v6341_v28, %v3889_v56  ;;  %v3929_v14 = vsel %vm3923_vm9, %v3926_v0, %v3928_v33 }
 0x2bf   :  { %4192 = vst [vmem:[#allocation11 + $0x50] sm:$0xff] %v4179_v18  ;;  %v3757_v51 = vor.u32 %v3756_v6, %v3755_v27  ;;  %vm3947_vm11 = vc.u32 %v6752_v20, %v6761_v17  ;;  %vm3684_vm12 = vcmp.lt.s32.totalorder %v6530_v15, 0  ;;  %v3948_v9 = vadd.s32 1, %v6762_v59 }
 0x2c0   :  { %v3760_v61 = vshll.u32 %v3759_v54, 23  ;;  %v3998_v52 = vshrl.u32 %v3997_v53, 23  ;;  %v3769_v4 = vsel %vm3684_vm12, %v3768_v29, %v6687_v31  ;;  %v3945_v28 = vmul.u32 %v3938_v43, %v3929_v14 }
 0x2c1   :  { %vm6782_vm13 = vcmp.le.f32.partialorder %v3682_v35, 0.7853982  ;;  %v3949_v3 = vsel %vm3947_vm11, %v3948_v9, %v6762_v59  ;;  %v3764_v49 = vcvt.s32.f32 %v3757_v51  ;;  %v3994_v16 = vand.u32 2147483647, %v6734_v50 }
 0x2c2   :  { %v3761_v34 = vor.u32 4788187, %v3760_v61  ;;  %v4572_v44 = vadd.s32 4294967169, %v3998_v52  ;;  %v3950_v60 = vadd.s32 %v3949_v3, %v3945_v28  ;;  %v3771_v10 = vsel %vm6782_vm13, 0, %v3769_v4 }
 0x2c3   :  { %v3775_v35 = vadd.s32 3, %v3771_v10  ;;  %v4001_v0 = vand.u32 8388607, %v3994_v16  ;;  %v4143_v63 = vrot.slane %v6556_v41, %v5530_v11  ;;  %vm3774_vm8 = vweird.f32 %v6530_v15 }
 0x2c4   :  { %v3762_v13 = vand.u32 2147483647, %v3761_v34  ;;  %v4004_v40 = vadd.s32 1, %v4572_v44  ;;  %v3951_v29 = vadd.s32 536870912, %v3950_v60  ;;  %vm3892_vm10 = vcmp.lt.s32.totalorder %v6618_v62, 0 }
 0x2c5   :  { %v6800_v48 = vand.u32 3, %v3775_v35  ;;  %v4002_v7 = vor.u32 8388608, %v4001_v0  ;;  %vm6821_vm2 = vcmp.eq.s32.totalorder %v4143_v63, 1  ;;  %vm3891_vm11 = vcmp.le.f32.partialorder %v3890_v58, 0.7853982 }
 0x2c6   :  { %v3765_v31 = vmul.f32 %v3764_v49, %v3762_v13  ;;  %vm4005_vm14 = vcmp.gt.s32.totalorder %v4004_v40, 0  ;;  %v6790_v8 = vshrl.u32 %v3951_v29, 30 }
 0x2c7   :  { %v4006_v43 = vsel %vm4005_vm14, %v4004_v40, 0  ;;  %vm3777_vm15 = vcmp.lt.s32.totalorder %v6800_v48, 2  ;;  %vm3778_vm0 = vcmp.eq.s32.totalorder %v6800_v48, 0  ;;  %vm3781_vm1 = vcmp.eq.s32.totalorder %v6800_v48, 2 }
 0x2c8   :  { %v3766_v1 = vxor.u32 2147483648, %v3765_v31  ;;  %v4008_v38 = vand.u32 31, %v4006_v43  ;;  %v3953_v12 = vshll.u32 %v6790_v8, 30  ;;  %v4007_v59 = vshrl.u32 %v4006_v43, 5 }
 0x2ca   :  { %v3767_v42 = vsel %vm3684_vm12, %v3766_v1, %v3765_v31  ;;  %v4009_v39 = vsub.s32 32, %v4008_v38  ;;  %v6804_v55 = vsub.s32 %v3950_v60, %v3953_v12  ;;  %v4014_v33 = vshll.u32 %v5380_v22, %v4008_v38 }
 0x2cb   :  { %v3770_v24 = vsel %vm6782_vm13, %v6530_v15, %v3767_v42  ;;  %v4017_v25 = vshll.u32 %v5381_v26, %v4008_v38  ;;  %v4011_v56 = vshll.u32 %v5379_v19, %v4008_v38  ;;  %v4020_v11 = vshll.u32 %v5382_v30, %v4008_v38 }
 0x2cc   :  { %5216 = vcosq.f32 %v3770_v24  ;;  %v4012_v2 = vshrl.u32 %v5380_v22, %v4009_v39  ;;  %v4015_v5 = vshrl.u32 %v5381_v26, %v4009_v39  ;;  %v3956_v36 = vsub.s32 0, %v6804_v55 }
 0x2cd   :  { %5218 = vsinq.f32 %v3770_v24  ;;  %v4018_v27 = vshrl.u32 %v5382_v30, %v4009_v39  ;;  %v4021_v6 = vshrl.u32 %v5383_v32, %v4009_v39  ;;  %v4024_v14 = vshrl.u32 %v5384_v45, %v4009_v39 }
 0x2ce   :  { %v4569_v54 = vmin.u32 %v3956_v36, %v6804_v55  ;;  %v4016_v53 = vor.u32 %v4015_v5, %v4014_v33  ;;  %v4013_v51 = vor.u32 %v4012_v2, %v4011_v56  ;;  %v4023_v22 = vshll.u32 %v5383_v32, %v4008_v38 }
 0x2cf   :  { %v4019_v18 = vor.u32 %v4018_v27, %v4017_v25  ;;  %v4022_v61 = vor.u32 %v4021_v6, %v4020_v11  ;;  %v3946_v30 = vadd.s32 %v6761_v17, %v6752_v20  ;;  %vm4026_vm3 = vcmp.lt.s32.totalorder %v4007_v59, 1 }
 0x2d0   :  { %v3958_v52 = vclz %v4569_v54  ;;  %v4025_v9 = vor.u32 %v4024_v14, %v4023_v22  ;;  %vm4029_vm4 = vcmp.lt.s32.totalorder %v4007_v59, 4  ;;  %v4042_v45 = vshll.u32 %v4002_v7, 8 }
 0x2d1   :  { %vm4028_vm5 = vcmp.lt.s32.totalorder %v4007_v59, 3  ;;  %v4035_v32 = vsel %vm4029_vm4, %v4022_v61, 920167782  ;;  %v4038_v4 = vsel %vm4026_vm3, %v4016_v53, %v4019_v18  ;;  %v4010_v28 = vshrl.u32 %v5379_v19, %v4009_v39 }
 0x2d2   :  { %v4570_v34 = vadd.s32 4294967294, %v3958_v52  ;;  %v4034_v44 = vsel %vm4026_vm3, %v4013_v51, %v4016_v53  ;;  %v4036_v57 = vsel %vm4028_vm5, %v4019_v18, %v4035_v32  ;;  %v4039_v3 = vsel %vm4029_vm4, %v4025_v9, 1326507024 }
 0x2d3   :  { %vm4027_vm7 = vcmp.lt.s32.totalorder %v4007_v59, 2  ;;  %v4031_v20 = vsel %vm4029_vm4, %v4019_v18, 2102212464  ;;  %v4040_v17 = vsel %vm4028_vm5, %v4022_v61, %v4039_v3  ;;  %v4030_v10 = vsel %vm4026_vm3, %v4010_v28, %v4013_v51 }
 0x2d4   :  { %vm4571_vm6 = vcmp.lt.s32.totalorder %v4570_v34, 0  ;;  %v4041_v31 = vsel %vm4027_vm7, %v4038_v4, %v4040_v17  ;;  %v4037_v1 = vsel %vm4027_vm7, %v4034_v44, %v4036_v57  ;;  %v4032_v38 = vsel %vm4028_vm5, %v4016_v53, %v4031_v20 }
 0x2d5   :  { %v3961_v40 = vsel %vm4571_vm6, 0, %v4570_v34  ;;  %v6838_v0 = vmul.u32.u64.low %v4042_v45, %v4041_v31  ;;  %v6839_v42 = vmul.u32.u64.high %v4042_v45, %v4041_v31, %v6838_v0  ;;  %v4033_v56 = vsel %vm4027_vm7, %v4030_v10, %v4032_v38 }
 0x2d6   :  { %v5217_v13 = vpop.eup %5216  ;;  %v3962_v19 = vsub.s32 32, %v3961_v40  ;;  %v3966_v43 = vsub.s32 4294967266, %v3961_v40  ;;  %v3963_v39 = vshll.u32 %v6804_v55, %v3961_v40  ;;  %v4049_v6 = vmul.u32 %v4042_v45, %v4033_v56 }
 0x2d7   :  { %v5219_v49 = vpop.eup %5218  ;;  %v3782_v60 = vxor.u32 2147483648, %v5217_v13  ;;  %v6847_v2 = vmul.u32.u64.low %v4042_v45, %v4037_v1  ;;  %v6848_v5 = vmul.u32.u64.high %v4042_v45, %v4037_v1, %v6847_v2  ;;  %v3976_v18 = vsub.s32 4, %v6790_v8 }
 0x2d8   :  { %v3779_v29 = vxor.u32 2147483648, %v5219_v49  ;;  %v3964_v24 = vshrl.u32 %v3946_v30, %v3962_v19  ;;  %v3967_v63 = vadd.s32 127, %v3966_v43  ;;  %v4151_v28 = vrot.slane %v6556_v41, %v5564_v37 }
 0x2d9   :  { %v3783_v35 = vsel %vm3781_vm1, %v3782_v60, %v5219_v49  ;;  %vm4051_vm9 = vc.u32 %v6839_v42, %v6847_v2  ;;  %v4052_v15 = vadd.s32 1, %v6848_v5  ;;  %v3977_v59 = vsel %vm3892_vm10, %v3976_v18, %v6790_v8 }
 0x2da   :  { %v3780_v12 = vsel %vm3778_vm0, %v5217_v13, %v3779_v29  ;;  %v3965_v33 = vor.u32 %v3964_v24, %v3963_v39  ;;  %v3968_v25 = vshll.u32 %v3967_v63, 23  ;;  %v3979_v52 = vsel %vm3891_vm11, 0, %v3977_v59 }
 0x2db   :  { %v3784_v7 = vsel %vm3777_vm15, %v3780_v12, %v3783_v35  ;;  %v4053_v54 = vsel %vm4051_vm9, %v4052_v15, %v6848_v5  ;;  %v3983_v45 = vadd.s32 3, %v3979_v52  ;;  %vm6865_vm13 = vcmp.eq.s32.totalorder %v4151_v28, 1 }
 0x2dc   :  { %v3785_v36 = vsel %vm3774_vm8, nan, %v3784_v7  ;;  %v3969_v55 = vor.u32 4788187, %v3968_v25  ;;  %v3972_v11 = vcvt.s32.f32 %v3965_v33  ;;  %v4054_v14 = vadd.s32 %v4053_v54, %v4049_v6 }
 0x2dd   :  { %v4178_v27 = vsel %vm6821_vm2, %v6349_v21, %v3785_v36  ;;  %v3984_v4 = vand.u32 3, %v3983_v45  ;;  %v4050_v40 = vadd.s32 %v6847_v2, %v6839_v42  ;;  %vm3982_vm1 = vweird.f32 %v6618_v62 }
 0x2de   :  { %4191 = vst [vmem:[#allocation11 + $0x48] sm:$0xff] %v4178_v27  ;;  %v3970_v48 = vand.u32 2147483647, %v3969_v55  ;;  %v4055_v61 = vadd.s32 536870912, %v4054_v14  ;;  %vm3996_vm2 = vcmp.lt.s32.totalorder %v6734_v50, 0  ;;  %v4155_v27 = vrot.slane %v6556_v41, %v5885_v23 }
 0x2df   :  { %vm3989_vm12 = vcmp.eq.s32.totalorder %v3984_v4, 2  ;;  %vm3985_vm15 = vcmp.lt.s32.totalorder %v3984_v4, 2  ;;  %vm3986_vm0 = vcmp.eq.s32.totalorder %v3984_v4, 0  ;;  %vm3995_vm3 = vcmp.le.f32.partialorder %v3994_v16, 0.7853982 }
 0x2e0   :  { %v3973_v53 = vmul.f32 %v3972_v11, %v3970_v48  ;;  %v4056_v22 = vshrl.u32 %v4055_v61, 30  ;;  %vm4168_vm7 = vcmp.eq.s32.totalorder %v4155_v27, 1  ;;  %vm4086_vm8 = vweird.f32 %v6734_v50 }
 0x2e2   :  { %v3974_v51 = vxor.u32 2147483648, %v3973_v53  ;;  %v4057_v30 = vshll.u32 %v4056_v22, 30  ;;  %v4080_v63 = vsub.s32 4, %v4056_v22 }
 0x2e4   :  { %v3975_v21 = vsel %vm3892_vm10, %v3974_v51, %v3973_v53  ;;  %v4058_v9 = vsub.s32 %v4054_v14, %v4057_v30  ;;  %v4081_v2 = vsel %vm3996_vm2, %v4080_v63, %v4056_v22 }
 0x2e5   :  { %v3978_v26 = vsel %vm3891_vm11, %v6618_v62, %v3975_v21 }
 0x2e6   :  { %5220 = vcosq.f32 %v3978_v26  ;;  %v4060_v34 = vsub.s32 0, %v4058_v9 }
 0x2e7   :  { %5222 = vsinq.f32 %v3978_v26 }
 0x2e8   :  { %v4573_v32 = vmin.u32 %v4060_v34, %v4058_v9 }
 0x2ea   :  { %v4062_v44 = vclz %v4573_v32 }
 0x2ec   :  { %v4574_v57 = vadd.s32 4294967294, %v4062_v44 }
 0x2ee   :  { %vm4575_vm14 = vcmp.lt.s32.totalorder %v4574_v57, 0 }
 0x2ef   :  { %v4065_v49 = vsel %vm4575_vm14, 0, %v4574_v57 }
 0x2f0   :  { %v5221_v58 = vpop.eup %5220  ;;  %v4066_v37 = vsub.s32 32, %v4065_v49  ;;  %v4070_v10 = vsub.s32 4294967266, %v4065_v49  ;;  %v4067_v19 = vshll.u32 %v4058_v9, %v4065_v49 }
 0x2f1   :  { %v5223_v3 = vpop.eup %5222  ;;  %v3990_v8 = vxor.u32 2147483648, %v5221_v58 }
 0x2f2   :  { %v3987_v13 = vxor.u32 2147483648, %v5223_v3  ;;  %v4068_v43 = vshrl.u32 %v4050_v40, %v4066_v37  ;;  %v4071_v1 = vadd.s32 127, %v4070_v10 }
 0x2f3   :  { %v3991_v17 = vsel %vm3989_vm12, %v3990_v8, %v5223_v3 }
 0x2f4   :  { %v3988_v60 = vsel %vm3986_vm0, %v5221_v58, %v3987_v13  ;;  %v4069_v38 = vor.u32 %v4068_v43, %v4067_v19  ;;  %v4072_v0 = vshll.u32 %v4071_v1, 23 }
 0x2f5   :  { %v3992_v31 = vsel %vm3985_vm15, %v3988_v60, %v3991_v17 }
 0x2f6   :  { %v3993_v29 = vsel %vm3982_vm1, nan, %v3992_v31  ;;  %v4073_v12 = vor.u32 4788187, %v4072_v0  ;;  %v4076_v24 = vcvt.s32.f32 %v4069_v38 }
 0x2f7   :  { %v4180_v35 = vsel %vm6865_vm13, %v6351_v46, %v3993_v29  ;;  %v4083_v46 = vsel %vm3995_vm3, 0, %v4081_v2 }
 0x2f8   :  { %4193 = vst [vmem:[#allocation11 + $0x58] sm:$0xff] %v4180_v35  ;;  %v4074_v39 = vand.u32 2147483647, %v4073_v12  ;;  %v4087_v36 = vadd.s32 3, %v4083_v46 }
 0x2fa   :  { %v4077_v42 = vmul.f32 %v4076_v24, %v4074_v39  ;;  %v4088_v33 = vand.u32 3, %v4087_v36 }
 0x2fc   :  { %v4078_v7 = vxor.u32 2147483648, %v4077_v42  ;;  %vm4093_vm4 = vcmp.eq.s32.totalorder %v4088_v33, 2  ;;  %vm4090_vm5 = vcmp.eq.s32.totalorder %v4088_v33, 0  ;;  %vm4089_vm6 = vcmp.lt.s32.totalorder %v4088_v33, 2 }
 0x2fe   :  { %v4079_v62 = vsel %vm3996_vm2, %v4078_v7, %v4077_v42 }
 0x2ff   :  { %v4082_v5 = vsel %vm3995_vm3, %v6734_v50, %v4079_v62 }
 0x300   :  { %5224 = vcosq.f32 %v4082_v5 }
 0x301   :  { %5226 = vsinq.f32 %v4082_v5 }
 0x30a   :  { %v5225_v25 = vpop.eup %5224 }
 0x30b   :  { %v5227_v56 = vpop.eup %5226  ;;  %v4094_v55 = vxor.u32 2147483648, %v5225_v25 }
 0x30c   :  { %v4091_v15 = vxor.u32 2147483648, %v5227_v56 }
 0x30d   :  { %v4095_v48 = vsel %vm4093_vm4, %v4094_v55, %v5227_v56 }
 0x30e   :  { %v4092_v16 = vsel %vm4090_vm5, %v5225_v25, %v4091_v15 }
 0x30f   :  { %v4096_v11 = vsel %vm4089_vm6, %v4092_v16, %v4095_v48 }
 0x310   :  { %v4097_v6 = vsel %vm4086_vm8, nan, %v4096_v11 }
 0x311   :  { %v4181_v54 = vsel %vm4168_vm7, %v6657_v47, %v4097_v6 }
 0x312   :  { %4194 = vst [vmem:[#allocation11 + $0x60] sm:$0xff] %v4181_v54 }
 0x313   :  { %5350 = shalt.err (!%p5347_p2)
}
 0x314   :  { %s5351_s6 = scalar_lea.hbm %s6899_s5, 1664 }
 0x315   :  { %p5352_p3 = scmp.ne.s32.totalorder %s6899_s5, %s5351_s6  ;;  %p5355_p4 = scmp.lt.u32.totalorder %s5351_s6, %s6899_s5 }
 0x317   :  { %p5357_p5 = pnand %p5355_p4, %p5352_p3 }
 0x319   :  { %5360 = shalt.err (!%p5357_p5)
}
 0x31a   :  { %4204 = dma.vmem_to_hbm [thread:$0]  %s4202_s28, 1664, %s6899_s5, [#allocation4]  }
 0x31b   :  { %5367 = dma.done.wait [#allocation4], 1664  }
 0x31c   :  { %5368 = vsyncadd [#allocation4], 4294965632 }
 0x31d   :  { %4208 = vsyncpa [#allocation3], 1 }
 0x31e   :  { %4209 = vsyncpa [#allocation6], 1 }
 0x31f   :  { %4210 = vsyncpa [#allocation9], 1 }
 0x320   :  { %4211 = vsyncpa [#allocation4], 1 }

</bundles_post_ra>
